<compile_context>
chip_gen: v7x
topology: tpu7x:2x2x1
jax: 0.10.0
libtpu: 0.0.40
codegen_flags: <defaults>
</compile_context>

<pallas_src>
import functools

import jax
import jax.numpy as jnp
from jax.experimental import pallas as pl
from jax.experimental.pallas import tpu as pltpu

NC = 3
Z_DIM = 100

ENC_CFG = [(4, 2, 1)] * 4                       # (k, stride, pad) for encoder convs 1-4
DEC_CFG = [("relu", jnp.bfloat16), ("relu", jnp.bfloat16),
           ("relu", jnp.bfloat16), ("tanh", jnp.float32)]   # stride-2 deconvs


# ----------------------------------------------------------------------------
# Tile-size heuristics (generation aware)
# ----------------------------------------------------------------------------
def _tile_budget_bytes():
    """Per-call VMEM tile budget.  v7x has half the VMEM of v5e/v6e, so derive the cap
    from the actual chip instead of hard-coding a v6e-tuned constant."""
    try:
        cap = int(getattr(pltpu.get_tpu_info(), "vmem_capacity_bytes"))
    except Exception:                                   # conservative fallback (v7x-sized)
        cap = 64 << 20
    return max(cap // 8, 4 << 20)


_TILE_BUDGET = _tile_budget_bytes()


def _pick_tm(M, K, N, out_dtype):
    """Lane-tile size: whole M when small; otherwise >=2 tiles (keep both v7x TensorCores
    busy), multiples of 128, capped so double-buffered tiles stay inside the budget."""
    if M <= 256:
        return M
    tm = min(1024, ((M // 2 + 127) // 128) * 128)
    out_b = jnp.dtype(out_dtype).itemsize
    while tm > 128 and 2 * (K * tm * 2 + N * tm * out_b) + N * K * 2 > _TILE_BUDGET:
        tm //= 2
    return tm


# ----------------------------------------------------------------------------
# Pallas kernels
# ----------------------------------------------------------------------------
def _gemm_nt_kernel(w_ref, x_ref, b_ref, o_ref, *, act):
    """o[N, TM] = act(w[N, K] @ x[K, TM] + b[N, 1]); lane dim = M (lane-dense stores).
    Epilogue operates on the f32 accumulator (v5e has no bf16 VPU/EUP path)."""
    acc = jnp.dot(w_ref[...], x_ref[...], preferred_element_type=jnp.float32)
    acc = acc + b_ref[...]
    if act == "relu":
        acc = jnp.maximum(acc, 0.0)
    elif act == "tanh":
        acc = jnp.tanh(acc)
    o_ref[...] = acc.astype(o_ref.dtype)


def _mid_kernel(h_ref, w5_ref, b5_ref, wmu_ref, bmu_ref, wlv_ref, blv_ref, eps_ref,
                w1_ref, b1_ref, w2_ref, b2_ref, mu_ref, logvar_ref, d_ref):
    """Fused tiny dense chain: conv5-as-dense + fc head (mu/logvar) + reparameterize +
    dec_fc + 1x1-input ConvTranspose2d-as-dense — one kernel, no HBM round trips."""
    # encoder conv5 (4x4 valid conv on a 4x4 map == dense) + ReLU
    h = jnp.dot(h_ref[...], w5_ref[...], preferred_element_type=jnp.float32) + b5_ref[...]
    h = jnp.maximum(h, 0.0).astype(jnp.bfloat16)
    # encoder fc head
    mu = jnp.dot(h, wmu_ref[...], preferred_element_type=jnp.float32) + bmu_ref[...]
    logvar = jnp.dot(h, wlv_ref[...], preferred_element_type=jnp.float32) + blv_ref[...]
    mu_ref[...] = mu
    logvar_ref[...] = logvar
    # reparameterize fused into the epilogue: z = mu + eps * exp(0.5 * logvar)
    z = mu + eps_ref[...] * jnp.exp(0.5 * logvar)
    # decoder fc + ReLU
    d = jnp.dot(z.astype(jnp.bfloat16), w1_ref[...],
                preferred_element_type=jnp.float32) + b1_ref[...]
    d = jnp.maximum(d, 0.0).astype(jnp.bfloat16)
    # ConvTranspose2d(k=4, s=1, p=0) on a 1x1 spatial input == dense, + ReLU
    d = jnp.dot(d, w2_ref[...], preferred_element_type=jnp.float32) + b2_ref[...]
    d_ref[...] = jnp.maximum(d, 0.0).astype(d_ref.dtype)


# ----------------------------------------------------------------------------
# GEMM wrappers
# ----------------------------------------------------------------------------
def conv_gemm(patches, w2, bcol, act, out_dtype):
    """patches: (K, M) bf16; w2: (N, K) bf16; bcol: (N, 1) f32 -> (N, M) out_dtype."""
    K, M = patches.shape
    N = w2.shape[0]
    TM = _pick_tm(M, K, N, out_dtype)
    Mp = ((M + TM - 1) // TM) * TM
    if Mp != M:
        patches = jnp.pad(patches, ((0, 0), (0, Mp - M)))
    out = pl.pallas_call(
        functools.partial(_gemm_nt_kernel, act=act),
        out_shape=jax.ShapeDtypeStruct((N, Mp), out_dtype),
        grid=(Mp // TM,),
        in_specs=[
            pl.BlockSpec((N, K), lambda mi: (0, 0)),      # weight, resident
            pl.BlockSpec((K, TM), lambda mi: (0, mi)),    # patch tile
            pl.BlockSpec((N, 1), lambda mi: (0, 0)),      # bias column
        ],
        out_specs=pl.BlockSpec((N, TM), lambda mi: (0, mi)),
        compiler_params=pltpu.CompilerParams(dimension_semantics=("parallel",)),
    )(w2, patches, bcol)
    return out[:, :M] if Mp != M else out


def deconv_gemm(phase_patches, wph, bcol, act, out_dtype):
    """Fused 4-phase GEMM: phase_patches (4, K, M), wph (4, N, K) -> (4, N, M)."""
    _, K, M = phase_patches.shape
    N = wph.shape[1]
    TM = _pick_tm(M, K, N, out_dtype)
    Mp = ((M + TM - 1) // TM) * TM
    if Mp != M:
        phase_patches = jnp.pad(phase_patches, ((0, 0), (0, 0), (0, Mp - M)))
    out = pl.pallas_call(
        functools.partial(_gemm_nt_kernel, act=act),
        out_shape=jax.ShapeDtypeStruct((4, N, Mp), out_dtype),
        grid=(4, Mp // TM),
        in_specs=[
            pl.BlockSpec((None, N, K), lambda p, mi: (p, 0, 0)),    # per-phase weight
            pl.BlockSpec((None, K, TM), lambda p, mi: (p, 0, mi)),  # per-phase patches
            pl.BlockSpec((N, 1), lambda p, mi: (0, 0)),             # shared bias column
        ],
        out_specs=pl.BlockSpec((None, N, TM), lambda p, mi: (p, 0, mi)),
        compiler_params=pltpu.CompilerParams(
            dimension_semantics=("parallel", "parallel")),
    )(wph, phase_patches, bcol)
    return out[:, :, :M] if Mp != M else out


# ----------------------------------------------------------------------------
# Conv / ConvTranspose on top of the Pallas GEMMs (im2col glue in JAX, CNHW layout)
# ----------------------------------------------------------------------------
def conv2d_cnhw(x, w2, bcol, *, k, stride, padding, act, out_dtype=jnp.bfloat16):
    """x: (C, B, H, W) bf16 channel-major; w2: (Cout, C*k*k) bf16 -> (Cout, B, Ho, Wo)."""
    C, B, H, W = x.shape
    N = w2.shape[0]
    Ho = (H + 2 * padding - k) // stride + 1
    Wo = (W + 2 * padding - k) // stride + 1
    xb = x
    if padding > 0:
        xb = jnp.pad(xb, ((0, 0), (0, 0), (padding, padding), (padding, padding)))
    # TODO(synk): fuse the k*k tap extraction into the GEMM grid (tap grid axis with a
    # VMEM f32 accumulator / manual DMA for the stride-2 access) so patches never hit HBM.
    cols = []
    for i in range(k):
        for j in range(k):
            cols.append(xb[:, :, i:i + stride * Ho:stride, j:j + stride * Wo:stride])
    # K-major (Cin, kh, kw) matching w.reshape(Cout, -1); M = (b, ho, wo) -> batch folded
    # into the lane axis, and the GEMM output reshapes straight back to CNHW.
    patches = jnp.stack(cols, axis=1).reshape(C * k * k, B * Ho * Wo)
    out = conv_gemm(patches, w2, bcol, act, out_dtype)          # (Cout, B*Ho*Wo)
    return out.reshape(N, B, Ho, Wo)


def conv_transpose2d_s2_cnhw(x, wph, bcol, *, act, out_dtype=jnp.bfloat16):
    """PyTorch ConvTranspose2d(k=4, stride=2, padding=1) via sub-pixel decomposition:
    4 stride-1 2x2 convs on the un-dilated input, fused into ONE pallas_call."""
    C, B, H, W = x.shape
    N = wph.shape[1]
    xp = jnp.pad(x, ((0, 0), (0, 0), (1, 1), (1, 1)))           # shared 1-pixel halo
    phase_patches = []
    for ah in (0, 1):
        for aw in (0, 1):
            taps = []
            for dh in (0, 1):
                for dw in (0, 1):
                    taps.append(xp[:, :, dh + ah:dh + ah + H, dw + aw:dw + aw + W])
            phase_patches.append(jnp.stack(taps, axis=1).reshape(C * 4, B * H * W))
    patches = jnp.stack(phase_patches, axis=0)                  # (4, Cin*4, B*H*W)
    out = deconv_gemm(patches, wph, bcol, act, out_dtype)       # (4, Cout, B*H*W)
    # interleave phases once: out[co, b, 2q+ah, 2r+aw] = phase[ah,aw][co, b, q, r]
    out = out.reshape(2, 2, N, B, H, W)
    return jnp.transpose(out, (2, 3, 4, 0, 5, 1)).reshape(N, B, 2 * H, 2 * W)


def _subpixel_weights(w_t):
    """ConvTranspose2d(k=4,s=2,p=1) weight (Cin, Cout, 4, 4) -> per-phase stride-1 2x2
    conv weights (4, Cout, Cin*4); phase = ah*2+aw, K index = ci*4 + dh*2 + dw."""
    cout = w_t.shape[1]
    ws = []
    for ah in (0, 1):
        kh = slice(3, None, -2) if ah == 0 else slice(2, None, -2)   # taps (3,1)/(2,0)
        for aw in (0, 1):
            kw = slice(3, None, -2) if aw == 0 else slice(2, None, -2)
            wk = jnp.transpose(w_t[:, :, kh, kw], (1, 0, 2, 3))      # (Cout, Cin, 2, 2)
            ws.append(wk.reshape(cout, -1))
    return jnp.stack(ws, axis=0).astype(jnp.bfloat16)


# ----------------------------------------------------------------------------
# Parameters (deterministic synthetic init) + one-time kernel-side weight prep
# ----------------------------------------------------------------------------
def _kaiming(key, shape, fan_in):
    return jax.random.normal(key, shape, jnp.float32) * jnp.sqrt(2.0 / fan_in)


def init_params(key):
    keys = iter(jax.random.split(key, 16))
    p = {}
    enc_shapes = [(32, NC, 4, 4), (32, 32, 4, 4), (64, 32, 4, 4),
                  (64, 64, 4, 4), (256, 64, 4, 4)]
    p["enc_conv"] = []
    for (co, ci, k, _) in enc_shapes:
        p["enc_conv"].append((_kaiming(next(keys), (co, ci, k, k), ci * k * k),
                              jnp.zeros((co,), jnp.float32)))
    p["enc_fc"] = (_kaiming(next(keys), (2 * Z_DIM, 256), 256),
                   jnp.zeros((2 * Z_DIM,), jnp.float32))
    p["dec_fc"] = (_kaiming(next(keys), (256, Z_DIM), Z_DIM),
                   jnp.zeros((256,), jnp.float32))
    dec_shapes = [(256, 64, 4, 4), (64, 64, 4, 4), (64, 32, 4, 4),
                  (32, 32, 4, 4), (32, NC, 4, 4)]
    p["dec_convt"] = []
    for (ci, co, k, _) in dec_shapes:
        p["dec_convt"].append((_kaiming(next(keys), (ci, co, k, k), ci * k * k),
                               jnp.zeros((co,), jnp.float32)))
    return p


def prepare_params(params):
    """One-time weight prep (bf16 cast / reshape / transpose / phase split / bias
    columns), hoisted out of the jitted forward — nothing here re-runs per call."""
    pp = {}
    pp["enc_conv"] = []
    for (w, b) in params["enc_conv"][:4]:
        co = w.shape[0]
        pp["enc_conv"].append((w.reshape(co, -1).astype(jnp.bfloat16),
                               b.reshape(co, 1).astype(jnp.float32)))
    w5, b5 = params["enc_conv"][4]                  # conv5 -> dense (1024 -> 256)
    pp["w5t"] = w5.reshape(w5.shape[0], -1).T.astype(jnp.bfloat16)
    pp["b5"] = b5.reshape(1, -1).astype(jnp.float32)
    w_fc, b_fc = params["enc_fc"]
    pp["wmu"] = w_fc[:Z_DIM].T.astype(jnp.bfloat16)
    pp["wlv"] = w_fc[Z_DIM:].T.astype(jnp.bfloat16)
    pp["bmu"] = b_fc[:Z_DIM].reshape(1, Z_DIM).astype(jnp.float32)
    pp["blv"] = b_fc[Z_DIM:].reshape(1, Z_DIM).astype(jnp.float32)
    wd, bd = params["dec_fc"]
    pp["wdec_fc"] = wd.T.astype(jnp.bfloat16)
    pp["bdec_fc"] = bd.reshape(1, -1).astype(jnp.float32)
    wt0, bt0 = params["dec_convt"][0]               # 1x1-input deconv -> dense (256->1024)
    cout0, k0 = wt0.shape[1], wt0.shape[2]
    pp["wdec0"] = jnp.transpose(wt0, (1, 2, 3, 0)).reshape(cout0 * k0 * k0, -1) \
        .T.astype(jnp.bfloat16)
    pp["bdec0"] = jnp.repeat(bt0, k0 * k0).reshape(1, -1).astype(jnp.float32)
    pp["dec_convt"] = []
    for (w_t, b) in params["dec_convt"][1:]:
        pp["dec_convt"].append((_subpixel_weights(w_t),
                                b.reshape(-1, 1).astype(jnp.float32)))
    return pp


# ----------------------------------------------------------------------------
# VAE forward (9 pallas_calls total)
# ----------------------------------------------------------------------------
def vae_forward(pp, x, eps):
    B = x.shape[0]
    # NCHW -> CNHW once: channel-major activations + batch folded into the GEMM lane
    # axis mean every conv/deconv GEMM output reshapes straight back to CNHW.
    h = jnp.transpose(x, (1, 0, 2, 3)).astype(jnp.bfloat16)
    for (w2, bcol), (k, s, p) in zip(pp["enc_conv"], ENC_CFG):
        h = conv2d_cnhw(h, w2, bcol, k=k, stride=s, padding=p, act="relu")

    # conv5 + fc head + reparameterize (View((-1,256)) is just the reshape below)
    # + dec_fc + 1x1 deconv: single fused kernel.
    C4, _, H4, W4 = h.shape
    hf = jnp.transpose(h, (1, 0, 2, 3)).reshape(B, C4 * H4 * W4)   # (c,i,j) K-order
    mu, logvar, d = pl.pallas_call(
        _mid_kernel,
        out_shape=(jax.ShapeDtypeStruct((B, Z_DIM), jnp.float32),
                   jax.ShapeDtypeStruct((B, Z_DIM), jnp.float32),
                   jax.ShapeDtypeStruct((B, pp["wdec0"].shape[1]), jnp.bfloat16)),
    )(hf, pp["w5t"], pp["b5"], pp["wmu"], pp["bmu"], pp["wlv"], pp["blv"],
      eps.astype(jnp.float32), pp["wdec_fc"], pp["bdec_fc"], pp["wdec0"], pp["bdec0"])

    cout0 = pp["wdec0"].shape[1] // 16
    d = jnp.transpose(d.reshape(B, cout0, 4, 4), (1, 0, 2, 3))     # -> CNHW (64, B, 4, 4)
    for (wph, bcol), (act, odt) in zip(pp["dec_convt"], DEC_CFG):
        d = conv_transpose2d_s2_cnhw(d, wph, bcol, act=act, out_dtype=odt)
    return jnp.transpose(d, (1, 0, 2, 3)), mu, logvar              # CNHW -> NCHW


# ----------------------------------------------------------------------------
# Pure-JAX f32 reference (PyTorch semantics) for validation
# ----------------------------------------------------------------------------
def _ref_forward(params, x, eps):
    def conv(x, w, b, s, p):
        out = jax.lax.conv_general_dilated(
            x, w, window_strides=(s, s), padding=[(p, p), (p, p)],
            dimension_numbers=("NCHW", "OIHW", "NCHW"))
        return out + b.reshape(1, -1, 1, 1)

    def convt(x, w_t, b, s, p):
        k = w_t.shape[2]
        w2 = jnp.transpose(jnp.flip(w_t, axis=(2, 3)), (1, 0, 2, 3))
        out = jax.lax.conv_general_dilated(
            x, w2, window_strides=(1, 1), padding=[(k - 1 - p, k - 1 - p)] * 2,
            lhs_dilation=(s, s), dimension_numbers=("NCHW", "OIHW", "NCHW"))
        return out + b.reshape(1, -1, 1, 1)

    h = x
    for (w, b), s, p in zip(params["enc_conv"], [2, 2, 2, 2, 1], [1, 1, 1, 1, 0]):
        h = jax.nn.relu(conv(h, w, b, s, p))
    B = h.shape[0]
    h = h.reshape(B, 256)
    w_fc, b_fc = params["enc_fc"]
    dist = h @ w_fc.T + b_fc
    mu, logvar = dist[:, :Z_DIM], dist[:, Z_DIM:]
    z = mu + eps * jnp.exp(0.5 * logvar)
    wd, bd = params["dec_fc"]
    d = jax.nn.relu(z @ wd.T + bd).reshape(B, 256, 1, 1)
    cfgs = [(1, 0, "relu"), (2, 1, "relu"), (2, 1, "relu"), (2, 1, "relu"), (2, 1, "tanh")]
    for (w_t, b), (s, p, act) in zip(params["dec_convt"], cfgs):
        d = convt(d, w_t, b, s, p)
        d = jnp.tanh(d) if act == "tanh" else jax.nn.relu(d)
    return d, mu, logvar


# ----------------------------------------------------------------------------
if __name__ == "__main__":
    key = jax.random.PRNGKey(0)
    k_param, k_x, k_eps = jax.random.split(key, 3)

    params = init_params(k_param)
    # The architecture (View((-1, 256*1*1)) after the 5th conv) requires 64x64 input.
    x = jax.random.normal(k_x, (2, NC, 64, 64), jnp.float32)
    eps = jax.random.normal(k_eps, (2, Z_DIM), jnp.float32)   # torch.randn_like(std)

    pp = prepare_params(params)                  # one-time weight prep, outside the jit
    fwd = jax.jit(vae_forward)
    recon, mu, logvar = fwd(pp, x, eps)
    jax.block_until_ready((recon, mu, logvar))

    assert recon.shape == (2, NC, 64, 64), recon.shape
    assert mu.shape == (2, Z_DIM) and logvar.shape == (2, Z_DIM)
    assert bool(jnp.all(jnp.isfinite(recon)))

    # Validate the sub-pixel deconv decomposition + GEMM lowerings against a pure-JAX
    # f32 reference (bf16 activations -> generous but structurally-discriminating tol).
    recon_r, mu_r, logvar_r = jax.jit(_ref_forward)(params, x, eps)

    def _rel(a, b):
        return float(jnp.linalg.norm((a - b).astype(jnp.float32)) /
                     (jnp.linalg.norm(b.astype(jnp.float32)) + 1e-6))

    assert _rel(mu, mu_r) < 0.1, _rel(mu, mu_r)
    assert _rel(logvar, logvar_r) < 0.1, _rel(logvar, logvar_r)
    assert _rel(recon, recon_r) < 0.2, _rel(recon, recon_r)

    print("KERNEL_OK")
</pallas_src>

<mosaic_0001>
module attributes {stable_mosaic.version = 11 : i64} {
  func.func @_gemm_nt_kernel(%arg0: i32, %arg1: memref<32x48xbf16, #tpu.memory_space<vmem>>, %arg2: memref<48x1024xbf16, #tpu.memory_space<vmem>>, %arg3: memref<32x1xf32, #tpu.memory_space<vmem>>, %arg4: memref<32x1024xbf16, #tpu.memory_space<vmem>>) attributes {dimension_semantics = [#tpu.dimension_semantics<parallel>], iteration_bounds = array<i64: 2>, scalar_prefetch = 0 : i64, scratch_operands = 0 : i64, tpu.core_type = #tpu.core_type<tc>, window_params = [{pipeline_mode = #tpu.pipeline_mode<synchronous>, transform_indices = @transform_0, window_bounds = array<i64: 32, 48>}, {transform_indices = @transform_1, window_bounds = array<i64: 48, 1024>}, {pipeline_mode = #tpu.pipeline_mode<synchronous>, transform_indices = @transform_2, window_bounds = array<i64: 32, 1>}, {transform_indices = @transform_3, window_bounds = array<i64: 32, 1024>}]} {
    %c0 = arith.constant 0 : index
    %c0_0 = arith.constant 0 : index
    %0 = vector.load %arg1[%c0, %c0_0] : memref<32x48xbf16, #tpu.memory_space<vmem>>, vector<32x48xbf16>
    %c0_1 = arith.constant 0 : index
    %c0_2 = arith.constant 0 : index
    %1 = vector.load %arg2[%c0_1, %c0_2] : memref<48x1024xbf16, #tpu.memory_space<vmem>>, vector<48x1024xbf16>
    %cst = arith.constant dense<0.000000e+00> : vector<32x1024xf32>
    %2 = tpu.matmul %0, %1, %cst {dimension_numbers = #tpu.dot_dimension_numbers<[1], [0], [0], [1], [0, 0, 1, 1], [], []>} : vector<32x48xbf16>, vector<48x1024xbf16>, vector<32x1024xf32> -> vector<32x1024xf32>
    %c0_3 = arith.constant 0 : index
    %c0_4 = arith.constant 0 : index
    %3 = vector.load %arg3[%c0_3, %c0_4] : memref<32x1xf32, #tpu.memory_space<vmem>>, vector<32x1xf32>
    %4 = vector.broadcast %3 : vector<32x1xf32> to vector<32x1024xf32>
    %5 = arith.addf %2, %4 : vector<32x1024xf32>
    %cst_5 = arith.constant 0.000000e+00 : f32
    %6 = vector.broadcast %cst_5 : f32 to vector<32x1024xf32>
    %7 = arith.maximumf %5, %6 : vector<32x1024xf32>
    %8 = arith.truncf %7 : vector<32x1024xf32> to vector<32x1024xbf16>
    %c0_6 = arith.constant 0 : index
    %c0_7 = arith.constant 0 : index
    %9 = vector.load %arg4[%c0_6, %c0_7] : memref<32x1024xbf16, #tpu.memory_space<vmem>>, vector<32x1024xbf16>
    tpu.vector_store %arg4[%c0_6, %c0_7], %8 {strides = array<i32>} : memref<32x1024xbf16, #tpu.memory_space<vmem>>, vector<32x1024xbf16>,
    return
  }
  func.func @transform_0(%arg0: i32) -> (i32, i32) {
    %c0_i32 = arith.constant 0 : i32
    %c0_i32_0 = arith.constant 0 : i32
    %c0_i32_1 = arith.constant 0 : i32
    return %c0_i32, %c0_i32_0 : i32, i32
  }
  func.func @transform_1(%arg0: i32) -> (i32, i32) {
    %c0_i32 = arith.constant 0 : i32
    %c0_i32_0 = arith.constant 0 : i32
    return %c0_i32, %arg0 : i32, i32
  }
  func.func @transform_2(%arg0: i32) -> (i32, i32) {
    %c0_i32 = arith.constant 0 : i32
    %c0_i32_0 = arith.constant 0 : i32
    %c0_i32_1 = arith.constant 0 : i32
    return %c0_i32, %c0_i32_0 : i32, i32
  }
  func.func @transform_3(%arg0: i32) -> (i32, i32) {
    %c0_i32 = arith.constant 0 : i32
    %c0_i32_0 = arith.constant 0 : i32
    return %c0_i32, %arg0 : i32, i32
  }
}

module attributes {stable_mosaic.version = 11 : i64} {
  func.func @_gemm_nt_kernel(%arg0: i32, %arg1: memref<32x512xbf16, #tpu.memory_space<vmem>>, %arg2: memref<512x256xbf16, #tpu.memory_space<vmem>>, %arg3: memref<32x1xf32, #tpu.memory_space<vmem>>, %arg4: memref<32x256xbf16, #tpu.memory_space<vmem>>) attributes {dimension_semantics = [#tpu.dimension_semantics<parallel>], iteration_bounds = array<i64: 2>, scalar_prefetch = 0 : i64, scratch_operands = 0 : i64, tpu.core_type = #tpu.core_type<tc>, window_params = [{pipeline_mode = #tpu.pipeline_mode<synchronous>, transform_indices = @transform_0, window_bounds = array<i64: 32, 512>}, {transform_indices = @transform_1, window_bounds = array<i64: 512, 256>}, {pipeline_mode = #tpu.pipeline_mode<synchronous>, transform_indices = @transform_2, window_bounds = array<i64: 32, 1>}, {transform_indices = @transform_3, window_bounds = array<i64: 32, 256>}]} {
    %c0 = arith.constant 0 : index
    %c0_0 = arith.constant 0 : index
    %0 = vector.load %arg1[%c0, %c0_0] : memref<32x512xbf16, #tpu.memory_space<vmem>>, vector<32x512xbf16>
    %c0_1 = arith.constant 0 : index
    %c0_2 = arith.constant 0 : index
    %1 = vector.load %arg2[%c0_1, %c0_2] : memref<512x256xbf16, #tpu.memory_space<vmem>>, vector<512x256xbf16>
    %cst = arith.constant dense<0.000000e+00> : vector<32x256xf32>
    %2 = tpu.matmul %0, %1, %cst {dimension_numbers = #tpu.dot_dimension_numbers<[1], [0], [0], [1], [0, 0, 1, 1], [], []>} : vector<32x512xbf16>, vector<512x256xbf16>, vector<32x256xf32> -> vector<32x256xf32>
    %c0_3 = arith.constant 0 : index
    %c0_4 = arith.constant 0 : index
    %3 = vector.load %arg3[%c0_3, %c0_4] : memref<32x1xf32, #tpu.memory_space<vmem>>, vector<32x1xf32>
    %4 = vector.broadcast %3 : vector<32x1xf32> to vector<32x256xf32>
    %5 = arith.addf %2, %4 : vector<32x256xf32>
    %cst_5 = arith.constant 0.000000e+00 : f32
    %6 = vector.broadcast %cst_5 : f32 to vector<32x256xf32>
    %7 = arith.maximumf %5, %6 : vector<32x256xf32>
    %8 = arith.truncf %7 : vector<32x256xf32> to vector<32x256xbf16>
    %c0_6 = arith.constant 0 : index
    %c0_7 = arith.constant 0 : index
    %9 = vector.load %arg4[%c0_6, %c0_7] : memref<32x256xbf16, #tpu.memory_space<vmem>>, vector<32x256xbf16>
    tpu.vector_store %arg4[%c0_6, %c0_7], %8 {strides = array<i32>} : memref<32x256xbf16, #tpu.memory_space<vmem>>, vector<32x256xbf16>,
    return
  }
  func.func @transform_0(%arg0: i32) -> (i32, i32) {
    %c0_i32 = arith.constant 0 : i32
    %c0_i32_0 = arith.constant 0 : i32
    %c0_i32_1 = arith.constant 0 : i32
    return %c0_i32, %c0_i32_0 : i32, i32
  }
  func.func @transform_1(%arg0: i32) -> (i32, i32) {
    %c0_i32 = arith.constant 0 : i32
    %c0_i32_0 = arith.constant 0 : i32
    return %c0_i32, %arg0 : i32, i32
  }
  func.func @transform_2(%arg0: i32) -> (i32, i32) {
    %c0_i32 = arith.constant 0 : i32
    %c0_i32_0 = arith.constant 0 : i32
    %c0_i32_1 = arith.constant 0 : i32
    return %c0_i32, %c0_i32_0 : i32, i32
  }
  func.func @transform_3(%arg0: i32) -> (i32, i32) {
    %c0_i32 = arith.constant 0 : i32
    %c0_i32_0 = arith.constant 0 : i32
    return %c0_i32, %arg0 : i32, i32
  }
}

module attributes {stable_mosaic.version = 11 : i64} {
  func.func @_gemm_nt_kernel(%arg0: i32, %arg1: memref<64x512xbf16, #tpu.memory_space<vmem>>, %arg2: memref<512x128xbf16, #tpu.memory_space<vmem>>, %arg3: memref<64x1xf32, #tpu.memory_space<vmem>>, %arg4: memref<64x128xbf16, #tpu.memory_space<vmem>>) attributes {dimension_semantics = [#tpu.dimension_semantics<parallel>], iteration_bounds = array<i64: 1>, scalar_prefetch = 0 : i64, scratch_operands = 0 : i64, tpu.core_type = #tpu.core_type<tc>, window_params = [{pipeline_mode = #tpu.pipeline_mode<synchronous>, transform_indices = @transform_0, window_bounds = array<i64: 64, 512>}, {transform_indices = @transform_1, window_bounds = array<i64: 512, 128>}, {pipeline_mode = #tpu.pipeline_mode<synchronous>, transform_indices = @transform_2, window_bounds = array<i64: 64, 1>}, {transform_indices = @transform_3, window_bounds = array<i64: 64, 128>}]} {
    %c0 = arith.constant 0 : index
    %c0_0 = arith.constant 0 : index
    %0 = vector.load %arg1[%c0, %c0_0] : memref<64x512xbf16, #tpu.memory_space<vmem>>, vector<64x512xbf16>
    %c0_1 = arith.constant 0 : index
    %c0_2 = arith.constant 0 : index
    %1 = vector.load %arg2[%c0_1, %c0_2] : memref<512x128xbf16, #tpu.memory_space<vmem>>, vector<512x128xbf16>
    %cst = arith.constant dense<0.000000e+00> : vector<64x128xf32>
    %2 = tpu.matmul %0, %1, %cst {dimension_numbers = #tpu.dot_dimension_numbers<[1], [0], [0], [1], [0, 0, 1, 1], [], []>} : vector<64x512xbf16>, vector<512x128xbf16>, vector<64x128xf32> -> vector<64x128xf32>
    %c0_3 = arith.constant 0 : index
    %c0_4 = arith.constant 0 : index
    %3 = vector.load %arg3[%c0_3, %c0_4] : memref<64x1xf32, #tpu.memory_space<vmem>>, vector<64x1xf32>
    %4 = vector.broadcast %3 : vector<64x1xf32> to vector<64x128xf32>
    %5 = arith.addf %2, %4 : vector<64x128xf32>
    %cst_5 = arith.constant 0.000000e+00 : f32
    %6 = vector.broadcast %cst_5 : f32 to vector<64x128xf32>
    %7 = arith.maximumf %5, %6 : vector<64x128xf32>
    %8 = arith.truncf %7 : vector<64x128xf32> to vector<64x128xbf16>
    %c0_6 = arith.constant 0 : index
    %c0_7 = arith.constant 0 : index
    %9 = vector.load %arg4[%c0_6, %c0_7] : memref<64x128xbf16, #tpu.memory_space<vmem>>, vector<64x128xbf16>
    tpu.vector_store %arg4[%c0_6, %c0_7], %8 {strides = array<i32>} : memref<64x128xbf16, #tpu.memory_space<vmem>>, vector<64x128xbf16>,
    return
  }
  func.func @transform_0(%arg0: i32) -> (i32, i32) {
    %c0_i32 = arith.constant 0 : i32
    %c0_i32_0 = arith.constant 0 : i32
    %c0_i32_1 = arith.constant 0 : i32
    return %c0_i32, %c0_i32_0 : i32, i32
  }
  func.func @transform_1(%arg0: i32) -> (i32, i32) {
    %c0_i32 = arith.constant 0 : i32
    %c0_i32_0 = arith.constant 0 : i32
    return %c0_i32, %arg0 : i32, i32
  }
  func.func @transform_2(%arg0: i32) -> (i32, i32) {
    %c0_i32 = arith.constant 0 : i32
    %c0_i32_0 = arith.constant 0 : i32
    %c0_i32_1 = arith.constant 0 : i32
    return %c0_i32, %c0_i32_0 : i32, i32
  }
  func.func @transform_3(%arg0: i32) -> (i32, i32) {
    %c0_i32 = arith.constant 0 : i32
    %c0_i32_0 = arith.constant 0 : i32
    return %c0_i32, %arg0 : i32, i32
  }
}

module attributes {stable_mosaic.version = 11 : i64} {
  func.func @_gemm_nt_kernel(%arg0: i32, %arg1: memref<64x1024xbf16, #tpu.memory_space<vmem>>, %arg2: memref<1024x32xbf16, #tpu.memory_space<vmem>>, %arg3: memref<64x1xf32, #tpu.memory_space<vmem>>, %arg4: memref<64x32xbf16, #tpu.memory_space<vmem>>) attributes {dimension_semantics = [#tpu.dimension_semantics<parallel>], iteration_bounds = array<i64: 1>, scalar_prefetch = 0 : i64, scratch_operands = 0 : i64, tpu.core_type = #tpu.core_type<tc>, window_params = [{pipeline_mode = #tpu.pipeline_mode<synchronous>, transform_indices = @transform_0, window_bounds = array<i64: 64, 1024>}, {transform_indices = @transform_1, window_bounds = array<i64: 1024, 32>}, {pipeline_mode = #tpu.pipeline_mode<synchronous>, transform_indices = @transform_2, window_bounds = array<i64: 64, 1>}, {transform_indices = @transform_3, window_bounds = array<i64: 64, 32>}]} {
    %c0 = arith.constant 0 : index
    %c0_0 = arith.constant 0 : index
    %0 = vector.load %arg1[%c0, %c0_0] : memref<64x1024xbf16, #tpu.memory_space<vmem>>, vector<64x1024xbf16>
    %c0_1 = arith.constant 0 : index
    %c0_2 = arith.constant 0 : index
    %1 = vector.load %arg2[%c0_1, %c0_2] : memref<1024x32xbf16, #tpu.memory_space<vmem>>, vector<1024x32xbf16>
    %cst = arith.constant dense<0.000000e+00> : vector<64x32xf32>
    %2 = tpu.matmul %0, %1, %cst {dimension_numbers = #tpu.dot_dimension_numbers<[1], [0], [0], [1], [0, 0, 1, 1], [], []>} : vector<64x1024xbf16>, vector<1024x32xbf16>, vector<64x32xf32> -> vector<64x32xf32>
    %c0_3 = arith.constant 0 : index
    %c0_4 = arith.constant 0 : index
    %3 = vector.load %arg3[%c0_3, %c0_4] : memref<64x1xf32, #tpu.memory_space<vmem>>, vector<64x1xf32>
    %4 = vector.broadcast %3 : vector<64x1xf32> to vector<64x32xf32>
    %5 = arith.addf %2, %4 : vector<64x32xf32>
    %cst_5 = arith.constant 0.000000e+00 : f32
    %6 = vector.broadcast %cst_5 : f32 to vector<64x32xf32>
    %7 = arith.maximumf %5, %6 : vector<64x32xf32>
    %8 = arith.truncf %7 : vector<64x32xf32> to vector<64x32xbf16>
    %c0_6 = arith.constant 0 : index
    %c0_7 = arith.constant 0 : index
    %9 = vector.load %arg4[%c0_6, %c0_7] : memref<64x32xbf16, #tpu.memory_space<vmem>>, vector<64x32xbf16>
    tpu.vector_store %arg4[%c0_6, %c0_7], %8 {strides = array<i32>} : memref<64x32xbf16, #tpu.memory_space<vmem>>, vector<64x32xbf16>,
    return
  }
  func.func @transform_0(%arg0: i32) -> (i32, i32) {
    %c0_i32 = arith.constant 0 : i32
    %c0_i32_0 = arith.constant 0 : i32
    %c0_i32_1 = arith.constant 0 : i32
    return %c0_i32, %c0_i32_0 : i32, i32
  }
  func.func @transform_1(%arg0: i32) -> (i32, i32) {
    %c0_i32 = arith.constant 0 : i32
    %c0_i32_0 = arith.constant 0 : i32
    return %c0_i32, %arg0 : i32, i32
  }
  func.func @transform_2(%arg0: i32) -> (i32, i32) {
    %c0_i32 = arith.constant 0 : i32
    %c0_i32_0 = arith.constant 0 : i32
    %c0_i32_1 = arith.constant 0 : i32
    return %c0_i32, %c0_i32_0 : i32, i32
  }
  func.func @transform_3(%arg0: i32) -> (i32, i32) {
    %c0_i32 = arith.constant 0 : i32
    %c0_i32_0 = arith.constant 0 : i32
    return %c0_i32, %arg0 : i32, i32
  }
}

module attributes {stable_mosaic.version = 11 : i64} {
  func.func @_mid_kernel(%arg0: memref<2x1024xbf16, #tpu.memory_space<vmem>>, %arg1: memref<1024x256xbf16, #tpu.memory_space<vmem>>, %arg2: memref<1x256xf32, #tpu.memory_space<vmem>>, %arg3: memref<256x100xbf16, #tpu.memory_space<vmem>>, %arg4: memref<1x100xf32, #tpu.memory_space<vmem>>, %arg5: memref<256x100xbf16, #tpu.memory_space<vmem>>, %arg6: memref<1x100xf32, #tpu.memory_space<vmem>>, %arg7: memref<2x100xf32, #tpu.memory_space<vmem>>, %arg8: memref<100x256xbf16, #tpu.memory_space<vmem>>, %arg9: memref<1x256xf32, #tpu.memory_space<vmem>>, %arg10: memref<256x1024xbf16, #tpu.memory_space<vmem>>, %arg11: memref<1x1024xf32, #tpu.memory_space<vmem>>, %arg12: memref<2x100xf32, #tpu.memory_space<vmem>>, %arg13: memref<2x100xf32, #tpu.memory_space<vmem>>, %arg14: memref<2x1024xbf16, #tpu.memory_space<vmem>>) attributes {dimension_semantics = [], scalar_prefetch = 0 : i64, scratch_operands = 0 : i64, tpu.core_type = #tpu.core_type<tc>} {
    %c0 = arith.constant 0 : index
    %c0_0 = arith.constant 0 : index
    %0 = vector.load %arg0[%c0, %c0_0] : memref<2x1024xbf16, #tpu.memory_space<vmem>>, vector<2x1024xbf16>
    %c0_1 = arith.constant 0 : index
    %c0_2 = arith.constant 0 : index
    %1 = vector.load %arg1[%c0_1, %c0_2] : memref<1024x256xbf16, #tpu.memory_space<vmem>>, vector<1024x256xbf16>
    %cst = arith.constant dense<0.000000e+00> : vector<2x256xf32>
    %2 = tpu.matmul %0, %1, %cst {dimension_numbers = #tpu.dot_dimension_numbers<[1], [0], [0], [1], [0, 0, 1, 1], [], []>} : vector<2x1024xbf16>, vector<1024x256xbf16>, vector<2x256xf32> -> vector<2x256xf32>
    %c0_3 = arith.constant 0 : index
    %c0_4 = arith.constant 0 : index
    %3 = vector.load %arg2[%c0_3, %c0_4] : memref<1x256xf32, #tpu.memory_space<vmem>>, vector<1x256xf32>
    %4 = vector.broadcast %3 : vector<1x256xf32> to vector<2x256xf32>
    %5 = arith.addf %2, %4 : vector<2x256xf32>
    %cst_5 = arith.constant 0.000000e+00 : f32
    %6 = vector.broadcast %cst_5 : f32 to vector<2x256xf32>
    %7 = arith.maximumf %5, %6 : vector<2x256xf32>
    %8 = arith.truncf %7 : vector<2x256xf32> to vector<2x256xbf16>
    %c0_6 = arith.constant 0 : index
    %c0_7 = arith.constant 0 : index
    %9 = vector.load %arg3[%c0_6, %c0_7] : memref<256x100xbf16, #tpu.memory_space<vmem>>, vector<256x100xbf16>
    %cst_8 = arith.constant dense<0.000000e+00> : vector<2x100xf32>
    %10 = tpu.matmul %8, %9, %cst_8 {dimension_numbers = #tpu.dot_dimension_numbers<[1], [0], [0], [1], [0, 0, 1, 1], [], []>} : vector<2x256xbf16>, vector<256x100xbf16>, vector<2x100xf32> -> vector<2x100xf32>
    %c0_9 = arith.constant 0 : index
    %c0_10 = arith.constant 0 : index
    %11 = vector.load %arg4[%c0_9, %c0_10] : memref<1x100xf32, #tpu.memory_space<vmem>>, vector<1x100xf32>
    %12 = vector.broadcast %11 : vector<1x100xf32> to vector<2x100xf32>
    %13 = arith.addf %10, %12 : vector<2x100xf32>
    %c0_11 = arith.constant 0 : index
    %c0_12 = arith.constant 0 : index
    %14 = vector.load %arg5[%c0_11, %c0_12] : memref<256x100xbf16, #tpu.memory_space<vmem>>, vector<256x100xbf16>
    %cst_13 = arith.constant dense<0.000000e+00> : vector<2x100xf32>
    %15 = tpu.matmul %8, %14, %cst_13 {dimension_numbers = #tpu.dot_dimension_numbers<[1], [0], [0], [1], [0, 0, 1, 1], [], []>} : vector<2x256xbf16>, vector<256x100xbf16>, vector<2x100xf32> -> vector<2x100xf32>
    %c0_14 = arith.constant 0 : index
    %c0_15 = arith.constant 0 : index
    %16 = vector.load %arg6[%c0_14, %c0_15] : memref<1x100xf32, #tpu.memory_space<vmem>>, vector<1x100xf32>
    %17 = vector.broadcast %16 : vector<1x100xf32> to vector<2x100xf32>
    %18 = arith.addf %15, %17 : vector<2x100xf32>
    %c0_16 = arith.constant 0 : index
    %c0_17 = arith.constant 0 : index
    %19 = vector.load %arg12[%c0_16, %c0_17] : memref<2x100xf32, #tpu.memory_space<vmem>>, vector<2x100xf32>
    tpu.vector_store %arg12[%c0_16, %c0_17], %13 {strides = array<i32>} : memref<2x100xf32, #tpu.memory_space<vmem>>, vector<2x100xf32>,
    %c0_18 = arith.constant 0 : index
    %c0_19 = arith.constant 0 : index
    %20 = vector.load %arg13[%c0_18, %c0_19] : memref<2x100xf32, #tpu.memory_space<vmem>>, vector<2x100xf32>
    tpu.vector_store %arg13[%c0_18, %c0_19], %18 {strides = array<i32>} : memref<2x100xf32, #tpu.memory_space<vmem>>, vector<2x100xf32>,
    %c0_20 = arith.constant 0 : index
    %c0_21 = arith.constant 0 : index
    %21 = vector.load %arg7[%c0_20, %c0_21] : memref<2x100xf32, #tpu.memory_space<vmem>>, vector<2x100xf32>
    %cst_22 = arith.constant 5.000000e-01 : f32
    %22 = vector.broadcast %cst_22 : f32 to vector<2x100xf32>
    %23 = arith.mulf %22, %18 : vector<2x100xf32>
    %24 = math.exp %23 : vector<2x100xf32>
    %25 = arith.mulf %21, %24 : vector<2x100xf32>
    %26 = arith.addf %13, %25 : vector<2x100xf32>
    %27 = arith.truncf %26 : vector<2x100xf32> to vector<2x100xbf16>
    %c0_23 = arith.constant 0 : index
    %c0_24 = arith.constant 0 : index
    %28 = vector.load %arg8[%c0_23, %c0_24] : memref<100x256xbf16, #tpu.memory_space<vmem>>, vector<100x256xbf16>
    %cst_25 = arith.constant dense<0.000000e+00> : vector<2x256xf32>
    %29 = tpu.matmul %27, %28, %cst_25 {dimension_numbers = #tpu.dot_dimension_numbers<[1], [0], [0], [1], [0, 0, 1, 1], [], []>} : vector<2x100xbf16>, vector<100x256xbf16>, vector<2x256xf32> -> vector<2x256xf32>
    %c0_26 = arith.constant 0 : index
    %c0_27 = arith.constant 0 : index
    %30 = vector.load %arg9[%c0_26, %c0_27] : memref<1x256xf32, #tpu.memory_space<vmem>>, vector<1x256xf32>
    %31 = vector.broadcast %30 : vector<1x256xf32> to vector<2x256xf32>
    %32 = arith.addf %29, %31 : vector<2x256xf32>
    %cst_28 = arith.constant 0.000000e+00 : f32
    %33 = vector.broadcast %cst_28 : f32 to vector<2x256xf32>
    %34 = arith.maximumf %32, %33 : vector<2x256xf32>
    %35 = arith.truncf %34 : vector<2x256xf32> to vector<2x256xbf16>
    %c0_29 = arith.constant 0 : index
    %c0_30 = arith.constant 0 : index
    %36 = vector.load %arg10[%c0_29, %c0_30] : memref<256x1024xbf16, #tpu.memory_space<vmem>>, vector<256x1024xbf16>
    %cst_31 = arith.constant dense<0.000000e+00> : vector<2x1024xf32>
    %37 = tpu.matmul %35, %36, %cst_31 {dimension_numbers = #tpu.dot_dimension_numbers<[1], [0], [0], [1], [0, 0, 1, 1], [], []>} : vector<2x256xbf16>, vector<256x1024xbf16>, vector<2x1024xf32> -> vector<2x1024xf32>
    %c0_32 = arith.constant 0 : index
    %c0_33 = arith.constant 0 : index
    %38 = vector.load %arg11[%c0_32, %c0_33] : memref<1x1024xf32, #tpu.memory_space<vmem>>, vector<1x1024xf32>
    %39 = vector.broadcast %38 : vector<1x1024xf32> to vector<2x1024xf32>
    %40 = arith.addf %37, %39 : vector<2x1024xf32>
    %cst_34 = arith.constant 0.000000e+00 : f32
    %41 = vector.broadcast %cst_34 : f32 to vector<2x1024xf32>
    %42 = arith.maximumf %40, %41 : vector<2x1024xf32>
    %43 = arith.truncf %42 : vector<2x1024xf32> to vector<2x1024xbf16>
    %c0_35 = arith.constant 0 : index
    %c0_36 = arith.constant 0 : index
    %44 = vector.load %arg14[%c0_35, %c0_36] : memref<2x1024xbf16, #tpu.memory_space<vmem>>, vector<2x1024xbf16>
    tpu.vector_store %arg14[%c0_35, %c0_36], %43 {strides = array<i32>} : memref<2x1024xbf16, #tpu.memory_space<vmem>>, vector<2x1024xbf16>,
    return
  }
}

module attributes {stable_mosaic.version = 11 : i64} {
  func.func @_gemm_nt_kernel(%arg0: i32, %arg1: i32, %arg2: memref<1x64x256xbf16, #tpu.memory_space<vmem>>, %arg3: memref<1x256x32xbf16, #tpu.memory_space<vmem>>, %arg4: memref<64x1xf32, #tpu.memory_space<vmem>>, %arg5: memref<1x64x32xbf16, #tpu.memory_space<vmem>>) attributes {dimension_semantics = [#tpu.dimension_semantics<parallel>, #tpu.dimension_semantics<parallel>], iteration_bounds = array<i64: 4, 1>, scalar_prefetch = 0 : i64, scratch_operands = 0 : i64, tpu.core_type = #tpu.core_type<tc>, window_params = [{transform_indices = @transform_0, window_bounds = array<i64: 1, 64, 256>}, {transform_indices = @transform_1, window_bounds = array<i64: 1, 256, 32>}, {pipeline_mode = #tpu.pipeline_mode<synchronous>, transform_indices = @transform_2, window_bounds = array<i64: 64, 1>}, {transform_indices = @transform_3, window_bounds = array<i64: 1, 64, 32>}]} {
    %c0 = arith.constant 0 : index
    %c0_0 = arith.constant 0 : index
    %c0_1 = arith.constant 0 : index
    %0 = vector.load %arg2[%c0, %c0_0, %c0_1] : memref<1x64x256xbf16, #tpu.memory_space<vmem>>, vector<1x64x256xbf16>
    %1 = vector.shape_cast %0 : vector<1x64x256xbf16> to vector<64x256xbf16>
    %c0_2 = arith.constant 0 : index
    %c0_3 = arith.constant 0 : index
    %c0_4 = arith.constant 0 : index
    %2 = vector.load %arg3[%c0_2, %c0_3, %c0_4] : memref<1x256x32xbf16, #tpu.memory_space<vmem>>, vector<1x256x32xbf16>
    %3 = vector.shape_cast %2 : vector<1x256x32xbf16> to vector<256x32xbf16>
    %cst = arith.constant dense<0.000000e+00> : vector<64x32xf32>
    %4 = tpu.matmul %1, %3, %cst {dimension_numbers = #tpu.dot_dimension_numbers<[1], [0], [0], [1], [0, 0, 1, 1], [], []>} : vector<64x256xbf16>, vector<256x32xbf16>, vector<64x32xf32> -> vector<64x32xf32>
    %c0_5 = arith.constant 0 : index
    %c0_6 = arith.constant 0 : index
    %5 = vector.load %arg4[%c0_5, %c0_6] : memref<64x1xf32, #tpu.memory_space<vmem>>, vector<64x1xf32>
    %6 = vector.broadcast %5 : vector<64x1xf32> to vector<64x32xf32>
    %7 = arith.addf %4, %6 : vector<64x32xf32>
    %cst_7 = arith.constant 0.000000e+00 : f32
    %8 = vector.broadcast %cst_7 : f32 to vector<64x32xf32>
    %9 = arith.maximumf %7, %8 : vector<64x32xf32>
    %10 = arith.truncf %9 : vector<64x32xf32> to vector<64x32xbf16>
    %c0_8 = arith.constant 0 : index
    %c0_9 = arith.constant 0 : index
    %c0_10 = arith.constant 0 : index
    %11 = vector.load %arg5[%c0_8, %c0_9, %c0_10] : memref<1x64x32xbf16, #tpu.memory_space<vmem>>, vector<1x64x32xbf16>
    %12 = vector.shape_cast %11 : vector<1x64x32xbf16> to vector<64x32xbf16>
    %13 = vector.shape_cast %10 : vector<64x32xbf16> to vector<1x64x32xbf16>
    tpu.vector_store %arg5[%c0_8, %c0_9, %c0_10], %13 {strides = array<i32>} : memref<1x64x32xbf16, #tpu.memory_space<vmem>>, vector<1x64x32xbf16>,
    return
  }
  func.func @transform_0(%arg0: i32, %arg1: i32) -> (i32, i32, i32) {
    %c0_i32 = arith.constant 0 : i32
    %c0_i32_0 = arith.constant 0 : i32
    %c0_i32_1 = arith.constant 0 : i32
    return %arg0, %c0_i32, %c0_i32_0 : i32, i32, i32
  }
  func.func @transform_1(%arg0: i32, %arg1: i32) -> (i32, i32, i32) {
    %c0_i32 = arith.constant 0 : i32
    %c0_i32_0 = arith.constant 0 : i32
    return %arg0, %c0_i32, %arg1 : i32, i32, i32
  }
  func.func @transform_2(%arg0: i32, %arg1: i32) -> (i32, i32) {
    %c0_i32 = arith.constant 0 : i32
    %c0_i32_0 = arith.constant 0 : i32
    %c0_i32_1 = arith.constant 0 : i32
    return %c0_i32, %c0_i32_0 : i32, i32
  }
  func.func @transform_3(%arg0: i32, %arg1: i32) -> (i32, i32, i32) {
    %c0_i32 = arith.constant 0 : i32
    %c0_i32_0 = arith.constant 0 : i32
    return %arg0, %c0_i32, %arg1 : i32, i32, i32
  }
}

module attributes {stable_mosaic.version = 11 : i64} {
  func.func @_gemm_nt_kernel(%arg0: i32, %arg1: i32, %arg2: memref<1x32x256xbf16, #tpu.memory_space<vmem>>, %arg3: memref<1x256x128xbf16, #tpu.memory_space<vmem>>, %arg4: memref<32x1xf32, #tpu.memory_space<vmem>>, %arg5: memref<1x32x128xbf16, #tpu.memory_space<vmem>>) attributes {dimension_semantics = [#tpu.dimension_semantics<parallel>, #tpu.dimension_semantics<parallel>], iteration_bounds = array<i64: 4, 1>, scalar_prefetch = 0 : i64, scratch_operands = 0 : i64, tpu.core_type = #tpu.core_type<tc>, window_params = [{transform_indices = @transform_0, window_bounds = array<i64: 1, 32, 256>}, {transform_indices = @transform_1, window_bounds = array<i64: 1, 256, 128>}, {pipeline_mode = #tpu.pipeline_mode<synchronous>, transform_indices = @transform_2, window_bounds = array<i64: 32, 1>}, {transform_indices = @transform_3, window_bounds = array<i64: 1, 32, 128>}]} {
    %c0 = arith.constant 0 : index
    %c0_0 = arith.constant 0 : index
    %c0_1 = arith.constant 0 : index
    %0 = vector.load %arg2[%c0, %c0_0, %c0_1] : memref<1x32x256xbf16, #tpu.memory_space<vmem>>, vector<1x32x256xbf16>
    %1 = vector.shape_cast %0 : vector<1x32x256xbf16> to vector<32x256xbf16>
    %c0_2 = arith.constant 0 : index
    %c0_3 = arith.constant 0 : index
    %c0_4 = arith.constant 0 : index
    %2 = vector.load %arg3[%c0_2, %c0_3, %c0_4] : memref<1x256x128xbf16, #tpu.memory_space<vmem>>, vector<1x256x128xbf16>
    %3 = vector.shape_cast %2 : vector<1x256x128xbf16> to vector<256x128xbf16>
    %cst = arith.constant dense<0.000000e+00> : vector<32x128xf32>
    %4 = tpu.matmul %1, %3, %cst {dimension_numbers = #tpu.dot_dimension_numbers<[1], [0], [0], [1], [0, 0, 1, 1], [], []>} : vector<32x256xbf16>, vector<256x128xbf16>, vector<32x128xf32> -> vector<32x128xf32>
    %c0_5 = arith.constant 0 : index
    %c0_6 = arith.constant 0 : index
    %5 = vector.load %arg4[%c0_5, %c0_6] : memref<32x1xf32, #tpu.memory_space<vmem>>, vector<32x1xf32>
    %6 = vector.broadcast %5 : vector<32x1xf32> to vector<32x128xf32>
    %7 = arith.addf %4, %6 : vector<32x128xf32>
    %cst_7 = arith.constant 0.000000e+00 : f32
    %8 = vector.broadcast %cst_7 : f32 to vector<32x128xf32>
    %9 = arith.maximumf %7, %8 : vector<32x128xf32>
    %10 = arith.truncf %9 : vector<32x128xf32> to vector<32x128xbf16>
    %c0_8 = arith.constant 0 : index
    %c0_9 = arith.constant 0 : index
    %c0_10 = arith.constant 0 : index
    %11 = vector.load %arg5[%c0_8, %c0_9, %c0_10] : memref<1x32x128xbf16, #tpu.memory_space<vmem>>, vector<1x32x128xbf16>
    %12 = vector.shape_cast %11 : vector<1x32x128xbf16> to vector<32x128xbf16>
    %13 = vector.shape_cast %10 : vector<32x128xbf16> to vector<1x32x128xbf16>
    tpu.vector_store %arg5[%c0_8, %c0_9, %c0_10], %13 {strides = array<i32>} : memref<1x32x128xbf16, #tpu.memory_space<vmem>>, vector<1x32x128xbf16>,
    return
  }
  func.func @transform_0(%arg0: i32, %arg1: i32) -> (i32, i32, i32) {
    %c0_i32 = arith.constant 0 : i32
    %c0_i32_0 = arith.constant 0 : i32
    %c0_i32_1 = arith.constant 0 : i32
    return %arg0, %c0_i32, %c0_i32_0 : i32, i32, i32
  }
  func.func @transform_1(%arg0: i32, %arg1: i32) -> (i32, i32, i32) {
    %c0_i32 = arith.constant 0 : i32
    %c0_i32_0 = arith.constant 0 : i32
    return %arg0, %c0_i32, %arg1 : i32, i32, i32
  }
  func.func @transform_2(%arg0: i32, %arg1: i32) -> (i32, i32) {
    %c0_i32 = arith.constant 0 : i32
    %c0_i32_0 = arith.constant 0 : i32
    %c0_i32_1 = arith.constant 0 : i32
    return %c0_i32, %c0_i32_0 : i32, i32
  }
  func.func @transform_3(%arg0: i32, %arg1: i32) -> (i32, i32, i32) {
    %c0_i32 = arith.constant 0 : i32
    %c0_i32_0 = arith.constant 0 : i32
    return %arg0, %c0_i32, %arg1 : i32, i32, i32
  }
}

module attributes {stable_mosaic.version = 11 : i64} {
  func.func @_gemm_nt_kernel(%arg0: i32, %arg1: i32, %arg2: memref<1x32x128xbf16, #tpu.memory_space<vmem>>, %arg3: memref<1x128x256xbf16, #tpu.memory_space<vmem>>, %arg4: memref<32x1xf32, #tpu.memory_space<vmem>>, %arg5: memref<1x32x256xbf16, #tpu.memory_space<vmem>>) attributes {dimension_semantics = [#tpu.dimension_semantics<parallel>, #tpu.dimension_semantics<parallel>], iteration_bounds = array<i64: 4, 2>, scalar_prefetch = 0 : i64, scratch_operands = 0 : i64, tpu.core_type = #tpu.core_type<tc>, window_params = [{transform_indices = @transform_0, window_bounds = array<i64: 1, 32, 128>}, {transform_indices = @transform_1, window_bounds = array<i64: 1, 128, 256>}, {pipeline_mode = #tpu.pipeline_mode<synchronous>, transform_indices = @transform_2, window_bounds = array<i64: 32, 1>}, {transform_indices = @transform_3, window_bounds = array<i64: 1, 32, 256>}]} {
    %c0 = arith.constant 0 : index
    %c0_0 = arith.constant 0 : index
    %c0_1 = arith.constant 0 : index
    %0 = vector.load %arg2[%c0, %c0_0, %c0_1] : memref<1x32x128xbf16, #tpu.memory_space<vmem>>, vector<1x32x128xbf16>
    %1 = vector.shape_cast %0 : vector<1x32x128xbf16> to vector<32x128xbf16>
    %c0_2 = arith.constant 0 : index
    %c0_3 = arith.constant 0 : index
    %c0_4 = arith.constant 0 : index
    %2 = vector.load %arg3[%c0_2, %c0_3, %c0_4] : memref<1x128x256xbf16, #tpu.memory_space<vmem>>, vector<1x128x256xbf16>
    %3 = vector.shape_cast %2 : vector<1x128x256xbf16> to vector<128x256xbf16>
    %cst = arith.constant dense<0.000000e+00> : vector<32x256xf32>
    %4 = tpu.matmul %1, %3, %cst {dimension_numbers = #tpu.dot_dimension_numbers<[1], [0], [0], [1], [0, 0, 1, 1], [], []>} : vector<32x128xbf16>, vector<128x256xbf16>, vector<32x256xf32> -> vector<32x256xf32>
    %c0_5 = arith.constant 0 : index
    %c0_6 = arith.constant 0 : index
    %5 = vector.load %arg4[%c0_5, %c0_6] : memref<32x1xf32, #tpu.memory_space<vmem>>, vector<32x1xf32>
    %6 = vector.broadcast %5 : vector<32x1xf32> to vector<32x256xf32>
    %7 = arith.addf %4, %6 : vector<32x256xf32>
    %cst_7 = arith.constant 0.000000e+00 : f32
    %8 = vector.broadcast %cst_7 : f32 to vector<32x256xf32>
    %9 = arith.maximumf %7, %8 : vector<32x256xf32>
    %10 = arith.truncf %9 : vector<32x256xf32> to vector<32x256xbf16>
    %c0_8 = arith.constant 0 : index
    %c0_9 = arith.constant 0 : index
    %c0_10 = arith.constant 0 : index
    %11 = vector.load %arg5[%c0_8, %c0_9, %c0_10] : memref<1x32x256xbf16, #tpu.memory_space<vmem>>, vector<1x32x256xbf16>
    %12 = vector.shape_cast %11 : vector<1x32x256xbf16> to vector<32x256xbf16>
    %13 = vector.shape_cast %10 : vector<32x256xbf16> to vector<1x32x256xbf16>
    tpu.vector_store %arg5[%c0_8, %c0_9, %c0_10], %13 {strides = array<i32>} : memref<1x32x256xbf16, #tpu.memory_space<vmem>>, vector<1x32x256xbf16>,
    return
  }
  func.func @transform_0(%arg0: i32, %arg1: i32) -> (i32, i32, i32) {
    %c0_i32 = arith.constant 0 : i32
    %c0_i32_0 = arith.constant 0 : i32
    %c0_i32_1 = arith.constant 0 : i32
    return %arg0, %c0_i32, %c0_i32_0 : i32, i32, i32
  }
  func.func @transform_1(%arg0: i32, %arg1: i32) -> (i32, i32, i32) {
    %c0_i32 = arith.constant 0 : i32
    %c0_i32_0 = arith.constant 0 : i32
    return %arg0, %c0_i32, %arg1 : i32, i32, i32
  }
  func.func @transform_2(%arg0: i32, %arg1: i32) -> (i32, i32) {
    %c0_i32 = arith.constant 0 : i32
    %c0_i32_0 = arith.constant 0 : i32
    %c0_i32_1 = arith.constant 0 : i32
    return %c0_i32, %c0_i32_0 : i32, i32
  }
  func.func @transform_3(%arg0: i32, %arg1: i32) -> (i32, i32, i32) {
    %c0_i32 = arith.constant 0 : i32
    %c0_i32_0 = arith.constant 0 : i32
    return %arg0, %c0_i32, %arg1 : i32, i32, i32
  }
}

module attributes {stable_mosaic.version = 11 : i64} {
  func.func @_gemm_nt_kernel(%arg0: i32, %arg1: i32, %arg2: memref<1x3x128xbf16, #tpu.memory_space<vmem>>, %arg3: memref<1x128x1024xbf16, #tpu.memory_space<vmem>>, %arg4: memref<3x1xf32, #tpu.memory_space<vmem>>, %arg5: memref<1x3x1024xf32, #tpu.memory_space<vmem>>) attributes {dimension_semantics = [#tpu.dimension_semantics<parallel>, #tpu.dimension_semantics<parallel>], iteration_bounds = array<i64: 4, 2>, scalar_prefetch = 0 : i64, scratch_operands = 0 : i64, tpu.core_type = #tpu.core_type<tc>, window_params = [{transform_indices = @transform_0, window_bounds = array<i64: 1, 3, 128>}, {transform_indices = @transform_1, window_bounds = array<i64: 1, 128, 1024>}, {pipeline_mode = #tpu.pipeline_mode<synchronous>, transform_indices = @transform_2, window_bounds = array<i64: 3, 1>}, {transform_indices = @transform_3, window_bounds = array<i64: 1, 3, 1024>}]} {
    %c0 = arith.constant 0 : index
    %c0_0 = arith.constant 0 : index
    %c0_1 = arith.constant 0 : index
    %0 = vector.load %arg2[%c0, %c0_0, %c0_1] : memref<1x3x128xbf16, #tpu.memory_space<vmem>>, vector<1x3x128xbf16>
    %1 = vector.shape_cast %0 : vector<1x3x128xbf16> to vector<3x128xbf16>
    %c0_2 = arith.constant 0 : index
    %c0_3 = arith.constant 0 : index
    %c0_4 = arith.constant 0 : index
    %2 = vector.load %arg3[%c0_2, %c0_3, %c0_4] : memref<1x128x1024xbf16, #tpu.memory_space<vmem>>, vector<1x128x1024xbf16>
    %3 = vector.shape_cast %2 : vector<1x128x1024xbf16> to vector<128x1024xbf16>
    %cst = arith.constant dense<0.000000e+00> : vector<3x1024xf32>
    %4 = tpu.matmul %1, %3, %cst {dimension_numbers = #tpu.dot_dimension_numbers<[1], [0], [0], [1], [0, 0, 1, 1], [], []>} : vector<3x128xbf16>, vector<128x1024xbf16>, vector<3x1024xf32> -> vector<3x1024xf32>
    %c0_5 = arith.constant 0 : index
    %c0_6 = arith.constant 0 : index
    %5 = vector.load %arg4[%c0_5, %c0_6] : memref<3x1xf32, #tpu.memory_space<vmem>>, vector<3x1xf32>
    %6 = vector.broadcast %5 : vector<3x1xf32> to vector<3x1024xf32>
    %7 = arith.addf %4, %6 : vector<3x1024xf32>
    %8 = math.tanh %7 : vector<3x1024xf32>
    %c0_7 = arith.constant 0 : index
    %c0_8 = arith.constant 0 : index
    %c0_9 = arith.constant 0 : index
    %9 = vector.load %arg5[%c0_7, %c0_8, %c0_9] : memref<1x3x1024xf32, #tpu.memory_space<vmem>>, vector<1x3x1024xf32>
    %10 = vector.shape_cast %9 : vector<1x3x1024xf32> to vector<3x1024xf32>
    %11 = vector.shape_cast %8 : vector<3x1024xf32> to vector<1x3x1024xf32>
    tpu.vector_store %arg5[%c0_7, %c0_8, %c0_9], %11 {strides = array<i32>} : memref<1x3x1024xf32, #tpu.memory_space<vmem>>, vector<1x3x1024xf32>,
    return
  }
  func.func @transform_0(%arg0: i32, %arg1: i32) -> (i32, i32, i32) {
    %c0_i32 = arith.constant 0 : i32
    %c0_i32_0 = arith.constant 0 : i32
    %c0_i32_1 = arith.constant 0 : i32
    return %arg0, %c0_i32, %c0_i32_0 : i32, i32, i32
  }
  func.func @transform_1(%arg0: i32, %arg1: i32) -> (i32, i32, i32) {
    %c0_i32 = arith.constant 0 : i32
    %c0_i32_0 = arith.constant 0 : i32
    return %arg0, %c0_i32, %arg1 : i32, i32, i32
  }
  func.func @transform_2(%arg0: i32, %arg1: i32) -> (i32, i32) {
    %c0_i32 = arith.constant 0 : i32
    %c0_i32_0 = arith.constant 0 : i32
    %c0_i32_1 = arith.constant 0 : i32
    return %c0_i32, %c0_i32_0 : i32, i32
  }
  func.func @transform_3(%arg0: i32, %arg1: i32) -> (i32, i32, i32) {
    %c0_i32 = arith.constant 0 : i32
    %c0_i32_0 = arith.constant 0 : i32
    return %arg0, %c0_i32, %arg1 : i32, i32, i32
  }
}

</mosaic_0001>

<bundles_post_ra>
// kernel: vae_forward.9
= control target key start
LH: loop header
LB: loop body
LE: loop exit
PB: predicated region body
PF: predicated region fallthrough
CT: control target
= control target key end

     0   :  { %s1049_s12 = smov 0   ;;  %s1051_s13 = smov 0   ;;  %s1301_s0 = inlined_call_operand.vmem [shape: bf16[32,48], index: 0, kind: input, shape index: {}]   ;;  %s1302_s1 = inlined_call_operand.vmem [shape: bf16[48,2048], index: 1, kind: input, shape index: {}]   ;;  %s1303_s2 = inlined_call_operand.vmem [shape: f32[32,1], index: 2, kind: input, shape index: {}]   ;;  %s1304_s3 = inlined_call_operand.vmem [shape: bf16[32,2048], index: 3, kind: output, shape index: {}]  }
   0x1   :  { %s1053_s14 = smov 0  }
   0x2 LB: > { %s892_s15 = sadd.s32 4294967295, %s1026_s14   ;;  %s1066_s16 = sadd.s32 1, %s1026_s14   ;;  %s1026_s14 = sphi %s1053_s14, %s1308_s14   ;;  %s1022_s13 = sphi %s1051_s13, %s1307_s13   ;;  %s1018_s12 = sphi %s1049_s12, %s1306_s12  }
   0x3   : > { %s38_s17 = ssub.s32 %s1026_s14, %s1066_s16  ;;  %s41_s18 = sadd.s32 1, %s1022_s13 }
   0x4   : > { %p39_p0 = scmp.eq.s32.totalorder %s38_s17, 0  ;;  %p48_p1 = scmp.ne.s32.totalorder %s1022_s13, %s1018_s12 }
   0x5   : > { %p49_p2 = scmp.eq.s32.totalorder %s1026_s14, 0  ;;  %p99_p3 = scmp.eq.s32.totalorder %s892_s15, 1 }
   0x6   : > { %s1077_s19 = scalar_select %p39_p0, %s1022_s13, %s41_s18  }
   0x7   : > { %p50_p4 = por %p49_p2, %p48_p1  ;;  %p1079_p5 = por %p99_p3, %p48_p1 }
   0x8   : > { %p895_p6 = scmp.ge.s32.totalorder %s1026_s14, 2 }
   0xa   : > { %127 = sbr.rel (%p895_p6) target bundleno = 34 (0x22), region = 24 }
  0x11   : > { %130 = sbr.rel (!%p50_p4) target bundleno = 34 (0x22), region = 28  ;;  %s132_s21 = sand.u32 (%p50_p4), 1, %s1022_s13  }
  0x12   : > { %s955_s22 = sshll.u32 (%p50_p4), %s1026_s14, 5  ;;  %s973_s23 = smul.u32 (%p50_p4), 192, %s132_s21 }
  0x13   : > { %s1089_s26 = scalar_lea.vmem (%p50_p4), %s1302_s1, %s955_s22 }
  0x14   : > { %v150_v0 = vld [vmem:[%s1089_s26] sm:$0xff] (%p50_p4)  ;;  %v152_v1 = vld [vmem:[%s1089_s26 + $0x8] sm:$0xff] (%p50_p4)  ;;  %v154_v2 = vld [vmem:[%s1089_s26 + $0x10] sm:$0xff] (%p50_p4)  ;;  %s1097_s27 = scalar_lea.vmem (%p50_p4), [#allocation2], %s973_s23 }
  0x15   : > { %v156_v3 = vld [vmem:[%s1089_s26 + $0x18] sm:$0xff] (%p50_p4)  ;;  %v158_v4 = vld [vmem:[%s1089_s26 + $0x40] sm:$0xff] (%p50_p4)  ;;  %v160_v5 = vld [vmem:[%s1089_s26 + $0x48] sm:$0xff] (%p50_p4)  ;;  %151 = vst [vmem:[%s1097_s27] sm:$0xff] (%p50_p4), %v150_v0 }
  0x16   : > { %153 = vst [vmem:[%s1097_s27 + $0x8] sm:$0xff] (%p50_p4), %v152_v1  ;;  %155 = vst [vmem:[%s1097_s27 + $0x10] sm:$0xff] (%p50_p4), %v154_v2  ;;  %v162_v6 = vld [vmem:[%s1089_s26 + $0x50] sm:$0xff] (%p50_p4)  ;;  %v164_v7 = vld [vmem:[%s1089_s26 + $0x58] sm:$0xff] (%p50_p4) }
  0x17   : > { %157 = vst [vmem:[%s1097_s27 + $0x18] sm:$0xff] (%p50_p4), %v156_v3  ;;  %159 = vst [vmem:[%s1097_s27 + $0x20] sm:$0xff] (%p50_p4), %v158_v4  ;;  %v166_v8 = vld [vmem:[%s1089_s26 + $0x80] sm:$0xff] (%p50_p4)  ;;  %v168_v9 = vld [vmem:[%s1089_s26 + $0x88] sm:$0xff] (%p50_p4) }
  0x18   : > { %161 = vst [vmem:[%s1097_s27 + $0x28] sm:$0xff] %v160_v5  ;;  %163 = vst [vmem:[%s1097_s27 + $0x30] sm:$0xff] %v162_v6  ;;  %v170_v10 = vld [vmem:[%s1089_s26 + $0x90] sm:$0xff]  ;;  %v172_v11 = vld [vmem:[%s1089_s26 + $0x98] sm:$0xff] }
  0x19   : > { %165 = vst [vmem:[%s1097_s27 + $0x38] sm:$0xff] %v164_v7  ;;  %167 = vst [vmem:[%s1097_s27 + $0x40] sm:$0xff] %v166_v8  ;;  %v174_v12 = vld [vmem:[%s1089_s26 + $0xc0] sm:$0xff]  ;;  %v176_v13 = vld [vmem:[%s1089_s26 + $0xc8] sm:$0xff] }
  0x1a   : > { %169 = vst [vmem:[%s1097_s27 + $0x48] sm:$0xff] %v168_v9  ;;  %171 = vst [vmem:[%s1097_s27 + $0x50] sm:$0xff] %v170_v10  ;;  %v178_v14 = vld [vmem:[%s1089_s26 + $0xd0] sm:$0xff]  ;;  %v180_v15 = vld [vmem:[%s1089_s26 + $0xd8] sm:$0xff] }
  0x1b   : > { %173 = vst [vmem:[%s1097_s27 + $0x58] sm:$0xff] %v172_v11  ;;  %175 = vst [vmem:[%s1097_s27 + $0x60] sm:$0xff] %v174_v12  ;;  %v182_v16 = vld [vmem:[%s1089_s26 + $0x100] sm:$0xff]  ;;  %v184_v17 = vld [vmem:[%s1089_s26 + $0x108] sm:$0xff] }
  0x1c   : > { %177 = vst [vmem:[%s1097_s27 + $0x68] sm:$0xff] %v176_v13  ;;  %179 = vst [vmem:[%s1097_s27 + $0x70] sm:$0xff] %v178_v14  ;;  %v186_v18 = vld [vmem:[%s1089_s26 + $0x110] sm:$0xff]  ;;  %v188_v19 = vld [vmem:[%s1089_s26 + $0x118] sm:$0xff] }
  0x1d   : > { %181 = vst [vmem:[%s1097_s27 + $0x78] sm:$0xff] %v180_v15  ;;  %183 = vst [vmem:[%s1097_s27 + $0x80] sm:$0xff] %v182_v16  ;;  %v190_v20 = vld [vmem:[%s1089_s26 + $0x140] sm:$0xff]  ;;  %v192_v21 = vld [vmem:[%s1089_s26 + $0x148] sm:$0xff] }
  0x1e   : > { %185 = vst [vmem:[%s1097_s27 + $0x88] sm:$0xff] %v184_v17  ;;  %187 = vst [vmem:[%s1097_s27 + $0x90] sm:$0xff] %v186_v18  ;;  %v194_v22 = vld [vmem:[%s1089_s26 + $0x150] sm:$0xff]  ;;  %v196_v23 = vld [vmem:[%s1089_s26 + $0x158] sm:$0xff] }
  0x1f   : > { %189 = vst [vmem:[%s1097_s27 + $0x98] sm:$0xff] %v188_v19  ;;  %191 = vst [vmem:[%s1097_s27 + $0xa0] sm:$0xff] %v190_v20 }
  0x20   : > { %193 = vst [vmem:[%s1097_s27 + $0xa8] sm:$0xff] %v192_v21  ;;  %195 = vst [vmem:[%s1097_s27 + $0xb0] sm:$0xff] %v194_v22 }
  0x21   : > { %197 = vst [vmem:[%s1097_s27 + $0xb8] sm:$0xff] %v196_v23 }
  0x22 PF: > { %p898_p7 = scmp.ge.s32.totalorder %s1026_s14, 1  ;;  %p202_p8 = scmp.lt.s32.totalorder %s1026_s14, 3 }
  0x24   : > { %p203_p9 = pnand %p898_p7, %p202_p8 }
  0x25   : > { %s209_s28 = sand.u32 (!%p203_p9), 1, %s1018_s12   ;;  %v1028_v24 = vmov (!%p203_p9), 0   ;;  %v262_v25 = vld [vmem:[%s1303_s2] sm:$0xff] (!%p203_p9)  ;;  %v263_v26 = vld [vmem:[%s1303_s2 + $0x8] sm:$0xff] (!%p203_p9)  ;;  %v264_v27 = vld [vmem:[%s1303_s2 + $0x10] sm:$0xff] (!%p203_p9)  ;;  %vm416_vm0 = vcmask (!%p203_p9), 392192  }
  0x26   : > { %206 = sbr.rel (%p203_p9) target bundleno = 312 (0x138), region = 51  ;;  %455 = vmatprep.mubr.bf16.mxu0 (!%p203_p9), %v1028_v24  ;;  %508 = vmatprep.mubr.bf16.mxu1 (!%p203_p9), %v1028_v24  ;;  %v265_v47 = vld [vmem:[%s1303_s2 + $0x18] sm:$0xff] (!%p203_p9)  ;;  %v1002_v61 = vld [vmem:[%s1301_s0] sm:$0xff] (!%p203_p9)   ;;  %v1003_v12 = vld [vmem:[%s1301_s0 + $0x8] sm:$0xff] (!%p203_p9)   ;;  %s899_s23 = sshll.u32 (!%p203_p9), %s209_s28, 7 }
  0x27   : > { %s974_s29 = smul.u32 (!%p203_p9), 192, %s209_s28  ;;  %1000 = vset.pattern.permute.xlu0 (!%p203_p9), %v1028_v24  ;;  %1001 = vset.pattern.permute.xlu1 (!%p203_p9), %v1028_v24  ;;  %s1224_s12 = scalar_lea.vmem (!%p203_p9), [#allocation3], %s899_s23 }
  0x28   : > { %268 = vperm.xlu0 (!%p203_p9), %1000, %v262_v25   ;;  %278 = vperm.xlu1 (!%p203_p9), %1001, %v264_v27  }
  0x29   : > { %s1159_s9 = scalar_lea.vmem (!%p203_p9), [#allocation2], %s974_s29 }
  0x2a   : > { %v238_v28 = vld [vmem:[%s1159_s9] sm:$0xff] (!%p203_p9)  ;;  %v239_v30 = vld [vmem:[%s1159_s9 + $0x8] sm:$0xff] (!%p203_p9)  ;;  %v240_v51 = vld [vmem:[%s1159_s9 + $0x10] sm:$0xff] (!%p203_p9) }
  0x2b   : > { %v242_v29 = vld [vmem:[%s1159_s9 + $0x20] sm:$0xff] (!%p203_p9)  ;;  %v243_v32 = vld [vmem:[%s1159_s9 + $0x28] sm:$0xff] (!%p203_p9)  ;;  %v244_v52 = vld [vmem:[%s1159_s9 + $0x30] sm:$0xff] (!%p203_p9) }
  0x2c   : > { %v903_v31 = vcombine.high (!%p203_p9), %v238_v28, %v242_v29  ;;  %v902_v33 = vcombine.low (!%p203_p9), %v238_v28, %v242_v29  ;;  %v246_v34 = vld [vmem:[%s1159_s9 + $0x40] sm:$0xff] (!%p203_p9)  ;;  %v905_v36 = vcombine.high (!%p203_p9), %v239_v30, %v243_v32  ;;  %v904_v37 = vcombine.low (!%p203_p9), %v239_v30, %v243_v32  ;;  %v247_v39 = vld [vmem:[%s1159_s9 + $0x48] sm:$0xff] (!%p203_p9)  ;;  %273 = vperm.xlu0 (!%p203_p9), %1000, %v263_v26   ;;  %v241_v53 = vld [vmem:[%s1159_s9 + $0x18] sm:$0xff] (!%p203_p9) }
  0x2d   : > { %v250_v35 = vld [vmem:[%s1159_s9 + $0x60] sm:$0xff]  ;;  %v251_v40 = vld [vmem:[%s1159_s9 + $0x68] sm:$0xff]  ;;  %v245_v54 = vld [vmem:[%s1159_s9 + $0x38] sm:$0xff]  ;;  %283 = vperm.xlu1 %1001, %v265_v47   ;;  %v907_v57 = vcombine.high %v240_v51, %v244_v52  ;;  %v906_v0 = vcombine.low %v240_v51, %v244_v52  ;;  %s972_s24 = sshll.u32 (%p1079_p5), %s892_s15, 5 }
  0x2e   : > { %v911_v38 = vcombine.high %v246_v34, %v250_v35  ;;  %v254_v41 = vld [vmem:[%s1159_s9 + $0x80] sm:$0xff]  ;;  %423 = vmatprep.subr.bf16.mxu0 %v903_v31  ;;  %v913_v42 = vcombine.high %v247_v39, %v251_v40  ;;  %v255_v44 = vld [vmem:[%s1159_s9 + $0x88] sm:$0xff]  ;;  %476 = vmatprep.subr.bf16.mxu1 %v905_v36  ;;  %v910_v46 = vcombine.low %v246_v34, %v250_v35  ;;  %v248_v59 = vld [vmem:[%s1159_s9 + $0x50] sm:$0xff]  ;;  %s788_s20 = scalar_lea.vmem (%p1079_p5), %s1304_s3, %s972_s24 }
  0x2f   : > { %v258_v43 = vld [vmem:[%s1159_s9 + $0xa0] sm:$0xff]  ;;  %v259_v45 = vld [vmem:[%s1159_s9 + $0xa8] sm:$0xff]  ;;  %424 = vmatpush1.bf16.msra.mxu0 %v902_v33  ;;  %477 = vmatpush1.bf16.msra.mxu1 %v904_v37  ;;  %v912_v48 = vcombine.low %v247_v39, %v251_v40  ;;  %v909_v58 = vcombine.high %v241_v53, %v245_v54  ;;  %v252_v60 = vld [vmem:[%s1159_s9 + $0x70] sm:$0xff]  ;;  %v908_v1 = vcombine.low %v241_v53, %v245_v54 }
  0x30   : > { %425 = vmatprep.subr.bf16.mxu0 %v911_v38  ;;  %v919_v49 = vcombine.high %v254_v41, %v258_v43  ;;  %478 = vmatprep.subr.bf16.mxu1 %v913_v42  ;;  %v921_v50 = vcombine.high %v255_v44, %v259_v45  ;;  %v918_v55 = vcombine.low %v254_v41, %v258_v43  ;;  %v249_v62 = vld [vmem:[%s1159_s9 + $0x58] sm:$0xff]  ;;  %v256_v4 = vld [vmem:[%s1159_s9 + $0x90] sm:$0xff] }
  0x31   : > { %v920_v56 = vcombine.low %v255_v44, %v259_v45  ;;  %v253_v63 = vld [vmem:[%s1159_s9 + $0x78] sm:$0xff]  ;;  %v915_v2 = vcombine.high %v248_v59, %v252_v60  ;;  %v260_v5 = vld [vmem:[%s1159_s9 + $0xb0] sm:$0xff]  ;;  %v914_v8 = vcombine.low %v248_v59, %v252_v60 }
  0x32   : > { %v917_v3 = vcombine.high %v249_v62, %v253_v63  ;;  %v257_v6 = vld [vmem:[%s1159_s9 + $0x98] sm:$0xff]  ;;  %v916_v9 = vcombine.low %v249_v62, %v253_v63  ;;  %v923_v10 = vcombine.high %v256_v4, %v260_v5  ;;  %v922_v13 = vcombine.low %v256_v4, %v260_v5 }
  0x33   : > { %426 = vmatpush1.bf16.msra.mxu0 %v910_v46  ;;  %479 = vmatpush1.bf16.msra.mxu1 %v912_v48  ;;  %v261_v7 = vld [vmem:[%s1159_s9 + $0xb8] sm:$0xff] }
  0x34   : > { %427 = vmatprep.subr.bf16.mxu0 %v919_v49  ;;  %480 = vmatprep.subr.bf16.mxu1 %v921_v50  ;;  %v925_v11 = vcombine.high %v257_v6, %v261_v7  ;;  %v924_v14 = vcombine.low %v257_v6, %v261_v7 }
  0x37   : > { %428 = vmatpush1.bf16.msra.mxu0 %v918_v55  ;;  %481 = vmatpush1.bf16.msra.mxu1 %v920_v56 }
  0x38   : > { %529 = vmatprep.subr.bf16.mxu0 %v907_v57  ;;  %582 = vmatprep.subr.bf16.mxu1 %v909_v58 }
  0x3a   : > { %926 = vmatmul.mubr.msk.bf16.vlgmr.msra.gmra.mrb[0].mxu0 %vm416_vm0, %v1002_v61  ;;  %928 = vmatmul.mubr.msk.bf16.vlgmr.msra.gmra.mrb[0].mxu1 %vm416_vm0, %v1002_v61 }
  0x3b   : > { %530 = vmatpush1.bf16.msra.mxu0 %v906_v0  ;;  %583 = vmatpush1.bf16.msra.mxu1 %v908_v1 }
  0x3c   : > { %531 = vmatprep.subr.bf16.mxu0 %v915_v2  ;;  %584 = vmatprep.subr.bf16.mxu1 %v917_v3 }
  0x3d   : > { %465 = vmatprep.mubr.bf16.mxu0 %v1028_v24  ;;  %518 = vmatprep.mubr.bf16.mxu1 %v1028_v24 }
  0x3f   : > { %532 = vmatpush1.bf16.msra.mxu0 %v914_v8  ;;  %585 = vmatpush1.bf16.msra.mxu1 %v916_v9 }
  0x40   : > { %533 = vmatprep.subr.bf16.mxu0 %v923_v10  ;;  %586 = vmatprep.subr.bf16.mxu1 %v925_v11 }
  0x42   : > { %927 = vmatmul.mubr.msk.bf16.gmra.mrb[4].mxu0 %vm416_vm0, %v1003_v12  ;;  %929 = vmatmul.mubr.msk.bf16.gmra.mrb[4].mxu1 %vm416_vm0, %v1003_v12 }
  0x43   : > { %534 = vmatpush1.bf16.msra.mxu0 %v922_v13  ;;  %587 = vmatpush1.bf16.msra.mxu1 %v924_v14 }
  0x44   : > { %561 = vmatprep.mubr.bf16.mxu0 %v1028_v24  ;;  %614 = vmatprep.mubr.bf16.mxu1 %v1028_v24 }
  0x4a   : > { %930 = vmatmul.mubr.msk.bf16.vlgmr.msra.gmra.mrb[8].mxu0 %vm416_vm0, %v1002_v61  ;;  %932 = vmatmul.mubr.msk.bf16.vlgmr.msra.gmra.mrb[8].mxu1 %vm416_vm0, %v1002_v61 }
  0x4b   : > { %571 = vmatprep.mubr.bf16.mxu0 %v1028_v24  ;;  %624 = vmatprep.mubr.bf16.mxu1 %v1028_v24 }
  0x52   : > { %931 = vmatmul.mubr.msk.bf16.gmra.mrb[12].mxu0 %vm416_vm0, %v1003_v12  ;;  %933 = vmatmul.mubr.msk.bf16.gmra.mrb[12].mxu1 %vm416_vm0, %v1003_v12 }
  0xa7   : > { %v1208_v15 = vpop.permute.xlu0 %268  ;;  %v1210_v16 = vpop.permute.xlu1 %278 }
  0xab   : > { %v1212_v18 = vpop.permute.xlu0 %273 }
  0xac   : > { %v1227_v46 = vpop.permute.xlu1 %283 }
 0x10d   : > { %v457_v17 = vpop.f32.mrb[0].mxu0  ;;  %v510_v20 = vpop.f32.mrb[0].mxu1 }
 0x10e   : > { %v458_v19 = vadd.f32 %v457_v17, %v1208_v15  ;;  %v459_v21 = vpop.f32.mrb[1].mxu0  ;;  %v511_v22 = vadd.f32 %v510_v20, %v1208_v15  ;;  %v512_v24 = vpop.f32.mrb[1].mxu1 }
 0x10f   : > { %v460_v23 = vadd.f32 %v459_v21, %v1208_v15  ;;  %v461_v25 = vpop.f32.mrb[2].mxu0  ;;  %v513_v27 = vadd.f32 %v512_v24, %v1208_v15  ;;  %v514_v29 = vpop.f32.mrb[2].mxu1 }
 0x110   : > { %v635_v26 = vmax.f32 %v458_v19, 0.0  ;;  %v462_v28 = vadd.f32 %v461_v25, %v1212_v18  ;;  %v463_v30 = vpop.f32.mrb[3].mxu0  ;;  %v637_v31 = vmax.f32 %v511_v22, 0.0  ;;  %v515_v33 = vadd.f32 %v514_v29, %v1212_v18  ;;  %v516_v35 = vpop.f32.mrb[3].mxu1 }
 0x111   : > { %v636_v32 = vmax.f32 %v460_v23, 0.0  ;;  %v464_v34 = vadd.f32 %v463_v30, %v1212_v18  ;;  %v638_v36 = vmax.f32 %v513_v27, 0.0  ;;  %v517_v38 = vadd.f32 %v516_v35, %v1212_v18 }
 0x112   : > { %v643_v37 = vmax.f32 %v462_v28, 0.0  ;;  %v645_v40 = vmax.f32 %v515_v33, 0.0 }
 0x113   : > { %v956_v39 = vpack.c.bf16 %v636_v32, %v635_v26  ;;  %v644_v41 = vmax.f32 %v464_v34, 0.0  ;;  %v957_v42 = vpack.c.bf16 %v638_v36, %v637_v31  ;;  %v646_v43 = vmax.f32 %v517_v38, 0.0 }
 0x115   : > { %763 = vst [vmem:[%s1224_s12] sm:$0xff] %v956_v39  ;;  %v960_v44 = vpack.c.bf16 %v644_v41, %v643_v37  ;;  %v467_v45 = vpop.f32.mrb[4].mxu0  ;;  %764 = vst [vmem:[%s1224_s12 + $0x8] sm:$0xff] %v957_v42  ;;  %v961_v47 = vpack.c.bf16 %v646_v43, %v645_v40  ;;  %v520_v49 = vpop.f32.mrb[4].mxu1 }
 0x116   : > { %v468_v48 = vadd.f32 %v467_v45, %v1210_v16  ;;  %v469_v50 = vpop.f32.mrb[5].mxu0  ;;  %v521_v51 = vadd.f32 %v520_v49, %v1210_v16  ;;  %v522_v53 = vpop.f32.mrb[5].mxu1 }
 0x117   : > { %767 = vst [vmem:[%s1224_s12 + $0x20] sm:$0xff] %v960_v44  ;;  %v470_v52 = vadd.f32 %v469_v50, %v1210_v16  ;;  %v471_v54 = vpop.f32.mrb[6].mxu0  ;;  %768 = vst [vmem:[%s1224_s12 + $0x28] sm:$0xff] %v961_v47  ;;  %v523_v56 = vadd.f32 %v522_v53, %v1210_v16  ;;  %v524_v58 = vpop.f32.mrb[6].mxu1 }
 0x118   : > { %v651_v55 = vmax.f32 %v468_v48, 0.0  ;;  %v472_v57 = vadd.f32 %v471_v54, %v1227_v46  ;;  %v473_v59 = vpop.f32.mrb[7].mxu0  ;;  %v653_v60 = vmax.f32 %v521_v51, 0.0  ;;  %v525_v62 = vadd.f32 %v524_v58, %v1227_v46  ;;  %v526_v0 = vpop.f32.mrb[7].mxu1 }
 0x119   : > { %v652_v61 = vmax.f32 %v470_v52, 0.0  ;;  %v474_v63 = vadd.f32 %v473_v59, %v1227_v46  ;;  %v654_v1 = vmax.f32 %v523_v56, 0.0  ;;  %v527_v3 = vadd.f32 %v526_v0, %v1227_v46 }
 0x11a   : > { %v659_v2 = vmax.f32 %v472_v57, 0.0  ;;  %v661_v5 = vmax.f32 %v525_v62, 0.0 }
 0x11b   : > { %v964_v4 = vpack.c.bf16 %v652_v61, %v651_v55  ;;  %v660_v6 = vmax.f32 %v474_v63, 0.0  ;;  %v965_v7 = vpack.c.bf16 %v654_v1, %v653_v60  ;;  %v662_v8 = vmax.f32 %v527_v3, 0.0 }
 0x11d   : > { %771 = vst [vmem:[%s1224_s12 + $0x40] sm:$0xff] %v964_v4  ;;  %v968_v9 = vpack.c.bf16 %v660_v6, %v659_v2  ;;  %v563_v10 = vpop.f32.mrb[8].mxu0  ;;  %772 = vst [vmem:[%s1224_s12 + $0x48] sm:$0xff] %v965_v7  ;;  %v969_v11 = vpack.c.bf16 %v662_v8, %v661_v5  ;;  %v616_v13 = vpop.f32.mrb[8].mxu1  ;;  %v803_v4 = vld [vmem:[%s1224_s12 + $0x8] sm:$0xff] (%p1079_p5) }
 0x11e   : > { %v564_v12 = vadd.f32 %v563_v10, %v1208_v15  ;;  %v565_v14 = vpop.f32.mrb[9].mxu0  ;;  %v617_v17 = vadd.f32 %v616_v13, %v1208_v15  ;;  %v618_v20 = vpop.f32.mrb[9].mxu1  ;;  %v809_v7 = vld [vmem:[%s1224_s12 + $0x20] sm:$0xff] (%p1079_p5)  ;;  %v811_v8 = vld [vmem:[%s1224_s12 + $0x28] sm:$0xff] (%p1079_p5)  ;;  %804 = vst [vmem:[%s788_s20 + $0x8] sm:$0xff] (%p1079_p5), %v803_v4 }
 0x11f   : > { %775 = vst [vmem:[%s1224_s12 + $0x60] sm:$0xff] %v968_v9  ;;  %v566_v19 = vadd.f32 %v565_v14, %v1208_v15  ;;  %v567_v21 = vpop.f32.mrb[10].mxu0  ;;  %776 = vst [vmem:[%s1224_s12 + $0x68] sm:$0xff] %v969_v11  ;;  %v619_v23 = vadd.f32 %v618_v20, %v1208_v15  ;;  %v620_v25 = vpop.f32.mrb[10].mxu1 }
 0x120   : > { %v639_v22 = vmax.f32 %v564_v12, 0.0  ;;  %v568_v24 = vadd.f32 %v567_v21, %v1212_v18  ;;  %v569_v26 = vpop.f32.mrb[11].mxu0  ;;  %v641_v27 = vmax.f32 %v617_v17, 0.0  ;;  %v621_v29 = vadd.f32 %v620_v25, %v1212_v18  ;;  %v622_v31 = vpop.f32.mrb[11].mxu1  ;;  %810 = vst [vmem:[%s788_s20 + $0x40] sm:$0xff] (%p1079_p5), %v809_v7  ;;  %812 = vst [vmem:[%s788_s20 + $0x48] sm:$0xff] (%p1079_p5), %v811_v8 }
 0x121   : > { %v640_v28 = vmax.f32 %v566_v19, 0.0  ;;  %v570_v30 = vadd.f32 %v569_v26, %v1212_v18  ;;  %v642_v32 = vmax.f32 %v619_v23, 0.0  ;;  %v623_v34 = vadd.f32 %v622_v31, %v1212_v18 }
 0x122   : > { %v647_v33 = vmax.f32 %v568_v24, 0.0  ;;  %v649_v15 = vmax.f32 %v621_v29, 0.0 }
 0x123   : > { %v958_v35 = vpack.c.bf16 %v640_v28, %v639_v22  ;;  %v648_v36 = vmax.f32 %v570_v30, 0.0  ;;  %v959_v37 = vpack.c.bf16 %v642_v32, %v641_v27  ;;  %v650_v38 = vmax.f32 %v623_v34, 0.0 }
 0x124   : > { %v817_v11 = vld [vmem:[%s1224_s12 + $0x40] sm:$0xff] (%p1079_p5)  ;;  %v819_v12 = vld [vmem:[%s1224_s12 + $0x48] sm:$0xff] (%p1079_p5) }
 0x125   : > { %765 = vst [vmem:[%s1224_s12 + $0x10] sm:$0xff] %v958_v35  ;;  %v962_v39 = vpack.c.bf16 %v648_v36, %v647_v33  ;;  %v573_v40 = vpop.f32.mrb[12].mxu0  ;;  %766 = vst [vmem:[%s1224_s12 + $0x18] sm:$0xff] %v959_v37  ;;  %v963_v41 = vpack.c.bf16 %v650_v38, %v649_v15  ;;  %v626_v43 = vpop.f32.mrb[12].mxu1 }
 0x126   : > { %v574_v42 = vadd.f32 %v573_v40, %v1210_v16  ;;  %v575_v44 = vpop.f32.mrb[13].mxu0  ;;  %v627_v45 = vadd.f32 %v626_v43, %v1210_v16  ;;  %v628_v47 = vpop.f32.mrb[13].mxu1  ;;  %818 = vst [vmem:[%s788_s20 + $0x80] sm:$0xff] (%p1079_p5), %v817_v11  ;;  %820 = vst [vmem:[%s788_s20 + $0x88] sm:$0xff] (%p1079_p5), %v819_v12  ;;  %v825_v17 = vld [vmem:[%s1224_s12 + $0x60] sm:$0xff] (%p1079_p5)  ;;  %v827_v19 = vld [vmem:[%s1224_s12 + $0x68] sm:$0xff] (%p1079_p5) }
 0x127   : > { %769 = vst [vmem:[%s1224_s12 + $0x30] sm:$0xff] %v962_v39  ;;  %v576_v18 = vadd.f32 %v575_v44, %v1210_v16  ;;  %v577_v48 = vpop.f32.mrb[14].mxu0  ;;  %770 = vst [vmem:[%s1224_s12 + $0x38] sm:$0xff] %v963_v41  ;;  %v629_v50 = vadd.f32 %v628_v47, %v1210_v16  ;;  %v630_v52 = vpop.f32.mrb[14].mxu1 }
 0x128   : > { %v655_v49 = vmax.f32 %v574_v42, 0.0  ;;  %v578_v51 = vadd.f32 %v577_v48, %v1227_v46  ;;  %v579_v53 = vpop.f32.mrb[15].mxu0  ;;  %v657_v54 = vmax.f32 %v627_v45, 0.0  ;;  %v631_v56 = vadd.f32 %v630_v52, %v1227_v46  ;;  %v632_v58 = vpop.f32.mrb[15].mxu1  ;;  %826 = vst [vmem:[%s788_s20 + $0xc0] sm:$0xff] (%p1079_p5), %v825_v17  ;;  %828 = vst [vmem:[%s788_s20 + $0xc8] sm:$0xff] (%p1079_p5), %v827_v19 }
 0x129   : > { %v656_v55 = vmax.f32 %v576_v18, 0.0  ;;  %v580_v57 = vadd.f32 %v579_v53, %v1227_v46  ;;  %v658_v59 = vmax.f32 %v629_v50, 0.0  ;;  %v633_v61 = vadd.f32 %v632_v58, %v1227_v46  ;;  %785 = sbr.rel (!%p1079_p5) target bundleno = 312 (0x138), region = 59  ;;  %v801_v46 = vld [vmem:[%s1224_s12] sm:$0xff] (%p1079_p5) }
 0x12a   : > { %v663_v60 = vmax.f32 %v578_v51, 0.0  ;;  %v665_v62 = vmax.f32 %v631_v56, 0.0  ;;  %802 = vst [vmem:[%s788_s20] sm:$0xff] (%p1079_p5), %v801_v46 }
 0x12b   : > { %v966_v16 = vpack.c.bf16 %v656_v55, %v655_v49  ;;  %v664_v63 = vmax.f32 %v580_v57, 0.0  ;;  %v967_v0 = vpack.c.bf16 %v658_v59, %v657_v54  ;;  %v666_v1 = vmax.f32 %v633_v61, 0.0 }
 0x12c   : > { %v805_v5 = vld [vmem:[%s1224_s12 + $0x10] sm:$0xff] (%p1079_p5)  ;;  %v807_v6 = vld [vmem:[%s1224_s12 + $0x18] sm:$0xff] (%p1079_p5) }
 0x12d   : > { %773 = vst [vmem:[%s1224_s12 + $0x50] sm:$0xff] %v966_v16  ;;  %v970_v2 = vpack.c.bf16 %v664_v63, %v663_v60  ;;  %774 = vst [vmem:[%s1224_s12 + $0x58] sm:$0xff] %v967_v0  ;;  %v971_v3 = vpack.c.bf16 %v666_v1, %v665_v62 }
 0x12e   : > { %806 = vst [vmem:[%s788_s20 + $0x10] sm:$0xff] (%p1079_p5), %v805_v5  ;;  %808 = vst [vmem:[%s788_s20 + $0x18] sm:$0xff] (%p1079_p5), %v807_v6  ;;  %v813_v9 = vld [vmem:[%s1224_s12 + $0x30] sm:$0xff] (%p1079_p5)  ;;  %v815_v10 = vld [vmem:[%s1224_s12 + $0x38] sm:$0xff] (%p1079_p5) }
 0x12f   : > { %777 = vst [vmem:[%s1224_s12 + $0x70] sm:$0xff] %v970_v2  ;;  %778 = vst [vmem:[%s1224_s12 + $0x78] sm:$0xff] %v971_v3 }
 0x130   : > { %814 = vst [vmem:[%s788_s20 + $0x50] sm:$0xff] %v813_v9  ;;  %816 = vst [vmem:[%s788_s20 + $0x58] sm:$0xff] %v815_v10 }
 0x134   : > { %v821_v13 = vld [vmem:[%s1224_s12 + $0x50] sm:$0xff]  ;;  %v823_v14 = vld [vmem:[%s1224_s12 + $0x58] sm:$0xff] }
 0x135   : > { %822 = vst [vmem:[%s788_s20 + $0x90] sm:$0xff] %v821_v13  ;;  %824 = vst [vmem:[%s788_s20 + $0x98] sm:$0xff] %v823_v14 }
 0x136   : > { %v829_v20 = vld [vmem:[%s1224_s12 + $0x70] sm:$0xff]  ;;  %v831_v21 = vld [vmem:[%s1224_s12 + $0x78] sm:$0xff] }
 0x137   : > { %830 = vst [vmem:[%s788_s20 + $0xd0] sm:$0xff] %v829_v20  ;;  %832 = vst [vmem:[%s788_s20 + $0xd8] sm:$0xff] %v831_v21 }
 0x138 PF: > { %p10_p10 = scmp.ge.s32.totalorder %s1066_s16, 4   ;;  %s1306_s12 = smov %s1022_s13 }
 0x139   : > { %s1307_s13 = smov %s1077_s19  ;;  %s1308_s14 = smov %s1066_s16 }
 0x13a   :  { %12 = sbr.rel (!%p10_p10) target bundleno = 2 (0x2), region = 113 }

// kernel: vae_forward.10
= control target key start
LH: loop header
LB: loop body
LE: loop exit
PB: predicated region body
PF: predicated region fallthrough
CT: control target
= control target key end

     0   :  { %s1455_s12 = smov 0   ;;  %s1457_s13 = smov 0   ;;  %s1763_s0 = inlined_call_operand.vmem [shape: bf16[32,512], index: 0, kind: input, shape index: {}]   ;;  %s1764_s1 = inlined_call_operand.vmem [shape: bf16[512,512], index: 1, kind: input, shape index: {}]   ;;  %s1765_s2 = inlined_call_operand.vmem [shape: f32[32,1], index: 2, kind: input, shape index: {}]   ;;  %s1766_s3 = inlined_call_operand.vmem [shape: bf16[32,512], index: 3, kind: output, shape index: {}]  }
   0x1   :  { %s1459_s14 = smov 0  }
   0x2 LB: > { %s1162_s15 = sadd.s32 4294967295, %s1432_s14   ;;  %s1472_s16 = sadd.s32 1, %s1432_s14   ;;  %s1432_s14 = sphi %s1459_s14, %s1770_s14   ;;  %s1428_s13 = sphi %s1457_s13, %s1769_s13   ;;  %s1424_s12 = sphi %s1455_s12, %s1768_s12  }
   0x3   : > { %s38_s17 = ssub.s32 %s1432_s14, %s1472_s16  ;;  %s41_s18 = sadd.s32 1, %s1428_s13 }
   0x4   : > { %p39_p0 = scmp.eq.s32.totalorder %s38_s17, 0  ;;  %p48_p1 = scmp.ne.s32.totalorder %s1428_s13, %s1424_s12 }
   0x5   : > { %p49_p2 = scmp.eq.s32.totalorder %s1432_s14, 0  ;;  %p99_p3 = scmp.eq.s32.totalorder %s1162_s15, 1 }
   0x6   : > { %s1483_s19 = scalar_select %p39_p0, %s1428_s13, %s41_s18  }
   0x7   : > { %p50_p4 = por %p49_p2, %p48_p1  ;;  %p1485_p5 = por %p99_p3, %p48_p1 }
   0x8   : > { %p1165_p6 = scmp.ge.s32.totalorder %s1432_s14, 2 }
   0xa   : > { %127 = sbr.rel (%p1165_p6) target bundleno = 53 (0x35), region = 24 }
  0x11   : > { %130 = sbr.rel (!%p50_p4) target bundleno = 53 (0x35), region = 28  ;;  %s132_s21 = sand.u32 (%p50_p4), 1, %s1428_s13  }
  0x12   : > { %s1253_s22 = sshll.u32 (%p50_p4), %s1432_s14, 3  ;;  %s1166_s23 = sshll.u32 (%p50_p4), %s132_s21, 9 }
  0x13   : > { %s1495_s26 = scalar_lea.vmem (%p50_p4), %s1764_s1, %s1253_s22  ;;  %s1500_s27 = scalar_lea.vmem (%p50_p4), [#allocation2], %s1166_s23 }
  0x14   : > { %v291_v0 = vld [vmem:[%s1495_s26] sm:$0xff] (%p50_p4)  ;;  %v293_v1 = vld [vmem:[%s1495_s26 + $0x10] sm:$0xff] (%p50_p4) }
  0x15   : > { %v295_v2 = vld [vmem:[%s1495_s26 + $0x20] sm:$0xff] (%p50_p4)  ;;  %292 = vst [vmem:[%s1500_s27] sm:$0xff] (%p50_p4), %v291_v0  ;;  %294 = vst [vmem:[%s1500_s27 + $0x8] sm:$0xff] (%p50_p4), %v293_v1  ;;  %v297_v3 = vld [vmem:[%s1495_s26 + $0x30] sm:$0xff] (%p50_p4) }
  0x16   : > { %296 = vst [vmem:[%s1500_s27 + $0x10] sm:$0xff] (%p50_p4), %v295_v2  ;;  %v299_v4 = vld [vmem:[%s1495_s26 + $0x40] sm:$0xff] (%p50_p4)  ;;  %v301_v5 = vld [vmem:[%s1495_s26 + $0x50] sm:$0xff] (%p50_p4)  ;;  %298 = vst [vmem:[%s1500_s27 + $0x18] sm:$0xff] (%p50_p4), %v297_v3 }
  0x17   : > { %300 = vst [vmem:[%s1500_s27 + $0x20] sm:$0xff] (%p50_p4), %v299_v4  ;;  %302 = vst [vmem:[%s1500_s27 + $0x28] sm:$0xff] (%p50_p4), %v301_v5  ;;  %v303_v6 = vld [vmem:[%s1495_s26 + $0x60] sm:$0xff] (%p50_p4)  ;;  %v305_v7 = vld [vmem:[%s1495_s26 + $0x70] sm:$0xff] (%p50_p4) }
  0x18   : > { %v307_v8 = vld [vmem:[%s1495_s26 + $0x80] sm:$0xff]  ;;  %304 = vst [vmem:[%s1500_s27 + $0x30] sm:$0xff] %v303_v6  ;;  %306 = vst [vmem:[%s1500_s27 + $0x38] sm:$0xff] %v305_v7  ;;  %v309_v9 = vld [vmem:[%s1495_s26 + $0x90] sm:$0xff] }
  0x19   : > { %308 = vst [vmem:[%s1500_s27 + $0x40] sm:$0xff] %v307_v8  ;;  %v311_v10 = vld [vmem:[%s1495_s26 + $0xa0] sm:$0xff]  ;;  %v313_v11 = vld [vmem:[%s1495_s26 + $0xb0] sm:$0xff]  ;;  %310 = vst [vmem:[%s1500_s27 + $0x48] sm:$0xff] %v309_v9 }
  0x1a   : > { %312 = vst [vmem:[%s1500_s27 + $0x50] sm:$0xff] %v311_v10  ;;  %314 = vst [vmem:[%s1500_s27 + $0x58] sm:$0xff] %v313_v11  ;;  %v315_v12 = vld [vmem:[%s1495_s26 + $0xc0] sm:$0xff]  ;;  %v317_v13 = vld [vmem:[%s1495_s26 + $0xd0] sm:$0xff] }
  0x1b   : > { %v319_v14 = vld [vmem:[%s1495_s26 + $0xe0] sm:$0xff]  ;;  %316 = vst [vmem:[%s1500_s27 + $0x60] sm:$0xff] %v315_v12  ;;  %318 = vst [vmem:[%s1500_s27 + $0x68] sm:$0xff] %v317_v13  ;;  %v321_v15 = vld [vmem:[%s1495_s26 + $0xf0] sm:$0xff] }
  0x1c   : > { %320 = vst [vmem:[%s1500_s27 + $0x70] sm:$0xff] %v319_v14  ;;  %v323_v16 = vld [vmem:[%s1495_s26 + $0x100] sm:$0xff]  ;;  %v325_v17 = vld [vmem:[%s1495_s26 + $0x110] sm:$0xff]  ;;  %322 = vst [vmem:[%s1500_s27 + $0x78] sm:$0xff] %v321_v15 }
  0x1d   : > { %324 = vst [vmem:[%s1500_s27 + $0x80] sm:$0xff] %v323_v16  ;;  %326 = vst [vmem:[%s1500_s27 + $0x88] sm:$0xff] %v325_v17  ;;  %v327_v18 = vld [vmem:[%s1495_s26 + $0x120] sm:$0xff]  ;;  %v329_v19 = vld [vmem:[%s1495_s26 + $0x130] sm:$0xff] }
  0x1e   : > { %v331_v20 = vld [vmem:[%s1495_s26 + $0x140] sm:$0xff]  ;;  %328 = vst [vmem:[%s1500_s27 + $0x90] sm:$0xff] %v327_v18  ;;  %330 = vst [vmem:[%s1500_s27 + $0x98] sm:$0xff] %v329_v19  ;;  %v333_v21 = vld [vmem:[%s1495_s26 + $0x150] sm:$0xff] }
  0x1f   : > { %332 = vst [vmem:[%s1500_s27 + $0xa0] sm:$0xff] %v331_v20  ;;  %v335_v22 = vld [vmem:[%s1495_s26 + $0x160] sm:$0xff]  ;;  %v337_v23 = vld [vmem:[%s1495_s26 + $0x170] sm:$0xff]  ;;  %334 = vst [vmem:[%s1500_s27 + $0xa8] sm:$0xff] %v333_v21 }
  0x20   : > { %336 = vst [vmem:[%s1500_s27 + $0xb0] sm:$0xff] %v335_v22  ;;  %338 = vst [vmem:[%s1500_s27 + $0xb8] sm:$0xff] %v337_v23  ;;  %v339_v24 = vld [vmem:[%s1495_s26 + $0x180] sm:$0xff]  ;;  %v341_v25 = vld [vmem:[%s1495_s26 + $0x190] sm:$0xff] }
  0x21   : > { %v343_v26 = vld [vmem:[%s1495_s26 + $0x1a0] sm:$0xff]  ;;  %340 = vst [vmem:[%s1500_s27 + $0xc0] sm:$0xff] %v339_v24  ;;  %342 = vst [vmem:[%s1500_s27 + $0xc8] sm:$0xff] %v341_v25  ;;  %v345_v27 = vld [vmem:[%s1495_s26 + $0x1b0] sm:$0xff] }
  0x22   : > { %344 = vst [vmem:[%s1500_s27 + $0xd0] sm:$0xff] %v343_v26  ;;  %v347_v28 = vld [vmem:[%s1495_s26 + $0x1c0] sm:$0xff]  ;;  %v349_v29 = vld [vmem:[%s1495_s26 + $0x1d0] sm:$0xff]  ;;  %346 = vst [vmem:[%s1500_s27 + $0xd8] sm:$0xff] %v345_v27 }
  0x23   : > { %348 = vst [vmem:[%s1500_s27 + $0xe0] sm:$0xff] %v347_v28  ;;  %350 = vst [vmem:[%s1500_s27 + $0xe8] sm:$0xff] %v349_v29  ;;  %v351_v30 = vld [vmem:[%s1495_s26 + $0x1e0] sm:$0xff]  ;;  %v353_v31 = vld [vmem:[%s1495_s26 + $0x1f0] sm:$0xff] }
  0x24   : > { %v355_v32 = vld [vmem:[%s1495_s26 + $0x200] sm:$0xff]  ;;  %352 = vst [vmem:[%s1500_s27 + $0xf0] sm:$0xff] %v351_v30  ;;  %354 = vst [vmem:[%s1500_s27 + $0xf8] sm:$0xff] %v353_v31  ;;  %v357_v33 = vld [vmem:[%s1495_s26 + $0x210] sm:$0xff] }
  0x25   : > { %356 = vst [vmem:[%s1500_s27 + $0x100] sm:$0xff] %v355_v32  ;;  %v359_v34 = vld [vmem:[%s1495_s26 + $0x220] sm:$0xff]  ;;  %v361_v35 = vld [vmem:[%s1495_s26 + $0x230] sm:$0xff]  ;;  %358 = vst [vmem:[%s1500_s27 + $0x108] sm:$0xff] %v357_v33 }
  0x26   : > { %360 = vst [vmem:[%s1500_s27 + $0x110] sm:$0xff] %v359_v34  ;;  %362 = vst [vmem:[%s1500_s27 + $0x118] sm:$0xff] %v361_v35  ;;  %v363_v36 = vld [vmem:[%s1495_s26 + $0x240] sm:$0xff]  ;;  %v365_v37 = vld [vmem:[%s1495_s26 + $0x250] sm:$0xff] }
  0x27   : > { %v367_v38 = vld [vmem:[%s1495_s26 + $0x260] sm:$0xff]  ;;  %364 = vst [vmem:[%s1500_s27 + $0x120] sm:$0xff] %v363_v36  ;;  %366 = vst [vmem:[%s1500_s27 + $0x128] sm:$0xff] %v365_v37  ;;  %v369_v39 = vld [vmem:[%s1495_s26 + $0x270] sm:$0xff] }
  0x28   : > { %368 = vst [vmem:[%s1500_s27 + $0x130] sm:$0xff] %v367_v38  ;;  %v371_v40 = vld [vmem:[%s1495_s26 + $0x280] sm:$0xff]  ;;  %v373_v41 = vld [vmem:[%s1495_s26 + $0x290] sm:$0xff]  ;;  %370 = vst [vmem:[%s1500_s27 + $0x138] sm:$0xff] %v369_v39 }
  0x29   : > { %372 = vst [vmem:[%s1500_s27 + $0x140] sm:$0xff] %v371_v40  ;;  %374 = vst [vmem:[%s1500_s27 + $0x148] sm:$0xff] %v373_v41  ;;  %v375_v42 = vld [vmem:[%s1495_s26 + $0x2a0] sm:$0xff]  ;;  %v377_v43 = vld [vmem:[%s1495_s26 + $0x2b0] sm:$0xff] }
  0x2a   : > { %v379_v44 = vld [vmem:[%s1495_s26 + $0x2c0] sm:$0xff]  ;;  %376 = vst [vmem:[%s1500_s27 + $0x150] sm:$0xff] %v375_v42  ;;  %378 = vst [vmem:[%s1500_s27 + $0x158] sm:$0xff] %v377_v43  ;;  %v381_v45 = vld [vmem:[%s1495_s26 + $0x2d0] sm:$0xff] }
  0x2b   : > { %380 = vst [vmem:[%s1500_s27 + $0x160] sm:$0xff] %v379_v44  ;;  %v383_v46 = vld [vmem:[%s1495_s26 + $0x2e0] sm:$0xff]  ;;  %v385_v47 = vld [vmem:[%s1495_s26 + $0x2f0] sm:$0xff]  ;;  %382 = vst [vmem:[%s1500_s27 + $0x168] sm:$0xff] %v381_v45 }
  0x2c   : > { %384 = vst [vmem:[%s1500_s27 + $0x170] sm:$0xff] %v383_v46  ;;  %386 = vst [vmem:[%s1500_s27 + $0x178] sm:$0xff] %v385_v47  ;;  %v387_v48 = vld [vmem:[%s1495_s26 + $0x300] sm:$0xff]  ;;  %v389_v49 = vld [vmem:[%s1495_s26 + $0x310] sm:$0xff] }
  0x2d   : > { %v391_v50 = vld [vmem:[%s1495_s26 + $0x320] sm:$0xff]  ;;  %388 = vst [vmem:[%s1500_s27 + $0x180] sm:$0xff] %v387_v48  ;;  %390 = vst [vmem:[%s1500_s27 + $0x188] sm:$0xff] %v389_v49  ;;  %v393_v51 = vld [vmem:[%s1495_s26 + $0x330] sm:$0xff] }
  0x2e   : > { %392 = vst [vmem:[%s1500_s27 + $0x190] sm:$0xff] %v391_v50  ;;  %v395_v52 = vld [vmem:[%s1495_s26 + $0x340] sm:$0xff]  ;;  %v397_v53 = vld [vmem:[%s1495_s26 + $0x350] sm:$0xff]  ;;  %394 = vst [vmem:[%s1500_s27 + $0x198] sm:$0xff] %v393_v51 }
  0x2f   : > { %396 = vst [vmem:[%s1500_s27 + $0x1a0] sm:$0xff] %v395_v52  ;;  %398 = vst [vmem:[%s1500_s27 + $0x1a8] sm:$0xff] %v397_v53  ;;  %v399_v54 = vld [vmem:[%s1495_s26 + $0x360] sm:$0xff]  ;;  %v401_v55 = vld [vmem:[%s1495_s26 + $0x370] sm:$0xff] }
  0x30   : > { %v403_v56 = vld [vmem:[%s1495_s26 + $0x380] sm:$0xff]  ;;  %400 = vst [vmem:[%s1500_s27 + $0x1b0] sm:$0xff] %v399_v54  ;;  %402 = vst [vmem:[%s1500_s27 + $0x1b8] sm:$0xff] %v401_v55  ;;  %v405_v57 = vld [vmem:[%s1495_s26 + $0x390] sm:$0xff] }
  0x31   : > { %404 = vst [vmem:[%s1500_s27 + $0x1c0] sm:$0xff] %v403_v56  ;;  %v407_v58 = vld [vmem:[%s1495_s26 + $0x3a0] sm:$0xff]  ;;  %v409_v59 = vld [vmem:[%s1495_s26 + $0x3b0] sm:$0xff]  ;;  %406 = vst [vmem:[%s1500_s27 + $0x1c8] sm:$0xff] %v405_v57 }
  0x32   : > { %408 = vst [vmem:[%s1500_s27 + $0x1d0] sm:$0xff] %v407_v58  ;;  %410 = vst [vmem:[%s1500_s27 + $0x1d8] sm:$0xff] %v409_v59  ;;  %v411_v60 = vld [vmem:[%s1495_s26 + $0x3c0] sm:$0xff]  ;;  %v413_v61 = vld [vmem:[%s1495_s26 + $0x3d0] sm:$0xff] }
  0x33   : > { %v415_v62 = vld [vmem:[%s1495_s26 + $0x3e0] sm:$0xff]  ;;  %412 = vst [vmem:[%s1500_s27 + $0x1e0] sm:$0xff] %v411_v60  ;;  %414 = vst [vmem:[%s1500_s27 + $0x1e8] sm:$0xff] %v413_v61  ;;  %v417_v63 = vld [vmem:[%s1495_s26 + $0x3f0] sm:$0xff] }
  0x34   : > { %416 = vst [vmem:[%s1500_s27 + $0x1f0] sm:$0xff] %v415_v62  ;;  %418 = vst [vmem:[%s1500_s27 + $0x1f8] sm:$0xff] %v417_v63 }
  0x35 PF: > { %p1169_p7 = scmp.ge.s32.totalorder %s1432_s14, 1  ;;  %p423_p8 = scmp.lt.s32.totalorder %s1432_s14, 3 }
  0x37   : > { %p424_p9 = pnand %p1169_p7, %p423_p8 }
  0x38   : > { %s430_s28 = sand.u32 (!%p424_p9), 1, %s1424_s12   ;;  %v1400_v0 = vld [vmem:[%s1763_s0 + $0x4] ss:$16 sps:$4 sm:$0xff] (!%p424_p9)   ;;  %v1434_v1 = vmov (!%p424_p9), 0   ;;  %v1403_v2 = vld [vmem:[%s1763_s0 + $0xc] ss:$16 sps:$4 sm:$0xff] (!%p424_p9)  }
  0x39   : > { %427 = sbr.rel (%p424_p9) target bundleno = 364 (0x16c), region = 66  ;;  %s1170_s29 = sshll.u32 (!%p424_p9), %s430_s28, 9  ;;  %1300 = vset.pattern.permute.xlu0 (!%p424_p9), %v1434_v1  ;;  %1301 = vset.pattern.permute.xlu1 (!%p424_p9), %v1434_v1  ;;  %v526_v53 = vld [vmem:[%s1765_s2] sm:$0xff] (!%p424_p9)  ;;  %v528_v54 = vld [vmem:[%s1765_s2 + $0x10] sm:$0xff] (!%p424_p9)  ;;  %v527_v55 = vld [vmem:[%s1765_s2 + $0x8] sm:$0xff] (!%p424_p9) }
  0x3a   : > { %s1638_s7 = scalar_lea.vmem (!%p424_p9), [#allocation2], %s1170_s29  ;;  %942 = vmatprep.mubr.bf16.mxu1 (!%p424_p9), %v1400_v0  ;;  %995 = vmatprep.mubr.bf16.mxu0 (!%p424_p9), %v1403_v2  ;;  %v529_v56 = vld [vmem:[%s1765_s2 + $0x18] sm:$0xff] (!%p424_p9)  ;;  %s1171_s9 = sshll.u32 (!%p424_p9), %s430_s28, 5 }
  0x3b   : > { %v1302_v3 = vld [vmem:[%s1638_s7 + $0x4] ss:$8 sps:$4 sm:$0xff] (!%p424_p9)   ;;  %v1306_v5 = vld [vmem:[%s1638_s7] ss:$8 sps:$4 sm:$0xff] (!%p424_p9)   ;;  %v1308_v7 = vld [vmem:[%s1638_s7 + $0x14] ss:$8 sps:$4 sm:$0xff] (!%p424_p9)   ;;  %532 = vperm.xlu0 (!%p424_p9), %1300, %v526_v53   ;;  %542 = vperm.xlu1 (!%p424_p9), %1301, %v528_v54  }
  0x3c   : > { %v1304_v4 = vld [vmem:[%s1638_s7 + $0x104] ss:$8 sps:$4 sm:$0xff] (!%p424_p9)   ;;  %910 = vmatprep.subr.bf16.mxu1 (!%p424_p9), %v1302_v3  ;;  %v1307_v6 = vld [vmem:[%s1638_s7 + $0x100] ss:$8 sps:$4 sm:$0xff] (!%p424_p9)   ;;  %v1310_v8 = vld [vmem:[%s1638_s7 + $0x114] ss:$8 sps:$4 sm:$0xff] (!%p424_p9)  }
  0x3d   : > { %963 = vmatprep.subr.bf16.mxu0 (!%p424_p9), %v1304_v4  ;;  %911 = vmatpush1.bf16.msra.mxu1 (!%p424_p9), %v1306_v5  ;;  %v1312_v9 = vld [vmem:[%s1638_s7 + $0x10] ss:$8 sps:$4 sm:$0xff] (!%p424_p9)   ;;  %v1314_v11 = vld [vmem:[%s1638_s7 + $0x24] ss:$8 sps:$4 sm:$0xff] (!%p424_p9)   ;;  %v1318_v13 = vld [vmem:[%s1638_s7 + $0x20] ss:$8 sps:$4 sm:$0xff] (!%p424_p9)  }
  0x3e   : > { %964 = vmatpush1.bf16.msra.mxu0 (!%p424_p9), %v1307_v6  ;;  %912 = vmatprep.subr.bf16.mxu1 (!%p424_p9), %v1308_v7  ;;  %v1313_v10 = vld [vmem:[%s1638_s7 + $0x110] ss:$8 sps:$4 sm:$0xff] (!%p424_p9)   ;;  %v1316_v12 = vld [vmem:[%s1638_s7 + $0x124] ss:$8 sps:$4 sm:$0xff] (!%p424_p9)   ;;  %v1319_v14 = vld [vmem:[%s1638_s7 + $0x120] ss:$8 sps:$4 sm:$0xff] (!%p424_p9)  }
  0x3f   : > { %965 = vmatprep.subr.bf16.mxu0 (!%p424_p9), %v1310_v8  ;;  %v1320_v15 = vld [vmem:[%s1638_s7 + $0x34] ss:$8 sps:$4 sm:$0xff] (!%p424_p9)   ;;  %v1324_v17 = vld [vmem:[%s1638_s7 + $0x30] ss:$8 sps:$4 sm:$0xff] (!%p424_p9)   ;;  %v1326_v19 = vld [vmem:[%s1638_s7 + $0x44] ss:$8 sps:$4 sm:$0xff] (!%p424_p9)   ;;  %537 = vperm.xlu0 (!%p424_p9), %1300, %v527_v55  }
  0x40   : > { %v1322_v16 = vld [vmem:[%s1638_s7 + $0x134] ss:$8 sps:$4 sm:$0xff]   ;;  %v1325_v18 = vld [vmem:[%s1638_s7 + $0x130] ss:$8 sps:$4 sm:$0xff]   ;;  %v1328_v20 = vld [vmem:[%s1638_s7 + $0x144] ss:$8 sps:$4 sm:$0xff]   ;;  %547 = vperm.xlu1 %1301, %v529_v56  }
  0x41   : > { %913 = vmatpush1.bf16.msra.mxu1 %v1312_v9  ;;  %v1330_v21 = vld [vmem:[%s1638_s7 + $0x40] ss:$8 sps:$4 sm:$0xff]   ;;  %v1332_v23 = vld [vmem:[%s1638_s7 + $0x54] ss:$8 sps:$4 sm:$0xff]   ;;  %v1336_v25 = vld [vmem:[%s1638_s7 + $0x50] ss:$8 sps:$4 sm:$0xff]  }
  0x42   : > { %966 = vmatpush1.bf16.msra.mxu0 %v1313_v10  ;;  %914 = vmatprep.subr.bf16.mxu1 %v1314_v11  ;;  %v1331_v22 = vld [vmem:[%s1638_s7 + $0x140] ss:$8 sps:$4 sm:$0xff]   ;;  %v1334_v24 = vld [vmem:[%s1638_s7 + $0x154] ss:$8 sps:$4 sm:$0xff]   ;;  %v1337_v26 = vld [vmem:[%s1638_s7 + $0x150] ss:$8 sps:$4 sm:$0xff]  }
  0x43   : > { %967 = vmatprep.subr.bf16.mxu0 %v1316_v12  ;;  %v1338_v27 = vld [vmem:[%s1638_s7 + $0x64] ss:$8 sps:$4 sm:$0xff]   ;;  %v1342_v29 = vld [vmem:[%s1638_s7 + $0x60] ss:$8 sps:$4 sm:$0xff]   ;;  %v1344_v31 = vld [vmem:[%s1638_s7 + $0x74] ss:$8 sps:$4 sm:$0xff]  }
  0x44   : > { %v1340_v28 = vld [vmem:[%s1638_s7 + $0x164] ss:$8 sps:$4 sm:$0xff]   ;;  %v1343_v30 = vld [vmem:[%s1638_s7 + $0x160] ss:$8 sps:$4 sm:$0xff]   ;;  %v1346_v32 = vld [vmem:[%s1638_s7 + $0x174] ss:$8 sps:$4 sm:$0xff]  }
  0x45   : > { %915 = vmatpush1.bf16.msra.mxu1 %v1318_v13  ;;  %v1348_v33 = vld [vmem:[%s1638_s7 + $0x70] ss:$8 sps:$4 sm:$0xff]   ;;  %v1350_v35 = vld [vmem:[%s1638_s7 + $0x84] ss:$8 sps:$4 sm:$0xff]   ;;  %v1354_v37 = vld [vmem:[%s1638_s7 + $0x80] ss:$8 sps:$4 sm:$0xff]  }
  0x46   : > { %968 = vmatpush1.bf16.msra.mxu0 %v1319_v14  ;;  %916 = vmatprep.subr.bf16.mxu1 %v1320_v15  ;;  %v1349_v34 = vld [vmem:[%s1638_s7 + $0x170] ss:$8 sps:$4 sm:$0xff]   ;;  %v1352_v36 = vld [vmem:[%s1638_s7 + $0x184] ss:$8 sps:$4 sm:$0xff]   ;;  %v1355_v38 = vld [vmem:[%s1638_s7 + $0x180] ss:$8 sps:$4 sm:$0xff]  }
  0x47   : > { %969 = vmatprep.subr.bf16.mxu0 %v1322_v16  ;;  %v1356_v39 = vld [vmem:[%s1638_s7 + $0x94] ss:$8 sps:$4 sm:$0xff]   ;;  %v1360_v41 = vld [vmem:[%s1638_s7 + $0x90] ss:$8 sps:$4 sm:$0xff]   ;;  %v1362_v43 = vld [vmem:[%s1638_s7 + $0xa4] ss:$8 sps:$4 sm:$0xff]  }
  0x48   : > { %v1358_v40 = vld [vmem:[%s1638_s7 + $0x194] ss:$8 sps:$4 sm:$0xff]   ;;  %v1361_v42 = vld [vmem:[%s1638_s7 + $0x190] ss:$8 sps:$4 sm:$0xff]   ;;  %v1364_v44 = vld [vmem:[%s1638_s7 + $0x1a4] ss:$8 sps:$4 sm:$0xff]  }
  0x49   : > { %917 = vmatpush1.bf16.msra.mxu1 %v1324_v17  ;;  %v1366_v45 = vld [vmem:[%s1638_s7 + $0xa0] ss:$8 sps:$4 sm:$0xff]   ;;  %v1368_v47 = vld [vmem:[%s1638_s7 + $0xb4] ss:$8 sps:$4 sm:$0xff]   ;;  %v1372_v49 = vld [vmem:[%s1638_s7 + $0xb0] ss:$8 sps:$4 sm:$0xff]  }
  0x4a   : > { %970 = vmatpush1.bf16.msra.mxu0 %v1325_v18  ;;  %918 = vmatprep.subr.bf16.mxu1 %v1326_v19  ;;  %v1367_v46 = vld [vmem:[%s1638_s7 + $0x1a0] ss:$8 sps:$4 sm:$0xff]   ;;  %v1370_v48 = vld [vmem:[%s1638_s7 + $0x1b4] ss:$8 sps:$4 sm:$0xff]   ;;  %v1373_v50 = vld [vmem:[%s1638_s7 + $0x1b0] ss:$8 sps:$4 sm:$0xff]  }
  0x4b   : > { %971 = vmatprep.subr.bf16.mxu0 %v1328_v20  ;;  %v1374_v51 = vld [vmem:[%s1638_s7 + $0xc4] ss:$8 sps:$4 sm:$0xff]   ;;  %v1378_v57 = vld [vmem:[%s1638_s7 + $0xc0] ss:$8 sps:$4 sm:$0xff]   ;;  %v1380_v59 = vld [vmem:[%s1638_s7 + $0xd4] ss:$8 sps:$4 sm:$0xff]  }
  0x4c   : > { %v1376_v52 = vld [vmem:[%s1638_s7 + $0x1c4] ss:$8 sps:$4 sm:$0xff]   ;;  %v1379_v58 = vld [vmem:[%s1638_s7 + $0x1c0] ss:$8 sps:$4 sm:$0xff]   ;;  %v1382_v60 = vld [vmem:[%s1638_s7 + $0x1d4] ss:$8 sps:$4 sm:$0xff]  }
  0x4d   : > { %919 = vmatpush1.bf16.msra.mxu1 %v1330_v21  ;;  %v1384_v61 = vld [vmem:[%s1638_s7 + $0xd0] ss:$8 sps:$4 sm:$0xff]   ;;  %v1386_v63 = vld [vmem:[%s1638_s7 + $0xe4] ss:$8 sps:$4 sm:$0xff]   ;;  %v1390_v1 = vld [vmem:[%s1638_s7 + $0xe0] ss:$8 sps:$4 sm:$0xff]  }
  0x4e   : > { %972 = vmatpush1.bf16.msra.mxu0 %v1331_v22  ;;  %920 = vmatprep.subr.bf16.mxu1 %v1332_v23  ;;  %v1385_v62 = vld [vmem:[%s1638_s7 + $0x1d0] ss:$8 sps:$4 sm:$0xff]   ;;  %v1388_v0 = vld [vmem:[%s1638_s7 + $0x1e4] ss:$8 sps:$4 sm:$0xff]   ;;  %v1391_v2 = vld [vmem:[%s1638_s7 + $0x1e0] ss:$8 sps:$4 sm:$0xff]  }
  0x4f   : > { %973 = vmatprep.subr.bf16.mxu0 %v1334_v24  ;;  %v1392_v3 = vld [vmem:[%s1638_s7 + $0xf4] ss:$8 sps:$4 sm:$0xff]   ;;  %v1396_v5 = vld [vmem:[%s1638_s7 + $0xf0] ss:$8 sps:$4 sm:$0xff]   ;;  %s1736_s10 = scalar_lea.vmem [#allocation3], %s1171_s9  ;;  %s1258_s12 = sshll.u32 (%p1485_p5), %s1162_s15, 3 }
  0x50   : > { %v1394_v4 = vld [vmem:[%s1638_s7 + $0x1f4] ss:$8 sps:$4 sm:$0xff]   ;;  %v1397_v6 = vld [vmem:[%s1638_s7 + $0x1f0] ss:$8 sps:$4 sm:$0xff]   ;;  %s1061_s17 = scalar_lea.vmem (%p1485_p5), %s1766_s3, %s1258_s12 }
  0x51   : > { %921 = vmatpush1.bf16.msra.mxu1 %v1336_v25  ;;  %v1398_v7 = vld [vmem:[%s1763_s0] ss:$16 sps:$4 sm:$0xff]   ;;  %v1401_v8 = vld [vmem:[%s1763_s0 + $0x8] ss:$16 sps:$4 sm:$0xff]   ;;  %v1404_v9 = vld [vmem:[%s1763_s0 + $0x24] ss:$16 sps:$4 sm:$0xff]  }
  0x52   : > { %974 = vmatpush1.bf16.msra.mxu0 %v1337_v26  ;;  %922 = vmatprep.subr.bf16.mxu1 %v1338_v27  ;;  %v1406_v10 = vld [vmem:[%s1763_s0 + $0x2c] ss:$16 sps:$4 sm:$0xff]   ;;  %v1408_v11 = vld [vmem:[%s1763_s0 + $0x20] ss:$16 sps:$4 sm:$0xff]   ;;  %v1409_v12 = vld [vmem:[%s1763_s0 + $0x28] ss:$16 sps:$4 sm:$0xff]  }
  0x53   : > { %975 = vmatprep.subr.bf16.mxu0 %v1340_v28 }
  0x55   : > { %923 = vmatpush1.bf16.msra.mxu1 %v1342_v29 }
  0x56   : > { %976 = vmatpush1.bf16.msra.mxu0 %v1343_v30  ;;  %924 = vmatprep.subr.bf16.mxu1 %v1344_v31 }
  0x57   : > { %977 = vmatprep.subr.bf16.mxu0 %v1346_v32 }
  0x59   : > { %925 = vmatpush1.bf16.msra.mxu1 %v1348_v33 }
  0x5a   : > { %978 = vmatpush1.bf16.msra.mxu0 %v1349_v34  ;;  %926 = vmatprep.subr.bf16.mxu1 %v1350_v35 }
  0x5b   : > { %979 = vmatprep.subr.bf16.mxu0 %v1352_v36 }
  0x5d   : > { %927 = vmatpush1.bf16.msra.mxu1 %v1354_v37 }
  0x5e   : > { %980 = vmatpush1.bf16.msra.mxu0 %v1355_v38  ;;  %928 = vmatprep.subr.bf16.mxu1 %v1356_v39 }
  0x5f   : > { %981 = vmatprep.subr.bf16.mxu0 %v1358_v40 }
  0x61   : > { %929 = vmatpush1.bf16.msra.mxu1 %v1360_v41 }
  0x62   : > { %982 = vmatpush1.bf16.msra.mxu0 %v1361_v42  ;;  %930 = vmatprep.subr.bf16.mxu1 %v1362_v43 }
  0x63   : > { %983 = vmatprep.subr.bf16.mxu0 %v1364_v44 }
  0x65   : > { %931 = vmatpush1.bf16.msra.mxu1 %v1366_v45 }
  0x66   : > { %984 = vmatpush1.bf16.msra.mxu0 %v1367_v46  ;;  %932 = vmatprep.subr.bf16.mxu1 %v1368_v47 }
  0x67   : > { %985 = vmatprep.subr.bf16.mxu0 %v1370_v48 }
  0x69   : > { %933 = vmatpush1.bf16.msra.mxu1 %v1372_v49 }
  0x6a   : > { %986 = vmatpush1.bf16.msra.mxu0 %v1373_v50  ;;  %934 = vmatprep.subr.bf16.mxu1 %v1374_v51 }
  0x6b   : > { %987 = vmatprep.subr.bf16.mxu0 %v1376_v52 }
  0x6d   : > { %935 = vmatpush1.bf16.msra.mxu1 %v1378_v57 }
  0x6e   : > { %988 = vmatpush1.bf16.msra.mxu0 %v1379_v58  ;;  %936 = vmatprep.subr.bf16.mxu1 %v1380_v59 }
  0x6f   : > { %989 = vmatprep.subr.bf16.mxu0 %v1382_v60 }
  0x71   : > { %937 = vmatpush1.bf16.msra.mxu1 %v1384_v61 }
  0x72   : > { %990 = vmatpush1.bf16.msra.mxu0 %v1385_v62  ;;  %938 = vmatprep.subr.bf16.mxu1 %v1386_v63 }
  0x73   : > { %991 = vmatprep.subr.bf16.mxu0 %v1388_v0 }
  0x75   : > { %939 = vmatpush1.bf16.msra.mxu1 %v1390_v1 }
  0x76   : > { %992 = vmatpush1.bf16.msra.mxu0 %v1391_v2  ;;  %940 = vmatprep.subr.bf16.mxu1 %v1392_v3 }
  0x77   : > { %993 = vmatprep.subr.bf16.mxu0 %v1394_v4 }
  0x79   : > { %941 = vmatpush1.bf16.msra.mxu1 %v1396_v5 }
  0x7a   : > { %994 = vmatpush1.bf16.msra.mxu0 %v1397_v6 }
  0x7c   : > { %943 = vmatmul.mubr.bf16.vlgmr.msra.gmra.mrb[0].mxu1 %v1398_v7 }
  0x7d   : > { %996 = vmatmul.mubr.bf16.vlgmr.msra.gmra.mrb[0].mxu0 %v1401_v8  ;;  %952 = vmatprep.mubr.bf16.mxu1 %v1404_v9 }
  0x7e   : > { %1005 = vmatprep.mubr.bf16.mxu0 %v1406_v10 }
  0x84   : > { %953 = vmatmul.mubr.bf16.gmra.mrb[4].mxu1 %v1408_v11 }
  0x85   : > { %1006 = vmatmul.mubr.bf16.gmra.mrb[4].mxu0 %v1409_v12 }
  0xba   : > { %v533_v13 = vpop.permute.xlu0 %532  ;;  %v543_v15 = vpop.permute.xlu1 %542 }
  0xbe   : > { %v538_v14 = vpop.permute.xlu0 %537 }
  0xbf   : > { %v548_v35 = vpop.permute.xlu1 %547 }
 0x14f   : > { %v944_v16 = vpop.f32.mrb[0].mxu1 }
 0x150   : > { %v997_v17 = vpop.f32.mrb[0].mxu0  ;;  %v945_v18 = vadd.f32 %v944_v16, %v533_v13  ;;  %v946_v19 = vpop.f32.mrb[1].mxu1 }
 0x151   : > { %v999_v20 = vpop.f32.mrb[1].mxu0  ;;  %v947_v21 = vadd.f32 %v946_v19, %v533_v13  ;;  %v948_v22 = vpop.f32.mrb[2].mxu1 }
 0x152   : > { %v1001_v23 = vpop.f32.mrb[2].mxu0  ;;  %v998_v24 = vadd.f32 %v997_v17, %v945_v18  ;;  %v949_v25 = vadd.f32 %v948_v22, %v538_v14  ;;  %v950_v26 = vpop.f32.mrb[3].mxu1 }
 0x153   : > { %v1003_v27 = vpop.f32.mrb[3].mxu0  ;;  %v1000_v28 = vadd.f32 %v999_v20, %v947_v21  ;;  %v951_v29 = vadd.f32 %v950_v26, %v538_v14 }
 0x154   : > { %v1016_v30 = vmax.f32 %v998_v24, 0.0  ;;  %v1002_v31 = vadd.f32 %v1001_v23, %v949_v25 }
 0x155   : > { %v1017_v32 = vmax.f32 %v1000_v28, 0.0  ;;  %v1004_v33 = vadd.f32 %v1003_v27, %v951_v29 }
 0x156   : > { %v1018_v34 = vmax.f32 %v1002_v31, 0.0 }
 0x157   : > { %v1254_v36 = vpack.c.bf16 %v1017_v32, %v1016_v30  ;;  %v1019_v37 = vmax.f32 %v1004_v33, 0.0  ;;  %v954_v38 = vpop.f32.mrb[4].mxu1 }
 0x158   : > { %v1007_v39 = vpop.f32.mrb[4].mxu0  ;;  %v955_v40 = vadd.f32 %v954_v38, %v543_v15  ;;  %v956_v41 = vpop.f32.mrb[5].mxu1 }
 0x159   : > { %v1009_v42 = vpop.f32.mrb[5].mxu0  ;;  %1048 = vst [vmem:[%s1736_s10] sm:$0xff] %v1254_v36  ;;  %v1255_v43 = vpack.c.bf16 %v1019_v37, %v1018_v34  ;;  %v957_v44 = vadd.f32 %v956_v41, %v543_v15  ;;  %v958_v45 = vpop.f32.mrb[6].mxu1 }
 0x15a   : > { %v1011_v46 = vpop.f32.mrb[6].mxu0  ;;  %v1008_v47 = vadd.f32 %v1007_v39, %v955_v40  ;;  %v959_v48 = vadd.f32 %v958_v45, %v548_v35  ;;  %v960_v49 = vpop.f32.mrb[7].mxu1 }
 0x15b   : > { %v1013_v50 = vpop.f32.mrb[7].mxu0  ;;  %1049 = vst [vmem:[%s1736_s10 + $0x8] sm:$0xff] %v1255_v43  ;;  %v1010_v51 = vadd.f32 %v1009_v42, %v957_v44  ;;  %v961_v52 = vadd.f32 %v960_v49, %v548_v35 }
 0x15c   : > { %v1020_v53 = vmax.f32 %v1008_v47, 0.0  ;;  %v1012_v54 = vadd.f32 %v1011_v46, %v959_v48 }
 0x15d   : > { %v1021_v55 = vmax.f32 %v1010_v51, 0.0  ;;  %v1014_v56 = vadd.f32 %v1013_v50, %v961_v52  ;;  %1058 = sbr.rel (!%p1485_p5) target bundleno = 364 (0x16c), region = 74 }
 0x15e   : > { %v1022_v57 = vmax.f32 %v1012_v54, 0.0 }
 0x15f   : > { %v1256_v58 = vpack.c.bf16 %v1021_v55, %v1020_v53  ;;  %v1023_v59 = vmax.f32 %v1014_v56, 0.0 }
 0x160   : > { %v1095_v61 = vld [vmem:[%s1736_s10] sm:$0xff] (%p1485_p5) }
 0x161   : > { %1050 = vst [vmem:[%s1736_s10 + $0x10] sm:$0xff] %v1256_v58  ;;  %v1257_v60 = vpack.c.bf16 %v1023_v59, %v1022_v57  ;;  %1096 = vst [vmem:[%s1061_s17] sm:$0xff] (%p1485_p5), %v1095_v61 }
 0x162   : > { %v1097_v62 = vld [vmem:[%s1736_s10 + $0x8] sm:$0xff] (%p1485_p5) }
 0x163   : > { %1051 = vst [vmem:[%s1736_s10 + $0x18] sm:$0xff] %v1257_v60  ;;  %1098 = vst [vmem:[%s1061_s17 + $0x10] sm:$0xff] (%p1485_p5), %v1097_v62 }
 0x168   : > { %v1099_v63 = vld [vmem:[%s1736_s10 + $0x10] sm:$0xff] }
 0x169   : > { %1100 = vst [vmem:[%s1061_s17 + $0x20] sm:$0xff] %v1099_v63 }
 0x16a   : > { %v1101_v0 = vld [vmem:[%s1736_s10 + $0x18] sm:$0xff] }
 0x16b   : > { %1102 = vst [vmem:[%s1061_s17 + $0x30] sm:$0xff] %v1101_v0 }
 0x16c PF: > { %p10_p10 = scmp.ge.s32.totalorder %s1472_s16, 4   ;;  %s1768_s12 = smov %s1428_s13 }
 0x16d   : > { %s1769_s13 = smov %s1483_s19  ;;  %s1770_s14 = smov %s1472_s16 }
 0x16e   :  { %12 = sbr.rel (!%p10_p10) target bundleno = 2 (0x2), region = 143 }

// kernel: vae_forward.11
= control target key start
LH: loop header
LB: loop body
LE: loop exit
PB: predicated region body
PF: predicated region fallthrough
CT: control target
= control target key end

     0   :  { %v823_v1 = vmov 0   ;;  %s1024_s1 = inlined_call_operand.vmem [shape: bf16[512,128], index: 1, kind: input, shape index: {}]   ;;  %s1025_s0 = inlined_call_operand.vmem [shape: bf16[64,512], index: 0, kind: input, shape index: {}]   ;;  %s1026_s2 = inlined_call_operand.vmem [shape: f32[64,1], index: 2, kind: input, shape index: {}]   ;;  %s1027_s3 = inlined_call_operand.vmem [shape: bf16[64,128], index: 3, kind: output, shape index: {}]  }
   0x1   :  { %v767_v0 = vld [vmem:[%s1024_s1 + $0x40] sm:$0xff]   ;;  %765 = vset.pattern.permute.xlu0 %v823_v1  ;;  %766 = vset.pattern.permute.xlu1 %v823_v1  ;;  %v771_v5 = vld [vmem:[%s1024_s1 + $0x48] sm:$0xff]   ;;  %v775_v9 = vld [vmem:[%s1024_s1 + $0x50] sm:$0xff]  }
   0x2   :  { %v768_v2 = vld [vmem:[%s1024_s1 + $0xc0] sm:$0xff]   ;;  %684 = vmatprep.subr.bf16.mxu0 %v767_v0  ;;  %v772_v6 = vld [vmem:[%s1024_s1 + $0xc8] sm:$0xff]   ;;  %v776_v10 = vld [vmem:[%s1024_s1 + $0xd0] sm:$0xff]  }
   0x3   :  { %v769_v3 = vld [vmem:[%s1024_s1] sm:$0xff]   ;;  %724 = vmatprep.subr.bf16.mxu1 %v768_v2  ;;  %v773_v7 = vld [vmem:[%s1024_s1 + $0x8] sm:$0xff]   ;;  %v777_v11 = vld [vmem:[%s1024_s1 + $0x10] sm:$0xff]  }
   0x4   :  { %v770_v4 = vld [vmem:[%s1024_s1 + $0x80] sm:$0xff]   ;;  %685 = vmatpush3.bf16.msra.mxu0 %v769_v3  ;;  %v774_v8 = vld [vmem:[%s1024_s1 + $0x88] sm:$0xff]   ;;  %v778_v12 = vld [vmem:[%s1024_s1 + $0x90] sm:$0xff]  }
   0x5   :  { %725 = vmatpush3.bf16.msra.mxu1 %v770_v4  ;;  %686 = vmatprep.subr.bf16.mxu0 %v771_v5  ;;  %v779_v13 = vld [vmem:[%s1024_s1 + $0x58] sm:$0xff]   ;;  %v783_v17 = vld [vmem:[%s1024_s1 + $0x60] sm:$0xff]   ;;  %v787_v21 = vld [vmem:[%s1024_s1 + $0x68] sm:$0xff]  }
   0x6   :  { %726 = vmatprep.subr.bf16.mxu1 %v772_v6  ;;  %v780_v14 = vld [vmem:[%s1024_s1 + $0xd8] sm:$0xff]   ;;  %v784_v18 = vld [vmem:[%s1024_s1 + $0xe0] sm:$0xff]   ;;  %v788_v22 = vld [vmem:[%s1024_s1 + $0xe8] sm:$0xff]  }
   0x7   :  { %v781_v15 = vld [vmem:[%s1024_s1 + $0x18] sm:$0xff]   ;;  %v785_v19 = vld [vmem:[%s1024_s1 + $0x20] sm:$0xff]   ;;  %v789_v23 = vld [vmem:[%s1024_s1 + $0x28] sm:$0xff]  }
   0x8   :  { %687 = vmatpush3.bf16.msra.mxu0 %v773_v7  ;;  %v782_v16 = vld [vmem:[%s1024_s1 + $0x98] sm:$0xff]   ;;  %v786_v20 = vld [vmem:[%s1024_s1 + $0xa0] sm:$0xff]   ;;  %v790_v24 = vld [vmem:[%s1024_s1 + $0xa8] sm:$0xff]  }
   0x9   :  { %727 = vmatpush3.bf16.msra.mxu1 %v774_v8  ;;  %688 = vmatprep.subr.bf16.mxu0 %v775_v9  ;;  %v791_v25 = vld [vmem:[%s1024_s1 + $0x70] sm:$0xff]   ;;  %v795_v29 = vld [vmem:[%s1024_s1 + $0x78] sm:$0xff]   ;;  %v95_v43 = vld [vmem:[%s1026_s2] sm:$0xff] }
   0xa   :  { %728 = vmatprep.subr.bf16.mxu1 %v776_v10  ;;  %v792_v26 = vld [vmem:[%s1024_s1 + $0xf0] sm:$0xff]   ;;  %v796_v30 = vld [vmem:[%s1024_s1 + $0xf8] sm:$0xff]   ;;  %105 = vperm.xlu0 %765, %v95_v43   ;;  %v96_v45 = vld [vmem:[%s1026_s2 + $0x8] sm:$0xff] }
   0xb   :  { %v793_v27 = vld [vmem:[%s1024_s1 + $0x30] sm:$0xff]   ;;  %v797_v31 = vld [vmem:[%s1024_s1 + $0x38] sm:$0xff]   ;;  %v99_v48 = vld [vmem:[%s1026_s2 + $0x20] sm:$0xff] }
   0xc   :  { %689 = vmatpush3.bf16.msra.mxu0 %v777_v11  ;;  %v794_v28 = vld [vmem:[%s1024_s1 + $0xb0] sm:$0xff]   ;;  %v798_v32 = vld [vmem:[%s1024_s1 + $0xb8] sm:$0xff]   ;;  %v100_v51 = vld [vmem:[%s1026_s2 + $0x28] sm:$0xff] }
   0xd   :  { %729 = vmatpush3.bf16.msra.mxu1 %v778_v12  ;;  %690 = vmatprep.subr.bf16.mxu0 %v779_v13  ;;  %v799_v33 = vld [vmem:[%s1025_s0] ss:$16 sps:$4 sm:$0xff]   ;;  %v801_v34 = vld [vmem:[%s1025_s0 + $0x4] ss:$16 sps:$4 sm:$0xff]   ;;  %v802_v35 = vld [vmem:[%s1025_s0 + $0x8] ss:$16 sps:$4 sm:$0xff]  }
   0xe   :  { %730 = vmatprep.subr.bf16.mxu1 %v780_v14  ;;  %v804_v36 = vld [vmem:[%s1025_s0 + $0xc] ss:$16 sps:$4 sm:$0xff]   ;;  %447 = vmatprep.mubr.bf16.mxu0 %v801_v34  ;;  %v805_v37 = vld [vmem:[%s1025_s0 + $0x24] ss:$16 sps:$4 sm:$0xff]   ;;  %v809_v39 = vld [vmem:[%s1025_s0 + $0x20] ss:$16 sps:$4 sm:$0xff]  }
   0xf   :  { %512 = vmatprep.mubr.bf16.mxu1 %v804_v36  ;;  %v807_v38 = vld [vmem:[%s1025_s0 + $0x2c] ss:$16 sps:$4 sm:$0xff]   ;;  %v810_v40 = vld [vmem:[%s1025_s0 + $0x28] ss:$16 sps:$4 sm:$0xff]   ;;  %v811_v41 = vld [vmem:[%s1025_s0 + $0x44] ss:$16 sps:$4 sm:$0xff]   ;;  %110 = vperm.xlu0 %765, %v96_v45  }
  0x10   :  { %691 = vmatpush3.bf16.msra.mxu0 %v781_v15  ;;  %v813_v42 = vld [vmem:[%s1025_s0 + $0x4c] ss:$16 sps:$4 sm:$0xff]   ;;  %v97_v44 = vld [vmem:[%s1026_s2 + $0x10] sm:$0xff]  ;;  %v816_v49 = vld [vmem:[%s1025_s0 + $0x48] ss:$16 sps:$4 sm:$0xff]  }
  0x11   :  { %731 = vmatpush3.bf16.msra.mxu1 %v782_v16  ;;  %692 = vmatprep.subr.bf16.mxu0 %v783_v17  ;;  %v98_v46 = vld [vmem:[%s1026_s2 + $0x18] sm:$0xff]  ;;  %v815_v47 = vld [vmem:[%s1025_s0 + $0x40] ss:$16 sps:$4 sm:$0xff]   ;;  %v817_v50 = vld [vmem:[%s1025_s0 + $0x64] ss:$16 sps:$4 sm:$0xff]  }
  0x12   :  { %732 = vmatprep.subr.bf16.mxu1 %v784_v18  ;;  %115 = vperm.xlu1 %766, %v97_v44   ;;  %v819_v52 = vld [vmem:[%s1025_s0 + $0x6c] ss:$16 sps:$4 sm:$0xff]   ;;  %v101_v53 = vld [vmem:[%s1026_s2 + $0x30] sm:$0xff]  ;;  %v822_v56 = vld [vmem:[%s1025_s0 + $0x68] ss:$16 sps:$4 sm:$0xff]  }
  0x13   :  { %125 = vperm.xlu0 %765, %v99_v48   ;;  %v102_v54 = vld [vmem:[%s1026_s2 + $0x38] sm:$0xff]  ;;  %v821_v55 = vld [vmem:[%s1025_s0 + $0x60] ss:$16 sps:$4 sm:$0xff]  }
  0x14   :  { %693 = vmatpush3.bf16.msra.mxu0 %v785_v19 }
  0x15   :  { %733 = vmatpush3.bf16.msra.mxu1 %v786_v20  ;;  %694 = vmatprep.subr.bf16.mxu0 %v787_v21 }
  0x16   :  { %734 = vmatprep.subr.bf16.mxu1 %v788_v22  ;;  %120 = vperm.xlu1 %766, %v98_v46  }
  0x17   :  { %135 = vperm.xlu0 %765, %v101_v53  }
  0x18   :  { %695 = vmatpush3.bf16.msra.mxu0 %v789_v23 }
  0x19   :  { %735 = vmatpush3.bf16.msra.mxu1 %v790_v24  ;;  %696 = vmatprep.subr.bf16.mxu0 %v791_v25 }
  0x1a   :  { %736 = vmatprep.subr.bf16.mxu1 %v792_v26  ;;  %130 = vperm.xlu1 %766, %v100_v51  }
  0x1c   :  { %697 = vmatpush3.bf16.msra.mxu0 %v793_v27 }
  0x1d   :  { %737 = vmatpush3.bf16.msra.mxu1 %v794_v28  ;;  %698 = vmatprep.subr.bf16.mxu0 %v795_v29 }
  0x1e   :  { %738 = vmatprep.subr.bf16.mxu1 %v796_v30  ;;  %140 = vperm.xlu1 %766, %v102_v54  }
  0x20   :  { %699 = vmatpush3.bf16.msra.mxu0 %v797_v31 }
  0x21   :  { %739 = vmatpush3.bf16.msra.mxu1 %v798_v32 }
  0x23   :  { %448 = vmatmul.mubr.bf16.vlgmr.msra.gmra.mrb[0].mxu0 %v799_v33 }
  0x24   :  { %513 = vmatmul.mubr.bf16.vlgmr.msra.gmra.mrb[0].mxu1 %v802_v35  ;;  %455 = vmatprep.mubr.bf16.mxu0 %v805_v37 }
  0x25   :  { %520 = vmatprep.mubr.bf16.mxu1 %v807_v38 }
  0x2b   :  { %456 = vmatmul.mubr.bf16.gmra.mrb[4].mxu0 %v809_v39 }
  0x2c   :  { %521 = vmatmul.mubr.bf16.gmra.mrb[4].mxu1 %v810_v40  ;;  %463 = vmatprep.mubr.bf16.mxu0 %v811_v41 }
  0x2d   :  { %528 = vmatprep.mubr.bf16.mxu1 %v813_v42 }
  0x33   :  { %464 = vmatmul.mubr.bf16.gmra.mrb[8].mxu0 %v815_v47 }
  0x34   :  { %529 = vmatmul.mubr.bf16.gmra.mrb[8].mxu1 %v816_v49  ;;  %471 = vmatprep.mubr.bf16.mxu0 %v817_v50 }
  0x35   :  { %536 = vmatprep.mubr.bf16.mxu1 %v819_v52 }
  0x3b   :  { %472 = vmatmul.mubr.bf16.gmra.mrb[12].mxu0 %v821_v55 }
  0x3c   :  { %537 = vmatmul.mubr.bf16.gmra.mrb[12].mxu1 %v822_v56 }
  0x89   :  { %v106_v57 = vpop.permute.xlu0 %105 }
  0x8e   :  { %v111_v59 = vpop.permute.xlu0 %110 }
  0x91   :  { %v116_v10 = vpop.permute.xlu1 %115 }
  0x92   :  { %v126_v32 = vpop.permute.xlu0 %125 }
  0x95   :  { %v121_v27 = vpop.permute.xlu1 %120 }
  0x96   :  { %v136_v52 = vpop.permute.xlu0 %135 }
  0x99   :  { %v131_v48 = vpop.permute.xlu1 %130 }
  0xf6   :  { %v700_v58 = vpop.f32.mrb[0].mxu0 }
  0xf7   :  { %v740_v60 = vpop.f32.mrb[0].mxu1  ;;  %v701_v61 = vpop.f32.mrb[1].mxu0 }
  0xf8   :  { %v702_v62 = vadd.f32 %v701_v61, %v700_v58  ;;  %v741_v63 = vpop.f32.mrb[1].mxu1  ;;  %v703_v0 = vpop.f32.mrb[2].mxu0 }
  0xf9   :  { %v742_v1 = vadd.f32 %v741_v63, %v740_v60  ;;  %v743_v2 = vpop.f32.mrb[2].mxu1  ;;  %v704_v3 = vpop.f32.mrb[3].mxu0 }
  0xfa   :  { %v450_v4 = vadd.f32 %v702_v62, %v106_v57  ;;  %v705_v5 = vadd.f32 %v704_v3, %v703_v0  ;;  %v744_v6 = vpop.f32.mrb[3].mxu1 }
  0xfb   :  { %v745_v7 = vadd.f32 %v744_v6, %v743_v2 }
  0xfc   :  { %v515_v8 = vadd.f32 %v742_v1, %v450_v4  ;;  %v453_v9 = vadd.f32 %v705_v5, %v111_v59  ;;  %v141_v5 = vpop.permute.xlu1 %140 }
  0xfe   :  { %v518_v11 = vadd.f32 %v745_v7, %v453_v9  ;;  %v706_v12 = vpop.f32.mrb[4].mxu0  ;;  %v545_v15 = vmax.f32 %v515_v8, 0.0 }
  0xff   :  { %v746_v13 = vpop.f32.mrb[4].mxu1  ;;  %v707_v14 = vpop.f32.mrb[5].mxu0 }
 0x100   :  { %v546_v16 = vmax.f32 %v518_v11, 0.0  ;;  %v708_v17 = vadd.f32 %v707_v14, %v706_v12  ;;  %v747_v18 = vpop.f32.mrb[5].mxu1  ;;  %v709_v19 = vpop.f32.mrb[6].mxu0 }
 0x101   :  { %v748_v20 = vadd.f32 %v747_v18, %v746_v13  ;;  %v749_v21 = vpop.f32.mrb[6].mxu1  ;;  %v710_v22 = vpop.f32.mrb[7].mxu0 }
 0x102   :  { %v664_v23 = vpack.c.bf16 %v546_v16, %v545_v15  ;;  %v458_v24 = vadd.f32 %v708_v17, %v116_v10  ;;  %v711_v25 = vadd.f32 %v710_v22, %v709_v19  ;;  %v750_v26 = vpop.f32.mrb[7].mxu1 }
 0x103   :  { %v751_v28 = vadd.f32 %v750_v26, %v749_v21 }
 0x104   :  { %665 = vst [vmem:[%s1027_s3] sm:$0xff] %v664_v23   ;;  %v523_v29 = vadd.f32 %v748_v20, %v458_v24  ;;  %v461_v30 = vadd.f32 %v711_v25, %v121_v27 }
 0x106   :  { %v526_v31 = vadd.f32 %v751_v28, %v461_v30  ;;  %v712_v33 = vpop.f32.mrb[8].mxu0  ;;  %v547_v36 = vmax.f32 %v523_v29, 0.0 }
 0x107   :  { %v752_v34 = vpop.f32.mrb[8].mxu1  ;;  %v713_v35 = vpop.f32.mrb[9].mxu0 }
 0x108   :  { %v548_v37 = vmax.f32 %v526_v31, 0.0  ;;  %v714_v38 = vadd.f32 %v713_v35, %v712_v33  ;;  %v753_v39 = vpop.f32.mrb[9].mxu1  ;;  %v715_v40 = vpop.f32.mrb[10].mxu0 }
 0x109   :  { %v754_v41 = vadd.f32 %v753_v39, %v752_v34  ;;  %v755_v42 = vpop.f32.mrb[10].mxu1  ;;  %v716_v43 = vpop.f32.mrb[11].mxu0 }
 0x10a   :  { %v669_v44 = vpack.c.bf16 %v548_v37, %v547_v36  ;;  %v466_v45 = vadd.f32 %v714_v38, %v126_v32  ;;  %v717_v46 = vadd.f32 %v716_v43, %v715_v40  ;;  %v756_v47 = vpop.f32.mrb[11].mxu1 }
 0x10b   :  { %v757_v49 = vadd.f32 %v756_v47, %v755_v42 }
 0x10c   :  { %681 = vst [vmem:[%s1027_s3 + $0x8] sm:$0xff] %v669_v44   ;;  %v531_v50 = vadd.f32 %v754_v41, %v466_v45  ;;  %v469_v51 = vadd.f32 %v717_v46, %v131_v48 }
 0x10e   :  { %v534_v53 = vadd.f32 %v757_v49, %v469_v51  ;;  %v718_v54 = vpop.f32.mrb[12].mxu0  ;;  %v549_v57 = vmax.f32 %v531_v50, 0.0 }
 0x10f   :  { %v758_v55 = vpop.f32.mrb[12].mxu1  ;;  %v719_v56 = vpop.f32.mrb[13].mxu0 }
 0x110   :  { %v550_v58 = vmax.f32 %v534_v53, 0.0  ;;  %v720_v59 = vadd.f32 %v719_v56, %v718_v54  ;;  %v759_v60 = vpop.f32.mrb[13].mxu1  ;;  %v721_v61 = vpop.f32.mrb[14].mxu0 }
 0x111   :  { %v760_v62 = vadd.f32 %v759_v60, %v758_v55  ;;  %v761_v63 = vpop.f32.mrb[14].mxu1  ;;  %v722_v0 = vpop.f32.mrb[15].mxu0 }
 0x112   :  { %v674_v1 = vpack.c.bf16 %v550_v58, %v549_v57  ;;  %v474_v2 = vadd.f32 %v720_v59, %v136_v52  ;;  %v723_v3 = vadd.f32 %v722_v0, %v721_v61  ;;  %v762_v4 = vpop.f32.mrb[15].mxu1 }
 0x113   :  { %v763_v6 = vadd.f32 %v762_v4, %v761_v63 }
 0x114   :  { %682 = vst [vmem:[%s1027_s3 + $0x10] sm:$0xff] %v674_v1   ;;  %v539_v7 = vadd.f32 %v760_v62, %v474_v2  ;;  %v477_v8 = vadd.f32 %v723_v3, %v141_v5 }
 0x116   :  { %v542_v9 = vadd.f32 %v763_v6, %v477_v8  ;;  %v551_v10 = vmax.f32 %v539_v7, 0.0 }
 0x118   :  { %v552_v11 = vmax.f32 %v542_v9, 0.0 }
 0x11a   :  { %v679_v12 = vpack.c.bf16 %v552_v11, %v551_v10 }
 0x11c   :  { %683 = vst [vmem:[%s1027_s3 + $0x18] sm:$0xff] %v679_v12  }

// kernel: vae_forward.12
= control target key start
LH: loop header
LB: loop body
LE: loop exit
PB: predicated region body
PF: predicated region fallthrough
CT: control target
= control target key end

     0   :  { %v1419_v1 = vmov 0   ;;  %vm1067_vm0 = vcmask 257024   ;;  %s1808_s1 = inlined_call_operand.vmem [shape: bf16[1024,32], index: 1, kind: input, shape index: {}]   ;;  %s1809_s0 = inlined_call_operand.vmem [shape: bf16[64,1024], index: 0, kind: input, shape index: {}]   ;;  %s1810_s2 = inlined_call_operand.vmem [shape: f32[64,1], index: 2, kind: input, shape index: {}]   ;;  %s1811_s3 = inlined_call_operand.vmem [shape: bf16[64,32], index: 3, kind: output, shape index: {}]  }
   0x1   :  { %v1355_v0 = vld [vmem:[%s1808_s1 + $0x40] sm:$0xff]   ;;  %1353 = vset.pattern.permute.xlu0 %v1419_v1  ;;  %1354 = vset.pattern.permute.xlu1 %v1419_v1  ;;  %v1359_v5 = vld [vmem:[%s1808_s1 + $0x48] sm:$0xff]   ;;  %v1363_v9 = vld [vmem:[%s1808_s1 + $0x50] sm:$0xff]  }
   0x2   :  { %v1356_v2 = vld [vmem:[%s1808_s1 + $0xc0] sm:$0xff]   ;;  %1192 = vmatprep.subr.bf16.mxu0 %v1355_v0  ;;  %v1360_v6 = vld [vmem:[%s1808_s1 + $0xc8] sm:$0xff]   ;;  %v1364_v10 = vld [vmem:[%s1808_s1 + $0xd0] sm:$0xff]  }
   0x3   :  { %v1357_v3 = vld [vmem:[%s1808_s1] sm:$0xff]   ;;  %1232 = vmatprep.subr.bf16.mxu1 %v1356_v2  ;;  %v1361_v7 = vld [vmem:[%s1808_s1 + $0x8] sm:$0xff]   ;;  %v1365_v11 = vld [vmem:[%s1808_s1 + $0x10] sm:$0xff]  }
   0x4   :  { %v1358_v4 = vld [vmem:[%s1808_s1 + $0x80] sm:$0xff]   ;;  %1193 = vmatpush3.bf16.msra.mxu0 %v1357_v3  ;;  %v1362_v8 = vld [vmem:[%s1808_s1 + $0x88] sm:$0xff]   ;;  %v1366_v12 = vld [vmem:[%s1808_s1 + $0x90] sm:$0xff]  }
   0x5   :  { %1233 = vmatpush3.bf16.msra.mxu1 %v1358_v4  ;;  %1194 = vmatprep.subr.bf16.mxu0 %v1359_v5  ;;  %v1367_v13 = vld [vmem:[%s1808_s1 + $0x58] sm:$0xff]   ;;  %v1371_v17 = vld [vmem:[%s1808_s1 + $0x60] sm:$0xff]   ;;  %v1375_v21 = vld [vmem:[%s1808_s1 + $0x68] sm:$0xff]  }
   0x6   :  { %1234 = vmatprep.subr.bf16.mxu1 %v1360_v6  ;;  %v1368_v14 = vld [vmem:[%s1808_s1 + $0xd8] sm:$0xff]   ;;  %v1372_v18 = vld [vmem:[%s1808_s1 + $0xe0] sm:$0xff]   ;;  %v1376_v22 = vld [vmem:[%s1808_s1 + $0xe8] sm:$0xff]  }
   0x7   :  { %v1369_v15 = vld [vmem:[%s1808_s1 + $0x18] sm:$0xff]   ;;  %v1373_v19 = vld [vmem:[%s1808_s1 + $0x20] sm:$0xff]   ;;  %v1377_v23 = vld [vmem:[%s1808_s1 + $0x28] sm:$0xff]  }
   0x8   :  { %1195 = vmatpush3.bf16.msra.mxu0 %v1361_v7  ;;  %v1370_v16 = vld [vmem:[%s1808_s1 + $0x98] sm:$0xff]   ;;  %v1374_v20 = vld [vmem:[%s1808_s1 + $0xa0] sm:$0xff]   ;;  %v1378_v24 = vld [vmem:[%s1808_s1 + $0xa8] sm:$0xff]  }
   0x9   :  { %1235 = vmatpush3.bf16.msra.mxu1 %v1362_v8  ;;  %1196 = vmatprep.subr.bf16.mxu0 %v1363_v9  ;;  %v1379_v25 = vld [vmem:[%s1808_s1 + $0x70] sm:$0xff]   ;;  %v1383_v29 = vld [vmem:[%s1808_s1 + $0x78] sm:$0xff]   ;;  %v15_v33 = vld [vmem:[%s1809_s0] sm:$0xff] }
   0xa   :  { %1236 = vmatprep.subr.bf16.mxu1 %v1364_v10  ;;  %v1380_v26 = vld [vmem:[%s1808_s1 + $0xf0] sm:$0xff]   ;;  %v1384_v30 = vld [vmem:[%s1808_s1 + $0xf8] sm:$0xff]   ;;  %v19_v34 = vld [vmem:[%s1809_s0 + $0x20] sm:$0xff] }
   0xb   :  { %v1381_v27 = vld [vmem:[%s1808_s1 + $0x30] sm:$0xff]   ;;  %v1385_v31 = vld [vmem:[%s1808_s1 + $0x38] sm:$0xff]   ;;  %v16_v35 = vld [vmem:[%s1809_s0 + $0x8] sm:$0xff]  ;;  %v1080_v36 = vcombine.low %v15_v33, %v19_v34  ;;  %v1081_v37 = vcombine.high %v15_v33, %v19_v34 }
   0xc   :  { %1197 = vmatpush3.bf16.msra.mxu0 %v1365_v11  ;;  %v1382_v28 = vld [vmem:[%s1808_s1 + $0xb0] sm:$0xff]   ;;  %v1386_v32 = vld [vmem:[%s1808_s1 + $0xb8] sm:$0xff]   ;;  %v20_v38 = vld [vmem:[%s1809_s0 + $0x28] sm:$0xff] }
   0xd   :  { %1237 = vmatpush3.bf16.msra.mxu1 %v1366_v12  ;;  %1198 = vmatprep.subr.bf16.mxu0 %v1367_v13  ;;  %v1082_v39 = vcombine.low %v16_v35, %v20_v38  ;;  %v1083_v40 = vcombine.high %v16_v35, %v20_v38  ;;  %v1387_v41 = vld [vmem:[%s1808_s1 + $0x140] sm:$0xff]   ;;  %v1391_v45 = vld [vmem:[%s1808_s1 + $0x148] sm:$0xff]   ;;  %v1395_v57 = vld [vmem:[%s1808_s1 + $0x150] sm:$0xff]  }
   0xe   :  { %1238 = vmatprep.subr.bf16.mxu1 %v1368_v14  ;;  %799 = vmatprep.mubr.bf16.mxu0 %v1081_v37  ;;  %v1388_v42 = vld [vmem:[%s1808_s1 + $0x1c0] sm:$0xff]   ;;  %v1392_v46 = vld [vmem:[%s1808_s1 + $0x1c8] sm:$0xff]   ;;  %v1396_v58 = vld [vmem:[%s1808_s1 + $0x1d0] sm:$0xff]  }
   0xf   :  { %864 = vmatprep.mubr.bf16.mxu1 %v1083_v40  ;;  %v1389_v43 = vld [vmem:[%s1808_s1 + $0x100] sm:$0xff]   ;;  %v1393_v47 = vld [vmem:[%s1808_s1 + $0x108] sm:$0xff]   ;;  %v1397_v59 = vld [vmem:[%s1808_s1 + $0x110] sm:$0xff]  }
  0x10   :  { %1199 = vmatpush3.bf16.msra.mxu0 %v1369_v15  ;;  %v1390_v44 = vld [vmem:[%s1808_s1 + $0x180] sm:$0xff]   ;;  %v1394_v48 = vld [vmem:[%s1808_s1 + $0x188] sm:$0xff]   ;;  %v1398_v60 = vld [vmem:[%s1808_s1 + $0x190] sm:$0xff]  }
  0x11   :  { %1239 = vmatpush3.bf16.msra.mxu1 %v1370_v16  ;;  %1200 = vmatprep.subr.bf16.mxu0 %v1371_v17  ;;  %v23_v49 = vld [vmem:[%s1809_s0 + $0x40] sm:$0xff]  ;;  %v24_v52 = vld [vmem:[%s1809_s0 + $0x48] sm:$0xff]  ;;  %v1399_v61 = vld [vmem:[%s1808_s1 + $0x158] sm:$0xff]  }
  0x12   :  { %1240 = vmatprep.subr.bf16.mxu1 %v1372_v18  ;;  %v27_v50 = vld [vmem:[%s1809_s0 + $0x60] sm:$0xff]  ;;  %v28_v53 = vld [vmem:[%s1809_s0 + $0x68] sm:$0xff]  ;;  %v1400_v62 = vld [vmem:[%s1808_s1 + $0x1d8] sm:$0xff]  }
  0x13   :  { %v1089_v51 = vcombine.high %v23_v49, %v27_v50  ;;  %v1088_v54 = vcombine.low %v23_v49, %v27_v50  ;;  %v1091_v55 = vcombine.high %v24_v52, %v28_v53  ;;  %v1090_v56 = vcombine.low %v24_v52, %v28_v53  ;;  %v1401_v63 = vld [vmem:[%s1808_s1 + $0x118] sm:$0xff]   ;;  %v31_v1 = vld [vmem:[%s1809_s0 + $0x80] sm:$0xff]  ;;  %v32_v3 = vld [vmem:[%s1809_s0 + $0x88] sm:$0xff] }
  0x14   :  { %1201 = vmatpush3.bf16.msra.mxu0 %v1373_v19  ;;  %v1402_v0 = vld [vmem:[%s1808_s1 + $0x198] sm:$0xff]   ;;  %v35_v2 = vld [vmem:[%s1809_s0 + $0xa0] sm:$0xff]  ;;  %v36_v4 = vld [vmem:[%s1809_s0 + $0xa8] sm:$0xff] }
  0x15   :  { %1241 = vmatpush3.bf16.msra.mxu1 %v1374_v20  ;;  %1202 = vmatprep.subr.bf16.mxu0 %v1375_v21  ;;  %v1097_v5 = vcombine.high %v31_v1, %v35_v2  ;;  %v1099_v6 = vcombine.high %v32_v3, %v36_v4  ;;  %v1096_v7 = vcombine.low %v31_v1, %v35_v2  ;;  %v1403_v9 = vld [vmem:[%s1808_s1 + $0x160] sm:$0xff]   ;;  %v1407_v13 = vld [vmem:[%s1808_s1 + $0x168] sm:$0xff]   ;;  %v17_v33 = vld [vmem:[%s1809_s0 + $0x10] sm:$0xff] }
  0x16   :  { %1242 = vmatprep.subr.bf16.mxu1 %v1376_v22  ;;  %v1098_v8 = vcombine.low %v32_v3, %v36_v4  ;;  %v1404_v10 = vld [vmem:[%s1808_s1 + $0x1e0] sm:$0xff]   ;;  %v1408_v14 = vld [vmem:[%s1808_s1 + $0x1e8] sm:$0xff]   ;;  %v21_v34 = vld [vmem:[%s1809_s0 + $0x30] sm:$0xff] }
  0x17   :  { %v1405_v11 = vld [vmem:[%s1808_s1 + $0x120] sm:$0xff]   ;;  %v1409_v15 = vld [vmem:[%s1808_s1 + $0x128] sm:$0xff]   ;;  %v1084_v35 = vcombine.low %v17_v33, %v21_v34  ;;  %v18_v37 = vld [vmem:[%s1809_s0 + $0x18] sm:$0xff] }
  0x18   :  { %1203 = vmatpush3.bf16.msra.mxu0 %v1377_v23  ;;  %v1406_v12 = vld [vmem:[%s1808_s1 + $0x1a0] sm:$0xff]   ;;  %v1410_v16 = vld [vmem:[%s1808_s1 + $0x1a8] sm:$0xff]   ;;  %v22_v38 = vld [vmem:[%s1809_s0 + $0x38] sm:$0xff] }
  0x19   :  { %1243 = vmatpush3.bf16.msra.mxu1 %v1378_v24  ;;  %1204 = vmatprep.subr.bf16.mxu0 %v1379_v25  ;;  %v39_v17 = vld [vmem:[%s1809_s0 + $0xc0] sm:$0xff]  ;;  %v40_v19 = vld [vmem:[%s1809_s0 + $0xc8] sm:$0xff]  ;;  %v1411_v25 = vld [vmem:[%s1808_s1 + $0x170] sm:$0xff]   ;;  %v1086_v40 = vcombine.low %v18_v37, %v22_v38 }
  0x1a   :  { %1244 = vmatprep.subr.bf16.mxu1 %v1380_v26  ;;  %v43_v18 = vld [vmem:[%s1809_s0 + $0xe0] sm:$0xff]  ;;  %v44_v21 = vld [vmem:[%s1809_s0 + $0xe8] sm:$0xff]  ;;  %v1412_v26 = vld [vmem:[%s1808_s1 + $0x1f0] sm:$0xff]  }
  0x1b   :  { %v1105_v20 = vcombine.high %v39_v17, %v43_v18  ;;  %v1104_v22 = vcombine.low %v39_v17, %v43_v18  ;;  %v1107_v23 = vcombine.high %v40_v19, %v44_v21  ;;  %v1106_v24 = vcombine.low %v40_v19, %v44_v21  ;;  %v37_v49 = vld [vmem:[%s1809_s0 + $0xb0] sm:$0xff]  ;;  %v38_v52 = vld [vmem:[%s1809_s0 + $0xb8] sm:$0xff]  ;;  %v176_v53 = vld [vmem:[%s1810_s2 + $0x8] sm:$0xff] }
  0x1c   :  { %1205 = vmatpush3.bf16.msra.mxu0 %v1381_v27  ;;  %v1413_v27 = vld [vmem:[%s1808_s1 + $0x130] sm:$0xff]   ;;  %v182_v3 = vld [vmem:[%s1810_s2 + $0x38] sm:$0xff] }
  0x1d   :  { %1245 = vmatpush3.bf16.msra.mxu1 %v1382_v28  ;;  %1206 = vmatprep.subr.bf16.mxu0 %v1383_v29  ;;  %v1414_v28 = vld [vmem:[%s1808_s1 + $0x1b0] sm:$0xff]   ;;  %v1415_v29 = vld [vmem:[%s1808_s1 + $0x178] sm:$0xff]  }
  0x1e   :  { %1246 = vmatprep.subr.bf16.mxu1 %v1384_v30  ;;  %v1416_v30 = vld [vmem:[%s1808_s1 + $0x1f8] sm:$0xff]   ;;  %v177_v50 = vld [vmem:[%s1810_s2 + $0x10] sm:$0xff] }
  0x1f   :  { %195 = vperm.xlu1 %1354, %v177_v50   ;;  %v181_v1 = vld [vmem:[%s1810_s2 + $0x30] sm:$0xff] }
  0x20   :  { %1207 = vmatpush3.bf16.msra.mxu0 %v1385_v31  ;;  %v1417_v31 = vld [vmem:[%s1808_s1 + $0x138] sm:$0xff]  }
  0x21   :  { %1247 = vmatpush3.bf16.msra.mxu1 %v1386_v32  ;;  %1272 = vmatprep.subr.bf16.mxu0 %v1387_v41  ;;  %v1418_v32 = vld [vmem:[%s1808_s1 + $0x1b8] sm:$0xff]   ;;  %v1087_v41 = vcombine.high %v18_v37, %v22_v38 }
  0x22   :  { %1312 = vmatprep.subr.bf16.mxu1 %v1388_v42  ;;  %v29_v42 = vld [vmem:[%s1809_s0 + $0x70] sm:$0xff] }
  0x23   :  { %800 = vmatmul.mubr.bf16.vlgmr.msra.gmra.mrb[0].mxu0 %v1080_v36  ;;  %v1085_v36 = vcombine.high %v17_v33, %v21_v34 }
  0x24   :  { %865 = vmatmul.mubr.bf16.vlgmr.msra.gmra.mrb[0].mxu1 %v1082_v39  ;;  %1273 = vmatpush3.bf16.msra.mxu0 %v1389_v43  ;;  %v25_v39 = vld [vmem:[%s1809_s0 + $0x50] sm:$0xff]  ;;  %v26_v43 = vld [vmem:[%s1809_s0 + $0x58] sm:$0xff] }
  0x25   :  { %1313 = vmatpush3.bf16.msra.mxu1 %v1390_v44  ;;  %1274 = vmatprep.subr.bf16.mxu0 %v1391_v45  ;;  %v30_v44 = vld [vmem:[%s1809_s0 + $0x78] sm:$0xff]  ;;  %v1093_v45 = vcombine.high %v25_v39, %v29_v42 }
  0x26   :  { %1314 = vmatprep.subr.bf16.mxu1 %v1392_v46  ;;  %807 = vmatprep.mubr.bf16.mxu0 %v1089_v51  ;;  %v1095_v46 = vcombine.high %v26_v43, %v30_v44  ;;  %v34_v51 = vld [vmem:[%s1809_s0 + $0x98] sm:$0xff] }
  0x27   :  { %872 = vmatprep.mubr.bf16.mxu1 %v1091_v55  ;;  %v178_v55 = vld [vmem:[%s1810_s2 + $0x18] sm:$0xff]  ;;  %v1102_v4 = vcombine.low %v34_v51, %v38_v52 }
  0x28   :  { %1275 = vmatpush3.bf16.msra.mxu0 %v1393_v47  ;;  %v175_v47 = vld [vmem:[%s1810_s2] sm:$0xff]  ;;  %200 = vperm.xlu1 %1354, %v178_v55  }
  0x29   :  { %1315 = vmatpush3.bf16.msra.mxu1 %v1394_v48  ;;  %1276 = vmatprep.subr.bf16.mxu0 %v1395_v57  ;;  %v33_v48 = vld [vmem:[%s1809_s0 + $0x90] sm:$0xff] }
  0x2a   :  { %1316 = vmatprep.subr.bf16.mxu1 %v1396_v58  ;;  %185 = vperm.xlu0 %1353, %v175_v47   ;;  %v1101_v57 = vcombine.high %v33_v48, %v37_v49  ;;  %v1103_v58 = vcombine.high %v34_v51, %v38_v52  ;;  %v1100_v2 = vcombine.low %v33_v48, %v37_v49 }
  0x2b   :  { %808 = vmatmul.mubr.bf16.gmra.mrb[4].mxu0 %v1088_v54  ;;  %v1092_v54 = vcombine.low %v25_v39, %v29_v42 }
  0x2c   :  { %873 = vmatmul.mubr.bf16.gmra.mrb[4].mxu1 %v1090_v56  ;;  %1277 = vmatpush3.bf16.msra.mxu0 %v1397_v59  ;;  %v1094_v56 = vcombine.low %v26_v43, %v30_v44  ;;  %v179_v59 = vld [vmem:[%s1810_s2 + $0x20] sm:$0xff] }
  0x2d   :  { %1317 = vmatpush3.bf16.msra.mxu1 %v1398_v60  ;;  %1278 = vmatprep.subr.bf16.mxu0 %v1399_v61  ;;  %v180_v60 = vld [vmem:[%s1810_s2 + $0x28] sm:$0xff]  ;;  %v41_v61 = vld [vmem:[%s1809_s0 + $0xd0] sm:$0xff] }
  0x2e   :  { %1318 = vmatprep.subr.bf16.mxu1 %v1400_v62  ;;  %815 = vmatprep.mubr.bf16.mxu0 %v1097_v5  ;;  %v45_v62 = vld [vmem:[%s1809_s0 + $0xf0] sm:$0xff] }
  0x2f   :  { %880 = vmatprep.mubr.bf16.mxu1 %v1099_v6  ;;  %190 = vperm.xlu0 %1353, %v176_v53   ;;  %v1109_v5 = vcombine.high %v41_v61, %v45_v62 }
  0x30   :  { %1279 = vmatpush3.bf16.msra.mxu0 %v1401_v63  ;;  %v42_v63 = vld [vmem:[%s1809_s0 + $0xd8] sm:$0xff]  ;;  %210 = vperm.xlu1 %1354, %v180_v60  }
  0x31   :  { %1319 = vmatpush3.bf16.msra.mxu1 %v1402_v0  ;;  %1280 = vmatprep.subr.bf16.mxu0 %v1403_v9  ;;  %v46_v0 = vld [vmem:[%s1809_s0 + $0xf8] sm:$0xff] }
  0x32   :  { %1320 = vmatprep.subr.bf16.mxu1 %v1404_v10  ;;  %v1111_v6 = vcombine.high %v42_v63, %v46_v0 }
  0x33   :  { %816 = vmatmul.mubr.bf16.gmra.mrb[8].mxu0 %v1096_v7  ;;  %205 = vperm.xlu0 %1353, %v179_v59   ;;  %v1108_v7 = vcombine.low %v41_v61, %v45_v62 }
  0x34   :  { %881 = vmatmul.mubr.bf16.gmra.mrb[8].mxu1 %v1098_v8  ;;  %1281 = vmatpush3.bf16.msra.mxu0 %v1405_v11  ;;  %v1110_v8 = vcombine.low %v42_v63, %v46_v0 }
  0x35   :  { %1321 = vmatpush3.bf16.msra.mxu1 %v1406_v12  ;;  %1282 = vmatprep.subr.bf16.mxu0 %v1407_v13 }
  0x36   :  { %1322 = vmatprep.subr.bf16.mxu1 %v1408_v14  ;;  %823 = vmatprep.mubr.bf16.mxu0 %v1105_v20 }
  0x37   :  { %888 = vmatprep.mubr.bf16.mxu1 %v1107_v23  ;;  %215 = vperm.xlu0 %1353, %v181_v1  }
  0x38   :  { %1283 = vmatpush3.bf16.msra.mxu0 %v1409_v15  ;;  %220 = vperm.xlu1 %1354, %v182_v3  }
  0x39   :  { %1323 = vmatpush3.bf16.msra.mxu1 %v1410_v16  ;;  %1284 = vmatprep.subr.bf16.mxu0 %v1411_v25 }
  0x3a   :  { %1324 = vmatprep.subr.bf16.mxu1 %v1412_v26 }
  0x3b   :  { %824 = vmatmul.mubr.bf16.gmra.mrb[12].mxu0 %v1104_v22 }
  0x3c   :  { %889 = vmatmul.mubr.bf16.gmra.mrb[12].mxu1 %v1106_v24  ;;  %1285 = vmatpush3.bf16.msra.mxu0 %v1413_v27 }
  0x3d   :  { %1325 = vmatpush3.bf16.msra.mxu1 %v1414_v28  ;;  %1286 = vmatprep.subr.bf16.mxu0 %v1415_v29 }
  0x3e   :  { %1326 = vmatprep.subr.bf16.mxu1 %v1416_v30  ;;  %929 = vmatprep.mubr.bf16.mxu0 %v1085_v36 }
  0x3f   :  { %994 = vmatprep.mubr.bf16.mxu1 %v1087_v41 }
  0x40   :  { %1287 = vmatpush3.bf16.msra.mxu0 %v1417_v31 }
  0x41   :  { %1327 = vmatpush3.bf16.msra.mxu1 %v1418_v32 }
  0x43   :  { %930 = vmatmul.mubr.bf16.vlgmr.msra.gmra.mrb[16].mxu0 %v1084_v35 }
  0x44   :  { %995 = vmatmul.mubr.bf16.vlgmr.msra.gmra.mrb[16].mxu1 %v1086_v40  ;;  %937 = vmatprep.mubr.bf16.mxu0 %v1093_v45 }
  0x45   :  { %1002 = vmatprep.mubr.bf16.mxu1 %v1095_v46 }
  0x4b   :  { %938 = vmatmul.mubr.bf16.gmra.mrb[20].mxu0 %v1092_v54 }
  0x4c   :  { %1003 = vmatmul.mubr.bf16.gmra.mrb[20].mxu1 %v1094_v56  ;;  %945 = vmatprep.mubr.bf16.mxu0 %v1101_v57 }
  0x4d   :  { %1010 = vmatprep.mubr.bf16.mxu1 %v1103_v58 }
  0x53   :  { %946 = vmatmul.mubr.bf16.gmra.mrb[24].mxu0 %v1100_v2 }
  0x54   :  { %1011 = vmatmul.mubr.bf16.gmra.mrb[24].mxu1 %v1102_v4  ;;  %953 = vmatprep.mubr.bf16.mxu0 %v1109_v5 }
  0x55   :  { %1018 = vmatprep.mubr.bf16.mxu1 %v1111_v6 }
  0x5b   :  { %954 = vmatmul.mubr.bf16.gmra.mrb[28].mxu0 %v1108_v7 }
  0x5c   :  { %1019 = vmatmul.mubr.bf16.gmra.mrb[28].mxu1 %v1110_v8 }
  0x9e   :  { %v196_v10 = vpop.permute.xlu1 %195 }
  0xa7   :  { %v201_v29 = vpop.permute.xlu1 %200 }
  0xa9   :  { %v186_v9 = vpop.permute.xlu0 %185 }
  0xae   :  { %v191_v12 = vpop.permute.xlu0 %190 }
  0xaf   :  { %v211_v46 = vpop.permute.xlu1 %210 }
  0xb2   :  { %v206_v45 = vpop.permute.xlu0 %205 }
  0xb6   :  { %v216_v63 = vpop.permute.xlu0 %215 }
  0xb7   :  { %v221_v1 = vpop.permute.xlu1 %220 }
  0xf6   :  { %v1208_v11 = vpop.f32.mrb[0].mxu0 }
  0xf7   :  { %v1248_v13 = vpop.f32.mrb[0].mxu1  ;;  %v1209_v14 = vpop.f32.mrb[1].mxu0 }
  0xf8   :  { %v1210_v15 = vadd.f32 %v1209_v14, %v1208_v11  ;;  %v1249_v16 = vpop.f32.mrb[1].mxu1  ;;  %v1211_v17 = vpop.f32.mrb[2].mxu0 }
  0xf9   :  { %v1250_v18 = vadd.f32 %v1249_v16, %v1248_v13  ;;  %v1251_v19 = vpop.f32.mrb[2].mxu1  ;;  %v1212_v20 = vpop.f32.mrb[3].mxu0 }
  0xfa   :  { %v802_v21 = vadd.f32 %v1210_v15, %v186_v9  ;;  %v1213_v22 = vadd.f32 %v1212_v20, %v1211_v17  ;;  %v1252_v23 = vpop.f32.mrb[3].mxu1 }
  0xfb   :  { %v1253_v24 = vadd.f32 %v1252_v23, %v1251_v19 }
  0xfc   :  { %v1752_v25 = vadd.f32 %v1250_v18, %v802_v21  ;;  %v805_v26 = vadd.f32 %v1213_v22, %v191_v12 }
  0xfe   :  { %v1754_v27 = vadd.f32 %v1253_v24, %v805_v26  ;;  %v1214_v28 = vpop.f32.mrb[4].mxu0 }
  0xff   :  { %v1254_v30 = vpop.f32.mrb[4].mxu1  ;;  %v1215_v31 = vpop.f32.mrb[5].mxu0 }
 0x100   :  { %v1216_v32 = vadd.f32 %v1215_v31, %v1214_v28  ;;  %v1255_v33 = vpop.f32.mrb[5].mxu1  ;;  %v1217_v34 = vpop.f32.mrb[6].mxu0 }
 0x101   :  { %v1256_v35 = vadd.f32 %v1255_v33, %v1254_v30  ;;  %v1257_v36 = vpop.f32.mrb[6].mxu1  ;;  %v1218_v37 = vpop.f32.mrb[7].mxu0 }
 0x102   :  { %v810_v38 = vadd.f32 %v1216_v32, %v196_v10  ;;  %v1219_v39 = vadd.f32 %v1218_v37, %v1217_v34  ;;  %v1258_v40 = vpop.f32.mrb[7].mxu1 }
 0x103   :  { %v1259_v41 = vadd.f32 %v1258_v40, %v1257_v36 }
 0x104   :  { %v1756_v42 = vadd.f32 %v1256_v35, %v810_v38  ;;  %v813_v43 = vadd.f32 %v1219_v39, %v201_v29 }
 0x106   :  { %v1758_v44 = vadd.f32 %v1259_v41, %v813_v43  ;;  %v1220_v47 = vpop.f32.mrb[8].mxu0 }
 0x107   :  { %v1260_v48 = vpop.f32.mrb[8].mxu1  ;;  %v1221_v49 = vpop.f32.mrb[9].mxu0 }
 0x108   :  { %v1261_v50 = vpop.f32.mrb[9].mxu1  ;;  %v1222_v51 = vadd.f32 %v1221_v49, %v1220_v47  ;;  %v1223_v53 = vpop.f32.mrb[10].mxu0 }
 0x109   :  { %v1262_v52 = vadd.f32 %v1261_v50, %v1260_v48  ;;  %v1263_v54 = vpop.f32.mrb[10].mxu1  ;;  %v1224_v55 = vpop.f32.mrb[11].mxu0 }
 0x10a   :  { %v1264_v56 = vpop.f32.mrb[11].mxu1  ;;  %v818_v57 = vadd.f32 %v1222_v51, %v206_v45  ;;  %v1225_v58 = vadd.f32 %v1224_v55, %v1223_v53 }
 0x10b   :  { %v1265_v59 = vadd.f32 %v1264_v56, %v1263_v54 }
 0x10c   :  { %v1760_v60 = vadd.f32 %v1262_v52, %v818_v57  ;;  %v821_v61 = vadd.f32 %v1225_v58, %v211_v46 }
 0x10e   :  { %v1762_v62 = vadd.f32 %v1265_v59, %v821_v61  ;;  %v1226_v0 = vpop.f32.mrb[12].mxu0 }
 0x10f   :  { %v1266_v2 = vpop.f32.mrb[12].mxu1  ;;  %v1227_v3 = vpop.f32.mrb[13].mxu0 }
 0x110   :  { %v1228_v4 = vadd.f32 %v1227_v3, %v1226_v0  ;;  %v1267_v5 = vpop.f32.mrb[13].mxu1  ;;  %v1229_v6 = vpop.f32.mrb[14].mxu0 }
 0x111   :  { %v1268_v7 = vadd.f32 %v1267_v5, %v1266_v2  ;;  %v1269_v8 = vpop.f32.mrb[14].mxu1  ;;  %v1230_v9 = vpop.f32.mrb[15].mxu0 }
 0x112   :  { %v826_v10 = vadd.f32 %v1228_v4, %v216_v63  ;;  %v1231_v11 = vadd.f32 %v1230_v9, %v1229_v6  ;;  %v1270_v12 = vpop.f32.mrb[15].mxu1 }
 0x113   :  { %v1271_v13 = vadd.f32 %v1270_v12, %v1269_v8 }
 0x114   :  { %v1764_v14 = vadd.f32 %v1268_v7, %v826_v10  ;;  %v829_v15 = vadd.f32 %v1231_v11, %v221_v1 }
 0x116   :  { %v1766_v16 = vadd.f32 %v1271_v13, %v829_v15  ;;  %v1288_v17 = vpop.f32.mrb[16].mxu0 }
 0x117   :  { %v1328_v18 = vpop.f32.mrb[16].mxu1  ;;  %v1289_v19 = vpop.f32.mrb[17].mxu0 }
 0x118   :  { %v1290_v20 = vadd.f32 %v1289_v19, %v1288_v17  ;;  %v1329_v21 = vpop.f32.mrb[17].mxu1  ;;  %v1291_v22 = vpop.f32.mrb[18].mxu0 }
 0x119   :  { %v1330_v23 = vadd.f32 %v1329_v21, %v1328_v18  ;;  %v1331_v24 = vpop.f32.mrb[18].mxu1  ;;  %v1292_v26 = vpop.f32.mrb[19].mxu0 }
 0x11a   :  { %v932_v28 = vadd.f32 %v1290_v20, %v1752_v25  ;;  %v1293_v29 = vadd.f32 %v1292_v26, %v1291_v22  ;;  %v1332_v30 = vpop.f32.mrb[19].mxu1 }
 0x11b   :  { %v1333_v31 = vadd.f32 %v1332_v30, %v1331_v24 }
 0x11c   :  { %v997_v32 = vadd.f32 %v1330_v23, %v932_v28  ;;  %v935_v33 = vadd.f32 %v1293_v29, %v1754_v27 }
 0x11e   :  { %v1027_v34 = vmax.f32 %v997_v32, 0.0  ;;  %v1000_v35 = vadd.f32 %v1333_v31, %v935_v33  ;;  %v1294_v36 = vpop.f32.mrb[20].mxu0 }
 0x11f   :  { %v1334_v37 = vpop.f32.mrb[20].mxu1  ;;  %v1295_v38 = vpop.f32.mrb[21].mxu0 }
 0x120   :  { %v1184_v39 = vpack.c.bf16 %v1027_v34, %v1027_v34  ;;  %v1028_v40 = vmax.f32 %v1000_v35, 0.0  ;;  %v1296_v41 = vadd.f32 %v1295_v38, %v1294_v36  ;;  %v1335_v43 = vpop.f32.mrb[21].mxu1  ;;  %v1297_v45 = vpop.f32.mrb[22].mxu0 }
 0x121   :  { %v1336_v46 = vadd.f32 %v1335_v43, %v1334_v37  ;;  %v1337_v47 = vpop.f32.mrb[22].mxu1  ;;  %v1298_v25 = vpop.f32.mrb[23].mxu0 }
 0x122   :  { %1068 = vst.msk [vmem:[%s1811_s3] sm:$0xf] %vm1067_vm0, %v1184_v39  ;;  %v1185_v27 = vpack.c.bf16 %v1028_v40, %v1028_v40  ;;  %v940_v48 = vadd.f32 %v1296_v41, %v1756_v42  ;;  %v1299_v49 = vadd.f32 %v1298_v25, %v1297_v45  ;;  %v1338_v50 = vpop.f32.mrb[23].mxu1 }
 0x123   :  { %v1339_v51 = vadd.f32 %v1338_v50, %v1337_v47 }
 0x124   :  { %1069 = vst.msk [vmem:[%s1811_s3 + $0x4] sm:$0xf] %vm1067_vm0, %v1185_v27  ;;  %v1005_v52 = vadd.f32 %v1336_v46, %v940_v48  ;;  %v943_v53 = vadd.f32 %v1299_v49, %v1758_v44 }
 0x126   :  { %v1029_v54 = vmax.f32 %v1005_v52, 0.0  ;;  %v1008_v55 = vadd.f32 %v1339_v51, %v943_v53  ;;  %v1300_v56 = vpop.f32.mrb[24].mxu0 }
 0x127   :  { %v1340_v57 = vpop.f32.mrb[24].mxu1  ;;  %v1301_v58 = vpop.f32.mrb[25].mxu0 }
 0x128   :  { %v1186_v59 = vpack.c.bf16 %v1029_v54, %v1029_v54  ;;  %v1030_v61 = vmax.f32 %v1008_v55, 0.0  ;;  %v1302_v63 = vadd.f32 %v1301_v58, %v1300_v56  ;;  %v1341_v42 = vpop.f32.mrb[25].mxu1  ;;  %v1303_v0 = vpop.f32.mrb[26].mxu0 }
 0x129   :  { %v1342_v1 = vadd.f32 %v1341_v42, %v1340_v57  ;;  %v1343_v2 = vpop.f32.mrb[26].mxu1  ;;  %v1304_v3 = vpop.f32.mrb[27].mxu0 }
 0x12a   :  { %1070 = vst.msk [vmem:[%s1811_s3 + $0x8] sm:$0xf] %vm1067_vm0, %v1186_v59  ;;  %v1187_v4 = vpack.c.bf16 %v1030_v61, %v1030_v61  ;;  %v948_v44 = vadd.f32 %v1302_v63, %v1760_v60  ;;  %v1305_v5 = vadd.f32 %v1304_v3, %v1303_v0  ;;  %v1344_v6 = vpop.f32.mrb[27].mxu1 }
 0x12b   :  { %v1345_v7 = vadd.f32 %v1344_v6, %v1343_v2 }
 0x12c   :  { %1071 = vst.msk [vmem:[%s1811_s3 + $0xc] sm:$0xf] %vm1067_vm0, %v1187_v4  ;;  %v1013_v8 = vadd.f32 %v1342_v1, %v948_v44  ;;  %v951_v9 = vadd.f32 %v1305_v5, %v1762_v62 }
 0x12e   :  { %v1031_v10 = vmax.f32 %v1013_v8, 0.0  ;;  %v1016_v11 = vadd.f32 %v1345_v7, %v951_v9  ;;  %v1306_v12 = vpop.f32.mrb[28].mxu0 }
 0x12f   :  { %v1346_v13 = vpop.f32.mrb[28].mxu1  ;;  %v1307_v15 = vpop.f32.mrb[29].mxu0 }
 0x130   :  { %v1188_v17 = vpack.c.bf16 %v1031_v10, %v1031_v10  ;;  %v1032_v18 = vmax.f32 %v1016_v11, 0.0  ;;  %v1308_v19 = vadd.f32 %v1307_v15, %v1306_v12  ;;  %v1347_v60 = vpop.f32.mrb[29].mxu1  ;;  %v1309_v20 = vpop.f32.mrb[30].mxu0 }
 0x131   :  { %v1348_v21 = vadd.f32 %v1347_v60, %v1346_v13  ;;  %v1349_v22 = vpop.f32.mrb[30].mxu1  ;;  %v1310_v23 = vpop.f32.mrb[31].mxu0 }
 0x132   :  { %1072 = vst.msk [vmem:[%s1811_s3 + $0x10] sm:$0xf] %vm1067_vm0, %v1188_v17  ;;  %v1189_v24 = vpack.c.bf16 %v1032_v18, %v1032_v18  ;;  %v956_v62 = vadd.f32 %v1308_v19, %v1764_v14  ;;  %v1311_v26 = vadd.f32 %v1310_v23, %v1309_v20  ;;  %v1350_v28 = vpop.f32.mrb[31].mxu1 }
 0x133   :  { %v1351_v29 = vadd.f32 %v1350_v28, %v1349_v22 }
 0x134   :  { %1073 = vst.msk [vmem:[%s1811_s3 + $0x14] sm:$0xf] %vm1067_vm0, %v1189_v24  ;;  %v1021_v30 = vadd.f32 %v1348_v21, %v956_v62  ;;  %v959_v31 = vadd.f32 %v1311_v26, %v1766_v16 }
 0x136   :  { %v1033_v32 = vmax.f32 %v1021_v30, 0.0  ;;  %v1024_v33 = vadd.f32 %v1351_v29, %v959_v31 }
 0x138   :  { %v1190_v34 = vpack.c.bf16 %v1033_v32, %v1033_v32  ;;  %v1034_v35 = vmax.f32 %v1024_v33, 0.0 }
 0x13a   :  { %1074 = vst.msk [vmem:[%s1811_s3 + $0x18] sm:$0xf] %vm1067_vm0, %v1190_v34  ;;  %v1191_v14 = vpack.c.bf16 %v1034_v35, %v1034_v35 }
 0x13c   :  { %1075 = vst.msk [vmem:[%s1811_s3 + $0x1c] sm:$0xf] %vm1067_vm0, %v1191_v14 }

// kernel: vae_forward.13
= control target key start
LH: loop header
LB: loop body
LE: loop exit
PB: predicated region body
PF: predicated region fallthrough
CT: control target
= control target key end

     0   :  { %20 = vsyncpa [#allocation3], 0  ;;  %v178_v7 = vlaneseq  ;;  %v3308_v8 = vmov 1966171168   ;;  %s4434_s0 = inlined_call_operand.vmem [shape: bf16[2,1024], index: 0, kind: input, shape index: {}]   ;;  %s4435_s1 = inlined_call_operand.vmem [shape: bf16[1024,256], index: 1, kind: input, shape index: {}]   ;;  %s4436_s2 = inlined_call_operand.vmem [shape: f32[1,256], index: 2, kind: input, shape index: {}]   ;;  %s4437_s3 = inlined_call_operand.vmem [shape: bf16[256,100], index: 3, kind: input, shape index: {}]   ;;  %s4438_s4 = inlined_call_operand.vmem [shape: f32[1,100], index: 4, kind: input, shape index: {}]   ;;  %s4439_s5 = inlined_call_operand.vmem [shape: bf16[256,100], index: 5, kind: input, shape index: {}]   ;;  %s4440_s6 = inlined_call_operand.vmem [shape: f32[1,100], index: 6, kind: input, shape index: {}]   ;;  %s4441_s7 = inlined_call_operand.vmem [shape: f32[2,100], index: 7, kind: input, shape index: {}]   ;;  %s4442_s8 = inlined_call_operand.vmem [shape: bf16[100,256], index: 8, kind: input, shape index: {}]   ;;  %s4443_s9 = inlined_call_operand.vmem [shape: f32[1,256], index: 9, kind: input, shape index: {}]   ;;  %s4444_s10 = inlined_call_operand.vmem [shape: bf16[256,1024], index: 10, kind: input, shape index: {}]   ;;  %s4445_s11 = inlined_call_operand.vmem [shape: f32[1,1024], index: 11, kind: input, shape index: {}]   ;;  %s4446_s12 = inlined_call_operand.hbm [shape: f32[2,100], index: 12, kind: output, shape index: {0}]   ;;  %s4447_s13 = inlined_call_operand.hbm [shape: f32[2,100], index: 13, kind: output, shape index: {1}]   ;;  %s4448_s14 = inlined_call_operand.vmem [shape: bf16[2,1024], index: 14, kind: output, shape index: {2}]  }
   0x1   :  { %v3013_v0 = vld [vmem:[%s4435_s1 + $0x4] ss:$8 sps:$4 sm:$0xff]   ;;  %v3015_v1 = vld [vmem:[%s4435_s1] ss:$8 sps:$4 sm:$0xff]   ;;  %v3016_v2 = vld [vmem:[%s4435_s1 + $0x14] ss:$8 sps:$4 sm:$0xff]   ;;  %v191_v9 = vunpack.c.l.s4 %v3308_v8 }
   0x2   :  { %886 = vmatprep.subr.bf16.mxu0 %v3013_v0  ;;  %v3018_v3 = vld [vmem:[%s4435_s1 + $0x10] ss:$8 sps:$4 sm:$0xff]   ;;  %v3019_v4 = vld [vmem:[%s4435_s1 + $0x24] ss:$8 sps:$4 sm:$0xff]   ;;  %v3021_v5 = vld [vmem:[%s4435_s1 + $0x20] ss:$8 sps:$4 sm:$0xff]  }
   0x3   :  { %887 = vmatpush1.bf16.msra.mxu0 %v3015_v1  ;;  %v3022_v6 = vld [vmem:[%s4435_s1 + $0x34] ss:$8 sps:$4 sm:$0xff]   ;;  %v3024_v10 = vld [vmem:[%s4435_s1 + $0x30] ss:$8 sps:$4 sm:$0xff]   ;;  %v3025_v11 = vld [vmem:[%s4435_s1 + $0x44] ss:$8 sps:$4 sm:$0xff]   ;;  %v192_v13 = vunpack.c.0.s8 %v191_v9 }
   0x4   :  { %888 = vmatprep.subr.bf16.mxu0 %v3016_v2  ;;  %v3414_v12 = vshrl.u32 %v178_v7, 7  ;;  %v3027_v14 = vld [vmem:[%s4435_s1 + $0x40] ss:$8 sps:$4 sm:$0xff]   ;;  %v3028_v15 = vld [vmem:[%s4435_s1 + $0x54] ss:$8 sps:$4 sm:$0xff]  }
   0x5   :  { %v3030_v17 = vld [vmem:[%s4435_s1 + $0x50] ss:$8 sps:$4 sm:$0xff]   ;;  %v3031_v18 = vld [vmem:[%s4435_s1 + $0x64] ss:$8 sps:$4 sm:$0xff]   ;;  %v3033_v21 = vld [vmem:[%s4435_s1 + $0x60] ss:$8 sps:$4 sm:$0xff]  }
   0x6   :  { %v3423_v16 = vsub.s32 %v192_v13, %v3414_v12  ;;  %v3434_v19 = vld [vmem:[%s4434_s0] sm:$0xff]  ;;  %v3034_v22 = vld [vmem:[%s4435_s1 + $0x74] ss:$8 sps:$4 sm:$0xff]   ;;  %v3036_v25 = vld [vmem:[%s4435_s1 + $0x70] ss:$8 sps:$4 sm:$0xff]  }
   0x7   :  { %889 = vmatpush1.bf16.msra.mxu0 %v3018_v3  ;;  %v3037_v26 = vld [vmem:[%s4435_s1 + $0x84] ss:$8 sps:$4 sm:$0xff]   ;;  %v3039_v27 = vld [vmem:[%s4435_s1 + $0x80] ss:$8 sps:$4 sm:$0xff]   ;;  %v3040_v28 = vld [vmem:[%s4435_s1 + $0x94] ss:$8 sps:$4 sm:$0xff]  }
   0x8   :  { %890 = vmatprep.subr.bf16.mxu0 %v3019_v4  ;;  %v196_v20 = vrot.slane %v3434_v19, %v3423_v16  ;;  %v3042_v29 = vld [vmem:[%s4435_s1 + $0x90] ss:$8 sps:$4 sm:$0xff]   ;;  %v3043_v30 = vld [vmem:[%s4435_s1 + $0xa4] ss:$8 sps:$4 sm:$0xff]   ;;  %v3045_v31 = vld [vmem:[%s4435_s1 + $0xa0] ss:$8 sps:$4 sm:$0xff]  }
   0x9   :  { %v3046_v32 = vld [vmem:[%s4435_s1 + $0xb4] ss:$8 sps:$4 sm:$0xff]   ;;  %v3048_v33 = vld [vmem:[%s4435_s1 + $0xb0] ss:$8 sps:$4 sm:$0xff]   ;;  %v3049_v34 = vld [vmem:[%s4435_s1 + $0xc4] ss:$8 sps:$4 sm:$0xff]  }
   0xa   :  { %v204_v23 = vcombine.high %v196_v20, %v196_v20  ;;  %v3051_v35 = vld [vmem:[%s4435_s1 + $0xc0] ss:$8 sps:$4 sm:$0xff]   ;;  %v3052_v36 = vld [vmem:[%s4435_s1 + $0xd4] ss:$8 sps:$4 sm:$0xff]   ;;  %v3054_v37 = vld [vmem:[%s4435_s1 + $0xd0] ss:$8 sps:$4 sm:$0xff]   ;;  %v3500_v43 = vrot.slane %v196_v20, %v3423_v16 }
   0xb   :  { %891 = vmatpush1.bf16.msra.mxu0 %v3021_v5  ;;  %v3055_v38 = vld [vmem:[%s4435_s1 + $0xe4] ss:$8 sps:$4 sm:$0xff]   ;;  %v3057_v39 = vld [vmem:[%s4435_s1 + $0xe0] ss:$8 sps:$4 sm:$0xff]   ;;  %v3058_v40 = vld [vmem:[%s4435_s1 + $0xf4] ss:$8 sps:$4 sm:$0xff]  }
   0xc   :  { %892 = vmatprep.subr.bf16.mxu0 %v3022_v6  ;;  %v226_v24 = vrot.slane %v204_v23, %v3423_v16  ;;  %v3060_v41 = vld [vmem:[%s4435_s1 + $0xf0] ss:$8 sps:$4 sm:$0xff]   ;;  %v3064_v42 = vld [vmem:[%s4435_s1 + $0x104] ss:$8 sps:$4 sm:$0xff]   ;;  %v3062_v45 = vld [vmem:[%s4435_s1 + $0x100] ss:$8 sps:$4 sm:$0xff]  }
   0xd   :  { %v3067_v46 = vld [vmem:[%s4435_s1 + $0x114] ss:$8 sps:$4 sm:$0xff]   ;;  %v3065_v47 = vld [vmem:[%s4435_s1 + $0x110] ss:$8 sps:$4 sm:$0xff]   ;;  %v3070_v48 = vld [vmem:[%s4435_s1 + $0x124] ss:$8 sps:$4 sm:$0xff]  }
   0xe   :  { %918 = vmatprep.mubr.bf16.mxu0 %v226_v24  ;;  %v236_v44 = vcombine.high %v226_v24, %v226_v24  ;;  %v3068_v49 = vld [vmem:[%s4435_s1 + $0x120] ss:$8 sps:$4 sm:$0xff]   ;;  %v3073_v50 = vld [vmem:[%s4435_s1 + $0x134] ss:$8 sps:$4 sm:$0xff]   ;;  %v3071_v51 = vld [vmem:[%s4435_s1 + $0x130] ss:$8 sps:$4 sm:$0xff]  }
   0xf   :  { %893 = vmatpush1.bf16.msra.mxu0 %v3024_v10  ;;  %v3076_v52 = vld [vmem:[%s4435_s1 + $0x144] ss:$8 sps:$4 sm:$0xff]   ;;  %v3074_v53 = vld [vmem:[%s4435_s1 + $0x140] ss:$8 sps:$4 sm:$0xff]   ;;  %v3079_v54 = vld [vmem:[%s4435_s1 + $0x154] ss:$8 sps:$4 sm:$0xff]  }
  0x10   :  { %894 = vmatprep.subr.bf16.mxu0 %v3025_v11  ;;  %v3077_v55 = vld [vmem:[%s4435_s1 + $0x150] ss:$8 sps:$4 sm:$0xff]   ;;  %v3082_v56 = vld [vmem:[%s4435_s1 + $0x164] ss:$8 sps:$4 sm:$0xff]   ;;  %v3080_v57 = vld [vmem:[%s4435_s1 + $0x160] ss:$8 sps:$4 sm:$0xff]  }
  0x11   :  { %v3085_v58 = vld [vmem:[%s4435_s1 + $0x174] ss:$8 sps:$4 sm:$0xff]   ;;  %v3083_v59 = vld [vmem:[%s4435_s1 + $0x170] ss:$8 sps:$4 sm:$0xff]   ;;  %v3088_v60 = vld [vmem:[%s4435_s1 + $0x184] ss:$8 sps:$4 sm:$0xff]  }
  0x12   :  { %v3086_v61 = vld [vmem:[%s4435_s1 + $0x180] ss:$8 sps:$4 sm:$0xff]   ;;  %v3091_v62 = vld [vmem:[%s4435_s1 + $0x194] ss:$8 sps:$4 sm:$0xff]   ;;  %v3089_v63 = vld [vmem:[%s4435_s1 + $0x190] ss:$8 sps:$4 sm:$0xff]  }
  0x13   :  { %895 = vmatpush1.bf16.msra.mxu0 %v3027_v14  ;;  %v3094_v0 = vld [vmem:[%s4435_s1 + $0x1a4] ss:$8 sps:$4 sm:$0xff]   ;;  %v3092_v1 = vld [vmem:[%s4435_s1 + $0x1a0] ss:$8 sps:$4 sm:$0xff]   ;;  %v3097_v2 = vld [vmem:[%s4435_s1 + $0x1b4] ss:$8 sps:$4 sm:$0xff]  }
  0x14   :  { %896 = vmatprep.subr.bf16.mxu0 %v3028_v15  ;;  %v3095_v3 = vld [vmem:[%s4435_s1 + $0x1b0] ss:$8 sps:$4 sm:$0xff]   ;;  %v3100_v4 = vld [vmem:[%s4435_s1 + $0x1c4] ss:$8 sps:$4 sm:$0xff]  }
  0x17   :  { %897 = vmatpush1.bf16.msra.mxu0 %v3030_v17 }
  0x18   :  { %898 = vmatprep.subr.bf16.mxu0 %v3031_v18 }
  0x1b   :  { %899 = vmatpush1.bf16.msra.mxu0 %v3033_v21 }
  0x1c   :  { %900 = vmatprep.subr.bf16.mxu0 %v3034_v22 }
  0x1f   :  { %901 = vmatpush1.bf16.msra.mxu0 %v3036_v25 }
  0x20   :  { %902 = vmatprep.subr.bf16.mxu0 %v3037_v26 }
  0x23   :  { %903 = vmatpush1.bf16.msra.mxu0 %v3039_v27 }
  0x24   :  { %904 = vmatprep.subr.bf16.mxu0 %v3040_v28 }
  0x27   :  { %905 = vmatpush1.bf16.msra.mxu0 %v3042_v29 }
  0x28   :  { %906 = vmatprep.subr.bf16.mxu0 %v3043_v30 }
  0x2b   :  { %907 = vmatpush1.bf16.msra.mxu0 %v3045_v31 }
  0x2c   :  { %908 = vmatprep.subr.bf16.mxu0 %v3046_v32 }
  0x2f   :  { %909 = vmatpush1.bf16.msra.mxu0 %v3048_v33 }
  0x30   :  { %910 = vmatprep.subr.bf16.mxu0 %v3049_v34 }
  0x33   :  { %911 = vmatpush1.bf16.msra.mxu0 %v3051_v35 }
  0x34   :  { %912 = vmatprep.subr.bf16.mxu0 %v3052_v36 }
  0x37   :  { %913 = vmatpush1.bf16.msra.mxu0 %v3054_v37 }
  0x38   :  { %914 = vmatprep.subr.bf16.mxu0 %v3055_v38 }
  0x3b   :  { %915 = vmatpush1.bf16.msra.mxu0 %v3057_v39 }
  0x3c   :  { %916 = vmatprep.subr.bf16.mxu0 %v3058_v40 }
  0x3f   :  { %917 = vmatpush1.bf16.msra.mxu0 %v3060_v41 }
  0x40   :  { %927 = vmatprep.subr.bf16.mxu0 %v3064_v42 }
  0x42   :  { %919 = vmatmul.mubr.bf16.vlgmr.msra.gmra.mrb[0].mxu0 %v3500_v43 }
  0x43   :  { %928 = vmatpush1.bf16.msra.mxu0 %v3062_v45  ;;  %959 = vmatprep.mubr.bf16.mxu0 %v236_v44 }
  0x44   :  { %929 = vmatprep.subr.bf16.mxu0 %v3067_v46 }
  0x47   :  { %930 = vmatpush1.bf16.msra.mxu0 %v3065_v47 }
  0x48   :  { %931 = vmatprep.subr.bf16.mxu0 %v3070_v48 }
  0x4b   :  { %932 = vmatpush1.bf16.msra.mxu0 %v3068_v49 }
  0x4c   :  { %933 = vmatprep.subr.bf16.mxu0 %v3073_v50 }
  0x4f   :  { %934 = vmatpush1.bf16.msra.mxu0 %v3071_v51 }
  0x50   :  { %935 = vmatprep.subr.bf16.mxu0 %v3076_v52 }
  0x53   :  { %936 = vmatpush1.bf16.msra.mxu0 %v3074_v53 }
  0x54   :  { %937 = vmatprep.subr.bf16.mxu0 %v3079_v54 }
  0x57   :  { %938 = vmatpush1.bf16.msra.mxu0 %v3077_v55 }
  0x58   :  { %939 = vmatprep.subr.bf16.mxu0 %v3082_v56 }
  0x5b   :  { %940 = vmatpush1.bf16.msra.mxu0 %v3080_v57 }
  0x5c   :  { %941 = vmatprep.subr.bf16.mxu0 %v3085_v58 }
  0x5f   :  { %942 = vmatpush1.bf16.msra.mxu0 %v3083_v59 }
  0x60   :  { %943 = vmatprep.subr.bf16.mxu0 %v3088_v60 }
  0x63   :  { %944 = vmatpush1.bf16.msra.mxu0 %v3086_v61 }
  0x64   :  { %945 = vmatprep.subr.bf16.mxu0 %v3091_v62 }
  0x67   :  { %946 = vmatpush1.bf16.msra.mxu0 %v3089_v63 }
  0x68   :  { %947 = vmatprep.subr.bf16.mxu0 %v3094_v0 }
  0x6b   :  { %948 = vmatpush1.bf16.msra.mxu0 %v3092_v1 }
  0x6c   :  { %949 = vmatprep.subr.bf16.mxu0 %v3097_v2 }
  0x6d   :  { %21 = vsyncpa [#allocation5], 0  ;;  %v3098_v5 = vld [vmem:[%s4435_s1 + $0x1c0] ss:$8 sps:$4 sm:$0xff]   ;;  %v3103_v6 = vld [vmem:[%s4435_s1 + $0x1d4] ss:$8 sps:$4 sm:$0xff]   ;;  %v189_v7 = vcombine.high %v3434_v19, %v3434_v19  ;;  %v234_v18 = vcombine.high %v3500_v43, %v3500_v43 }
  0x6e   :  { %v3101_v8 = vld [vmem:[%s4435_s1 + $0x1d0] ss:$8 sps:$4 sm:$0xff]   ;;  %v3106_v9 = vld [vmem:[%s4435_s1 + $0x1e4] ss:$8 sps:$4 sm:$0xff]   ;;  %v3104_v10 = vld [vmem:[%s4435_s1 + $0x1e0] ss:$8 sps:$4 sm:$0xff]  }
  0x6f   :  { %950 = vmatpush1.bf16.msra.mxu0 %v3095_v3  ;;  %v3593_v11 = vrot.slane %v189_v7, %v3423_v16  ;;  %v3109_v13 = vld [vmem:[%s4435_s1 + $0x1f4] ss:$8 sps:$4 sm:$0xff]   ;;  %v3107_v14 = vld [vmem:[%s4435_s1 + $0x1f0] ss:$8 sps:$4 sm:$0xff]   ;;  %v3112_v17 = vld [vmem:[%s4435_s1 + $0x204] ss:$8 sps:$4 sm:$0xff]  }
  0x70   :  { %951 = vmatprep.subr.bf16.mxu0 %v3100_v4  ;;  %v3110_v19 = vld [vmem:[%s4435_s1 + $0x200] ss:$8 sps:$4 sm:$0xff]   ;;  %v3115_v21 = vld [vmem:[%s4435_s1 + $0x214] ss:$8 sps:$4 sm:$0xff]   ;;  %v3113_v25 = vld [vmem:[%s4435_s1 + $0x210] ss:$8 sps:$4 sm:$0xff]  }
  0x71   :  { %v205_v15 = vcombine.high %v3593_v11, %v3593_v11  ;;  %v3206_v22 = vld [vmem:[%s4437_s3 + $0x40] sm:$0xff]   ;;  %v3208_v24 = vld [vmem:[%s4437_s3 + $0x48] sm:$0xff]   ;;  %v3210_v28 = vld [vmem:[%s4437_s3 + $0x50] sm:$0xff]   ;;  %v3746_v0 = vrot.slane %v3593_v11, %v3423_v16  ;;  %vm1508_vm0 = vcmask 1041408   ;;  %vm1404_vm1 = vcmask 812032   ;;  %s3311_s26 = smov [#allocation4]  }
  0x72   :  { %v3207_v23 = vld [vmem:[%s4437_s3] sm:$0xff]   ;;  %2951 = vmatprep.subr.bf16.mxu1 %v3206_v22  ;;  %v3209_v27 = vld [vmem:[%s4437_s3 + $0x8] sm:$0xff]   ;;  %v3121_v30 = vld [vmem:[%s4435_s1 + $0x234] ss:$8 sps:$4 sm:$0xff]   ;;  %vm1504_vm2 = vcmask 818176   ;;  %s2625_s27 = sshll.u32 %s3311_s26, 4  ;;  %s2626_s27 = int_to_ptr.vmem [resolvable:$true] %s2625_s27 }
  0x73   :  { %952 = vmatpush1.bf16.msra.mxu0 %v3098_v5  ;;  %v3612_v20 = vrot.slane %v205_v15, %v3423_v16  ;;  %v3118_v26 = vld [vmem:[%s4435_s1 + $0x224] ss:$8 sps:$4 sm:$0xff]   ;;  %2952 = vmatpush3.bf16.msra.mxu1 %v3207_v23  ;;  %v3116_v29 = vld [vmem:[%s4435_s1 + $0x220] ss:$8 sps:$4 sm:$0xff]   ;;  %v3211_v31 = vld [vmem:[%s4437_s3 + $0x10] sm:$0xff]  }
  0x74   :  { %953 = vmatprep.subr.bf16.mxu0 %v3103_v6  ;;  %2953 = vmatprep.subr.bf16.mxu1 %v3208_v24  ;;  %v3212_v32 = vld [vmem:[%s4437_s3 + $0x58] sm:$0xff]   ;;  %v3124_v34 = vld [vmem:[%s4435_s1 + $0x244] ss:$8 sps:$4 sm:$0xff]   ;;  %v3122_v37 = vld [vmem:[%s4435_s1 + $0x240] ss:$8 sps:$4 sm:$0xff]  }
  0x75   :  { %v3119_v33 = vld [vmem:[%s4435_s1 + $0x230] ss:$8 sps:$4 sm:$0xff]   ;;  %v3214_v36 = vld [vmem:[%s4437_s3 + $0x60] sm:$0xff]   ;;  %v3127_v38 = vld [vmem:[%s4435_s1 + $0x254] ss:$8 sps:$4 sm:$0xff]   ;;  %v237_v2 = vcombine.high %v3612_v20, %v3612_v20 }
  0x76   :  { %v3213_v35 = vld [vmem:[%s4437_s3 + $0x18] sm:$0xff]   ;;  %v3215_v39 = vld [vmem:[%s4437_s3 + $0x20] sm:$0xff]   ;;  %v3216_v40 = vld [vmem:[%s4437_s3 + $0x68] sm:$0xff]  }
  0x77   :  { %954 = vmatpush1.bf16.msra.mxu0 %v3101_v8  ;;  %2954 = vmatpush3.bf16.msra.mxu1 %v3209_v27  ;;  %v3125_v41 = vld [vmem:[%s4435_s1 + $0x250] ss:$8 sps:$4 sm:$0xff]   ;;  %v3130_v42 = vld [vmem:[%s4435_s1 + $0x264] ss:$8 sps:$4 sm:$0xff]   ;;  %v3128_v44 = vld [vmem:[%s4435_s1 + $0x260] ss:$8 sps:$4 sm:$0xff]  }
  0x78   :  { %955 = vmatprep.subr.bf16.mxu0 %v3106_v9  ;;  %2955 = vmatprep.subr.bf16.mxu1 %v3210_v28  ;;  %v3217_v43 = vld [vmem:[%s4437_s3 + $0x28] sm:$0xff]   ;;  %v3133_v45 = vld [vmem:[%s4435_s1 + $0x274] ss:$8 sps:$4 sm:$0xff]   ;;  %v3131_v46 = vld [vmem:[%s4435_s1 + $0x270] ss:$8 sps:$4 sm:$0xff]  }
  0x79   :  { %v3136_v47 = vld [vmem:[%s4435_s1 + $0x284] ss:$8 sps:$4 sm:$0xff]   ;;  %v3134_v48 = vld [vmem:[%s4435_s1 + $0x280] ss:$8 sps:$4 sm:$0xff]   ;;  %v3139_v49 = vld [vmem:[%s4435_s1 + $0x294] ss:$8 sps:$4 sm:$0xff]  }
  0x7a   :  { %v3137_v50 = vld [vmem:[%s4435_s1 + $0x290] ss:$8 sps:$4 sm:$0xff]   ;;  %v3142_v51 = vld [vmem:[%s4435_s1 + $0x2a4] ss:$8 sps:$4 sm:$0xff]   ;;  %v3140_v52 = vld [vmem:[%s4435_s1 + $0x2a0] ss:$8 sps:$4 sm:$0xff]  }
  0x7b   :  { %956 = vmatpush1.bf16.msra.mxu0 %v3104_v10  ;;  %2956 = vmatpush3.bf16.msra.mxu1 %v3211_v31  ;;  %v3145_v53 = vld [vmem:[%s4435_s1 + $0x2b4] ss:$8 sps:$4 sm:$0xff]   ;;  %v3143_v54 = vld [vmem:[%s4435_s1 + $0x2b0] ss:$8 sps:$4 sm:$0xff]   ;;  %v3148_v55 = vld [vmem:[%s4435_s1 + $0x2c4] ss:$8 sps:$4 sm:$0xff]  }
  0x7c   :  { %957 = vmatprep.subr.bf16.mxu0 %v3109_v13  ;;  %2957 = vmatprep.subr.bf16.mxu1 %v3212_v32  ;;  %v3146_v56 = vld [vmem:[%s4435_s1 + $0x2c0] ss:$8 sps:$4 sm:$0xff]   ;;  %v3151_v57 = vld [vmem:[%s4435_s1 + $0x2d4] ss:$8 sps:$4 sm:$0xff]   ;;  %v3149_v58 = vld [vmem:[%s4435_s1 + $0x2d0] ss:$8 sps:$4 sm:$0xff]  }
  0x7d   :  { %v3154_v59 = vld [vmem:[%s4435_s1 + $0x2e4] ss:$8 sps:$4 sm:$0xff]   ;;  %v3152_v60 = vld [vmem:[%s4435_s1 + $0x2e0] ss:$8 sps:$4 sm:$0xff]   ;;  %v3157_v61 = vld [vmem:[%s4435_s1 + $0x2f4] ss:$8 sps:$4 sm:$0xff]  }
  0x7e   :  { %v3155_v62 = vld [vmem:[%s4435_s1 + $0x2f0] ss:$8 sps:$4 sm:$0xff]   ;;  %v3160_v63 = vld [vmem:[%s4435_s1 + $0x304] ss:$8 sps:$4 sm:$0xff]   ;;  %v3158_v1 = vld [vmem:[%s4435_s1 + $0x300] ss:$8 sps:$4 sm:$0xff]  }
  0x7f   :  { %958 = vmatpush1.bf16.msra.mxu0 %v3107_v14  ;;  %2958 = vmatpush3.bf16.msra.mxu1 %v3213_v35  ;;  %v3163_v3 = vld [vmem:[%s4435_s1 + $0x314] ss:$8 sps:$4 sm:$0xff]   ;;  %v3161_v4 = vld [vmem:[%s4435_s1 + $0x310] ss:$8 sps:$4 sm:$0xff]   ;;  %v3166_v5 = vld [vmem:[%s4435_s1 + $0x324] ss:$8 sps:$4 sm:$0xff]   ;;  %v235_v35 = vcombine.high %v3746_v0, %v3746_v0 }
  0x80   :  { %968 = vmatprep.subr.bf16.mxu0 %v3112_v17  ;;  %2959 = vmatprep.subr.bf16.mxu1 %v3214_v36  ;;  %v3164_v6 = vld [vmem:[%s4435_s1 + $0x320] ss:$8 sps:$4 sm:$0xff]   ;;  %v3169_v7 = vld [vmem:[%s4435_s1 + $0x334] ss:$8 sps:$4 sm:$0xff]   ;;  %v3167_v8 = vld [vmem:[%s4435_s1 + $0x330] ss:$8 sps:$4 sm:$0xff]  }
  0x81   :  { %v3172_v9 = vld [vmem:[%s4435_s1 + $0x344] ss:$8 sps:$4 sm:$0xff]   ;;  %v3170_v10 = vld [vmem:[%s4435_s1 + $0x340] ss:$8 sps:$4 sm:$0xff]   ;;  %v3175_v11 = vld [vmem:[%s4435_s1 + $0x354] ss:$8 sps:$4 sm:$0xff]  }
  0x82   :  { %960 = vmatmul.mubr.bf16.vlgmr.msra.gmra.mrb[0].mxu0 %v234_v18  ;;  %v3173_v13 = vld [vmem:[%s4435_s1 + $0x350] ss:$8 sps:$4 sm:$0xff]   ;;  %v3178_v14 = vld [vmem:[%s4435_s1 + $0x364] ss:$8 sps:$4 sm:$0xff]   ;;  %v3176_v15 = vld [vmem:[%s4435_s1 + $0x360] ss:$8 sps:$4 sm:$0xff]  }
  0x83   :  { %969 = vmatpush1.bf16.msra.mxu0 %v3110_v19  ;;  %1000 = vmatprep.mubr.bf16.mxu0 %v3612_v20  ;;  %v3181_v17 = vld [vmem:[%s4435_s1 + $0x374] ss:$8 sps:$4 sm:$0xff]   ;;  %v3179_v18 = vld [vmem:[%s4435_s1 + $0x370] ss:$8 sps:$4 sm:$0xff]   ;;  %v3184_v19 = vld [vmem:[%s4435_s1 + $0x384] ss:$8 sps:$4 sm:$0xff]  }
  0x84   :  { %970 = vmatprep.subr.bf16.mxu0 %v3115_v21  ;;  %2960 = vmatpush3.bf16.msra.mxu1 %v3215_v39  ;;  %v3182_v20 = vld [vmem:[%s4435_s1 + $0x380] ss:$8 sps:$4 sm:$0xff]   ;;  %v3187_v21 = vld [vmem:[%s4435_s1 + $0x394] ss:$8 sps:$4 sm:$0xff]   ;;  %v3185_v22 = vld [vmem:[%s4435_s1 + $0x390] ss:$8 sps:$4 sm:$0xff]  }
  0x85   :  { %2961 = vmatprep.subr.bf16.mxu1 %v3216_v40  ;;  %v3190_v23 = vld [vmem:[%s4435_s1 + $0x3a4] ss:$8 sps:$4 sm:$0xff]   ;;  %v3188_v24 = vld [vmem:[%s4435_s1 + $0x3a0] ss:$8 sps:$4 sm:$0xff]   ;;  %v3218_v36 = vld [vmem:[%s4437_s3 + $0x70] sm:$0xff]  }
  0x86   :  { %v3196_v27 = vld [vmem:[%s4435_s1 + $0x3c4] ss:$8 sps:$4 sm:$0xff]   ;;  %v3194_v28 = vld [vmem:[%s4435_s1 + $0x3c0] ss:$8 sps:$4 sm:$0xff]   ;;  %v3221_v39 = vld [vmem:[%s4437_s3 + $0x38] sm:$0xff]  }
  0x87   :  { %971 = vmatpush1.bf16.msra.mxu0 %v3113_v25  ;;  %v3193_v25 = vld [vmem:[%s4435_s1 + $0x3b4] ss:$8 sps:$4 sm:$0xff]   ;;  %v3202_v31 = vld [vmem:[%s4435_s1 + $0x3e4] ss:$8 sps:$4 sm:$0xff]   ;;  %v3200_v32 = vld [vmem:[%s4435_s1 + $0x3e0] ss:$8 sps:$4 sm:$0xff]  }
  0x88   :  { %972 = vmatprep.subr.bf16.mxu0 %v3118_v26  ;;  %2962 = vmatpush3.bf16.msra.mxu1 %v3217_v43  ;;  %v3191_v26 = vld [vmem:[%s4435_s1 + $0x3b0] ss:$8 sps:$4 sm:$0xff]   ;;  %v3222_v40 = vld [vmem:[%s4439_s5 + $0x40] sm:$0xff]   ;;  %v3868_v43 = vsub.s32 1, %v3414_v12 }
  0x89   :  { %2963 = vmatprep.subr.bf16.mxu1 %v3218_v36 }
  0x8b   :  { %973 = vmatpush1.bf16.msra.mxu0 %v3116_v29  ;;  %v3199_v29 = vld [vmem:[%s4435_s1 + $0x3d4] ss:$8 sps:$4 sm:$0xff]  }
  0x8c   :  { %974 = vmatprep.subr.bf16.mxu0 %v3121_v30  ;;  %v3197_v30 = vld [vmem:[%s4435_s1 + $0x3d0] ss:$8 sps:$4 sm:$0xff]  }
  0x8f   :  { %975 = vmatpush1.bf16.msra.mxu0 %v3119_v33  ;;  %v3205_v33 = vld [vmem:[%s4435_s1 + $0x3f4] ss:$8 sps:$4 sm:$0xff]  }
  0x90   :  { %976 = vmatprep.subr.bf16.mxu0 %v3124_v34  ;;  %v3203_v34 = vld [vmem:[%s4435_s1 + $0x3f0] ss:$8 sps:$4 sm:$0xff]  }
  0x93   :  { %977 = vmatpush1.bf16.msra.mxu0 %v3122_v37  ;;  %v3219_v37 = vld [vmem:[%s4437_s3 + $0x30] sm:$0xff]  }
  0x94   :  { %978 = vmatprep.subr.bf16.mxu0 %v3127_v38  ;;  %2964 = vmatpush3.bf16.msra.mxu1 %v3219_v37  ;;  %v3220_v38 = vld [vmem:[%s4437_s3 + $0x78] sm:$0xff]  }
  0x95   :  { %2965 = vmatprep.subr.bf16.mxu1 %v3220_v38  ;;  %v1579_v38 = vld [vmem:[%s4444_s10 + $0x98] sm:$0xff] }
  0x97   :  { %979 = vmatpush1.bf16.msra.mxu0 %v3125_v41  ;;  %v3862_v41 = vsub.s32 0, %v3414_v12 }
  0x98   :  { %980 = vmatprep.subr.bf16.mxu0 %v3130_v42  ;;  %2966 = vmatpush3.bf16.msra.mxu1 %v3221_v39  ;;  %v176_v42 = vld [vmem:[%s4436_s2] sm:$0x3]  ;;  %v1583_v39 = vld [vmem:[%s4444_s10 + $0xb8] sm:$0xff] }
  0x99   :  { %2973 = vmatprep.subr.bf16.mxu1 %v3222_v40  ;;  %v2841_v40 = vcombine.low %v1579_v38, %v1583_v39 }
  0x9b   :  { %981 = vmatpush1.bf16.msra.mxu0 %v3128_v44  ;;  %v181_v44 = vrot.slane %v176_v42, %v3862_v41 }
  0x9c   :  { %982 = vmatprep.subr.bf16.mxu0 %v3133_v45  ;;  %v185_v45 = vrot.slane %v176_v42, %v3868_v43  ;;  %v2842_v42 = vcombine.high %v1579_v38, %v1583_v39 }
  0x9f   :  { %983 = vmatpush1.bf16.msra.mxu0 %v3131_v46 }
  0xa0   :  { %984 = vmatprep.subr.bf16.mxu0 %v3136_v47 }
  0xa3   :  { %985 = vmatpush1.bf16.msra.mxu0 %v3134_v48 }
  0xa4   :  { %986 = vmatprep.subr.bf16.mxu0 %v3139_v49 }
  0xa7   :  { %987 = vmatpush1.bf16.msra.mxu0 %v3137_v50 }
  0xa8   :  { %988 = vmatprep.subr.bf16.mxu0 %v3142_v51 }
  0xab   :  { %989 = vmatpush1.bf16.msra.mxu0 %v3140_v52 }
  0xac   :  { %990 = vmatprep.subr.bf16.mxu0 %v3145_v53 }
  0xaf   :  { %991 = vmatpush1.bf16.msra.mxu0 %v3143_v54 }
  0xb0   :  { %992 = vmatprep.subr.bf16.mxu0 %v3148_v55  ;;  %v3223_v55 = vld [vmem:[%s4439_s5] sm:$0xff]  }
  0xb3   :  { %993 = vmatpush1.bf16.msra.mxu0 %v3146_v56 }
  0xb4   :  { %994 = vmatprep.subr.bf16.mxu0 %v3151_v57  ;;  %v3224_v57 = vld [vmem:[%s4439_s5 + $0x48] sm:$0xff]  }
  0xb7   :  { %995 = vmatpush1.bf16.msra.mxu0 %v3149_v58  ;;  %v3225_v58 = vld [vmem:[%s4439_s5 + $0x8] sm:$0xff]  }
  0xb8   :  { %996 = vmatprep.subr.bf16.mxu0 %v3154_v59  ;;  %v3226_v59 = vld [vmem:[%s4439_s5 + $0x50] sm:$0xff]  }
  0xbb   :  { %997 = vmatpush1.bf16.msra.mxu0 %v3152_v60  ;;  %v3227_v60 = vld [vmem:[%s4439_s5 + $0x10] sm:$0xff]  }
  0xbc   :  { %998 = vmatprep.subr.bf16.mxu0 %v3157_v61  ;;  %v3228_v61 = vld [vmem:[%s4439_s5 + $0x58] sm:$0xff]  }
  0xbf   :  { %999 = vmatpush1.bf16.msra.mxu0 %v3155_v62  ;;  %v3229_v62 = vld [vmem:[%s4439_s5 + $0x18] sm:$0xff]  }
  0xc0   :  { %1009 = vmatprep.subr.bf16.mxu0 %v3160_v63  ;;  %v3230_v63 = vld [vmem:[%s4439_s5 + $0x60] sm:$0xff]  }
  0xc2   :  { %1001 = vmatmul.mubr.bf16.vlgmr.msra.gmra.mrb[0].mxu0 %v3746_v0  ;;  %v3231_v0 = vld [vmem:[%s4439_s5 + $0x20] sm:$0xff]  }
  0xc3   :  { %1010 = vmatpush1.bf16.msra.mxu0 %v3158_v1  ;;  %1041 = vmatprep.mubr.bf16.mxu0 %v237_v2  ;;  %v3232_v1 = vld [vmem:[%s4439_s5 + $0x68] sm:$0xff]  }
  0xc4   :  { %1011 = vmatprep.subr.bf16.mxu0 %v3163_v3  ;;  %v3233_v2 = vld [vmem:[%s4439_s5 + $0x28] sm:$0xff]   ;;  %v3234_v3 = vld [vmem:[%s4439_s5 + $0x70] sm:$0xff]  }
  0xc7   :  { %1012 = vmatpush1.bf16.msra.mxu0 %v3161_v4  ;;  %v3235_v4 = vld [vmem:[%s4439_s5 + $0x30] sm:$0xff]  }
  0xc8   :  { %1013 = vmatprep.subr.bf16.mxu0 %v3166_v5  ;;  %v3236_v5 = vld [vmem:[%s4439_s5 + $0x78] sm:$0xff]  }
  0xcb   :  { %1014 = vmatpush1.bf16.msra.mxu0 %v3164_v6  ;;  %v3237_v6 = vld [vmem:[%s4439_s5 + $0x38] sm:$0xff]  }
  0xcc   :  { %1015 = vmatprep.subr.bf16.mxu0 %v3169_v7  ;;  %v3238_v7 = vld [vmem:[%s4442_s8] ss:$8 sps:$4 sm:$0xff]  }
  0xcf   :  { %1016 = vmatpush1.bf16.msra.mxu0 %v3167_v8  ;;  %v3240_v8 = vld [vmem:[%s4442_s8 + $0x4] ss:$8 sps:$4 sm:$0xff]  }
  0xd0   :  { %1017 = vmatprep.subr.bf16.mxu0 %v3172_v9  ;;  %v3243_v9 = vld [vmem:[%s4442_s8 + $0x14] ss:$8 sps:$4 sm:$0xff]  }
  0xd3   :  { %1018 = vmatpush1.bf16.msra.mxu0 %v3170_v10  ;;  %v3241_v10 = vld [vmem:[%s4442_s8 + $0x10] ss:$8 sps:$4 sm:$0xff]  }
  0xd4   :  { %1019 = vmatprep.subr.bf16.mxu0 %v3175_v11  ;;  %v3246_v11 = vld [vmem:[%s4442_s8 + $0x24] ss:$8 sps:$4 sm:$0xff]  }
  0xd7   :  { %1020 = vmatpush1.bf16.msra.mxu0 %v3173_v13  ;;  %v3244_v13 = vld [vmem:[%s4442_s8 + $0x20] ss:$8 sps:$4 sm:$0xff]  }
  0xd8   :  { %1021 = vmatprep.subr.bf16.mxu0 %v3178_v14  ;;  %v3249_v14 = vld [vmem:[%s4442_s8 + $0x34] ss:$8 sps:$4 sm:$0xff]  }
  0xdb   :  { %1022 = vmatpush1.bf16.msra.mxu0 %v3176_v15  ;;  %v3247_v15 = vld [vmem:[%s4442_s8 + $0x30] ss:$8 sps:$4 sm:$0xff]  }
  0xdc   :  { %1023 = vmatprep.subr.bf16.mxu0 %v3181_v17  ;;  %v3252_v17 = vld [vmem:[%s4442_s8 + $0x44] ss:$8 sps:$4 sm:$0xff]  }
  0xdf   :  { %1024 = vmatpush1.bf16.msra.mxu0 %v3179_v18  ;;  %v3250_v18 = vld [vmem:[%s4442_s8 + $0x40] ss:$8 sps:$4 sm:$0xff]  }
  0xe0   :  { %1025 = vmatprep.subr.bf16.mxu0 %v3184_v19  ;;  %v3255_v19 = vld [vmem:[%s4442_s8 + $0x54] ss:$8 sps:$4 sm:$0xff]  }
  0xe3   :  { %1026 = vmatpush1.bf16.msra.mxu0 %v3182_v20  ;;  %v3309_v20 = vmov 0  }
  0xe4   :  { %1027 = vmatprep.subr.bf16.mxu0 %v3187_v21  ;;  %v1426_v21 = vld [vmem:[%s4442_s8 + $0x60] sm:$0x33] }
  0xe7   :  { %1028 = vmatpush1.bf16.msra.mxu0 %v3185_v22  ;;  %v3253_v22 = vld [vmem:[%s4442_s8 + $0x50] ss:$8 sps:$4 sm:$0xff]  }
  0xe8   :  { %1029 = vmatprep.subr.bf16.mxu0 %v3190_v23  ;;  %v2816_v23 = vcombine.high %v1426_v21, %v1426_v21 }
  0xeb   :  { %1030 = vmatpush1.bf16.msra.mxu0 %v3188_v24  ;;  %v2815_v24 = vcombine.low %v1426_v21, %v1426_v21 }
  0xec   :  { %1031 = vmatprep.subr.bf16.mxu0 %v3193_v25 }
  0xed   :  { %v1510_v25 = vsel %vm1508_vm0, %v2815_v24, 0 }
  0xef   :  { %1032 = vmatpush1.bf16.msra.mxu0 %v3191_v26  ;;  %v3959_v26 = vld [vmem:[%s4444_s10] sm:$0xff] }
  0xf0   :  { %1033 = vmatprep.subr.bf16.mxu0 %v3196_v27  ;;  %v3964_v27 = vld [vmem:[%s4444_s10 + $0x20] sm:$0xff] }
  0xf3   :  { %1034 = vmatpush1.bf16.msra.mxu0 %v3194_v28  ;;  %v2819_v28 = vcombine.low %v3959_v26, %v3964_v27 }
  0xf4   :  { %1035 = vmatprep.subr.bf16.mxu0 %v3199_v29  ;;  %v2820_v29 = vcombine.high %v3959_v26, %v3964_v27  ;;  %v1592_v26 = vld [vmem:[%s4444_s10 + $0x100] sm:$0xff] }
  0xf5   :  { %v1596_v27 = vld [vmem:[%s4444_s10 + $0x120] sm:$0xff] }
  0xf7   :  { %1036 = vmatpush1.bf16.msra.mxu0 %v3197_v30  ;;  %v1563_v30 = vld [vmem:[%s4444_s10 + $0x18] sm:$0xff] }
  0xf8   :  { %1037 = vmatprep.subr.bf16.mxu0 %v3202_v31  ;;  %v1567_v31 = vld [vmem:[%s4444_s10 + $0x38] sm:$0xff] }
  0xfb   :  { %1038 = vmatpush1.bf16.msra.mxu0 %v3200_v32  ;;  %v2825_v32 = vcombine.low %v1563_v30, %v1567_v31 }
  0xfc   :  { %1039 = vmatprep.subr.bf16.mxu0 %v3205_v33  ;;  %v2826_v33 = vcombine.high %v1563_v30, %v1567_v31  ;;  %v2769_v30 = vld [vmem:[%s4438_s4] ss:$0 sm:$0xff] }
  0xff   :  { %1040 = vmatpush1.bf16.msra.mxu0 %v3203_v34  ;;  %v1571_v34 = vld [vmem:[%s4444_s10 + $0x58] sm:$0xff] }
 0x100   :  { %2493 = vmatprep.subr.bf16.mxu0 %v2826_v33 }
 0x102   :  { %1042 = vmatmul.mubr.bf16.vlgmr.msra.gmra.mrb[0].mxu0 %v235_v35  ;;  %v1575_v35 = vld [vmem:[%s4444_s10 + $0x78] sm:$0xff] }
 0x103   :  { %2494 = vmatpush1.bf16.msra.mxu0 %v2825_v32  ;;  %v2833_v36 = vcombine.low %v1571_v34, %v1575_v35  ;;  %v2834_v37 = vcombine.high %v1571_v34, %v1575_v35 }
 0x105   :  { %2495 = vmatprep.subr.bf16.mxu0 %v2834_v37  ;;  %v2786_v37 = vld [vmem:[%s4440_s6] ss:$0 sm:$0xff] }
 0x107   :  { %2496 = vmatpush1.bf16.msra.mxu0 %v2833_v36 }
 0x108   :  { %2497 = vmatprep.subr.bf16.mxu0 %v2842_v42 }
 0x10b   :  { %2498 = vmatpush1.bf16.msra.mxu0 %v2841_v40 }
 0x1d5   :  { %v1043_v46 = vpop.f32.mrb[0].mxu0 }
 0x1d6   :  { %v2995_v47 = vadd.f32 %v1043_v46, %v181_v44  ;;  %v1045_v48 = vpop.f32.mrb[1].mxu0  ;;  %v1587_v44 = vld [vmem:[%s4444_s10 + $0xd8] sm:$0xff] }
 0x1d7   :  { %v2996_v49 = vadd.f32 %v1045_v48, %v185_v45  ;;  %v1047_v50 = vpop.f32.mrb[2].mxu0  ;;  %v1591_v45 = vld [vmem:[%s4444_s10 + $0xf8] sm:$0xff] }
 0x1d8   :  { %v1050_v51 = vmax.f32 %v2995_v47, 0.0  ;;  %v1048_v52 = vpop.f32.mrb[3].mxu0  ;;  %v2849_v46 = vcombine.low %v1587_v44, %v1591_v45  ;;  %v2850_v47 = vcombine.high %v1587_v44, %v1591_v45  ;;  %v1595_v48 = vld [vmem:[%s4444_s10 + $0x118] sm:$0xff] }
 0x1d9   :  { %v1051_v53 = vmax.f32 %v2996_v49, 0.0  ;;  %v1599_v49 = vld [vmem:[%s4444_s10 + $0x138] sm:$0xff] }
 0x1da   :  { %v1052_v56 = vpack.c.bf16 %v1050_v51, %v1050_v51  ;;  %2499 = vmatprep.subr.bf16.mxu0 %v2850_v47  ;;  %v2857_v50 = vcombine.low %v1595_v48, %v1599_v49  ;;  %v2858_v51 = vcombine.high %v1595_v48, %v1599_v49  ;;  %v1603_v52 = vld [vmem:[%s4444_s10 + $0x158] sm:$0xff]  ;;  %v1407_v47 = vld [vmem:[%s4441_s7] sm:$0x3] }
 0x1db   :  { %v1053_v54 = vpack.c.bf16 %v1051_v53, %v1051_v53  ;;  %2500 = vmatpush1.bf16.msra.mxu0 %v2849_v46  ;;  %v1607_v53 = vld [vmem:[%s4444_s10 + $0x178] sm:$0xff] }
 0x1dc   :  { %2501 = vmatprep.subr.bf16.mxu0 %v2858_v51  ;;  %v1572_v51 = vld [vmem:[%s4444_s10 + $0x60] sm:$0xff] }
 0x1dd   :  { %1221 = vmatprep.mubr.bf16.mxu1 %v1053_v54 }
 0x1de   :  { %1222 = vmatmul.mubr.bf16.vlgmr.msra.gmra.mrb[0].mxu1 %v1052_v56 }
 0x1df   :  { %2974 = vmatpush3.bf16.msra.mxu1 %v3223_v55  ;;  %1396 = vmatprep.mubr.bf16.mxu1 %v1053_v54  ;;  %v2865_v54 = vcombine.low %v1603_v52, %v1607_v53  ;;  %v2866_v55 = vcombine.high %v1603_v52, %v1607_v53 }
 0x1e0   :  { %2975 = vmatprep.subr.bf16.mxu1 %v3224_v57  ;;  %2502 = vmatpush1.bf16.msra.mxu0 %v2857_v50  ;;  %v1615_v57 = vld [vmem:[%s4444_s10 + $0x1b8] sm:$0xff]  ;;  %v1568_v50 = vld [vmem:[%s4444_s10 + $0x40] sm:$0xff] }
 0x1e1   :  { %2503 = vmatprep.subr.bf16.mxu0 %v2866_v55  ;;  %v1576_v55 = vld [vmem:[%s4444_s10 + $0x80] sm:$0xff] }
 0x1e3   :  { %2976 = vmatpush3.bf16.msra.mxu1 %v3225_v58 }
 0x1e4   :  { %2977 = vmatprep.subr.bf16.mxu1 %v3226_v59  ;;  %2504 = vmatpush1.bf16.msra.mxu0 %v2865_v54  ;;  %v2828_v54 = vcombine.high %v1568_v50, %v1572_v51 }
 0x1e7   :  { %2978 = vmatpush3.bf16.msra.mxu1 %v3227_v60  ;;  %v1619_v60 = vld [vmem:[%s4444_s10 + $0x1d8] sm:$0xff] }
 0x1e8   :  { %2979 = vmatprep.subr.bf16.mxu1 %v3228_v61  ;;  %v1623_v61 = vld [vmem:[%s4444_s10 + $0x1f8] sm:$0xff] }
 0x1eb   :  { %2980 = vmatpush3.bf16.msra.mxu1 %v3229_v62  ;;  %v2881_v62 = vcombine.low %v1619_v60, %v1623_v61 }
 0x1ec   :  { %2981 = vmatprep.subr.bf16.mxu1 %v3230_v63  ;;  %v2882_v63 = vcombine.high %v1619_v60, %v1623_v61  ;;  %v1588_v60 = vld [vmem:[%s4444_s10 + $0xe0] sm:$0xff] }
 0x1ef   :  { %2982 = vmatpush3.bf16.msra.mxu1 %v3231_v0  ;;  %v1627_v0 = vld [vmem:[%s4444_s10 + $0x218] sm:$0xff] }
 0x1f0   :  { %2983 = vmatprep.subr.bf16.mxu1 %v3232_v1  ;;  %v1631_v1 = vld [vmem:[%s4444_s10 + $0x238] sm:$0xff] }
 0x1f3   :  { %2984 = vmatpush3.bf16.msra.mxu1 %v3233_v2  ;;  %v2889_v2 = vcombine.low %v1627_v0, %v1631_v1 }
 0x1f4   :  { %2985 = vmatprep.subr.bf16.mxu1 %v3234_v3  ;;  %v2890_v3 = vcombine.high %v1627_v0, %v1631_v1  ;;  %v1600_v0 = vld [vmem:[%s4444_s10 + $0x140] sm:$0xff] }
 0x1f5   :  { %v1604_v1 = vld [vmem:[%s4444_s10 + $0x160] sm:$0xff] }
 0x1f7   :  { %2986 = vmatpush3.bf16.msra.mxu1 %v3235_v4  ;;  %v1635_v4 = vld [vmem:[%s4444_s10 + $0x258] sm:$0xff] }
 0x1f8   :  { %2987 = vmatprep.subr.bf16.mxu1 %v3236_v5  ;;  %v1639_v5 = vld [vmem:[%s4444_s10 + $0x278] sm:$0xff] }
 0x1fb   :  { %2988 = vmatpush3.bf16.msra.mxu1 %v3237_v6  ;;  %v2897_v6 = vcombine.low %v1635_v4, %v1639_v5 }
 0x1fc   :  { %1515 = vmatprep.subr.bf16.mxu1 %v3240_v8  ;;  %v1643_v8 = vld [vmem:[%s4444_s10 + $0x298] sm:$0xff] }
 0x1fe   :  { %1397 = vmatmul.mubr.bf16.vlgmr.msra.gmra.mrb[4].mxu1 %v1052_v56  ;;  %v1611_v56 = vld [vmem:[%s4444_s10 + $0x198] sm:$0xff] }
 0x1ff   :  { %1516 = vmatpush1.bf16.msra.mxu1 %v3238_v7  ;;  %1547 = vmatprep.mubr.bf16.mxu1 %v3309_v20  ;;  %v2873_v58 = vcombine.low %v1611_v56, %v1615_v57  ;;  %v2874_v59 = vcombine.high %v1611_v56, %v1615_v57  ;;  %v2898_v7 = vcombine.high %v1635_v4, %v1639_v5  ;;  %v1580_v56 = vld [vmem:[%s4444_s10 + $0xa0] sm:$0xff] }
 0x200   :  { %1517 = vmatprep.subr.bf16.mxu1 %v3243_v9  ;;  %v1647_v9 = vld [vmem:[%s4444_s10 + $0x2b8] sm:$0xff]  ;;  %v2827_v57 = vcombine.low %v1568_v50, %v1572_v51  ;;  %v2835_v61 = vcombine.low %v1576_v55, %v1580_v56  ;;  %v1608_v4 = vld [vmem:[%s4444_s10 + $0x180] sm:$0xff] }
 0x201   :  { %2505 = vmatprep.subr.bf16.mxu0 %v2874_v59  ;;  %v1584_v59 = vld [vmem:[%s4444_s10 + $0xc0] sm:$0xff] }
 0x202   :  { %2506 = vmatpush1.bf16.msra.mxu0 %v2873_v58  ;;  %v2836_v58 = vcombine.high %v1576_v55, %v1580_v56  ;;  %v1612_v5 = vld [vmem:[%s4444_s10 + $0x1a0] sm:$0xff]  ;;  %v1683_v55 = vld [vmem:[%s4444_s10 + $0x3d8] sm:$0xff] }
 0x203   :  { %1518 = vmatpush1.bf16.msra.mxu1 %v3241_v10  ;;  %2507 = vmatprep.subr.bf16.mxu0 %v2882_v63  ;;  %v2905_v10 = vcombine.low %v1643_v8, %v1647_v9  ;;  %v2852_v63 = vcombine.high %v1592_v26, %v1596_v27  ;;  %v1687_v56 = vld [vmem:[%s4444_s10 + $0x3f8] sm:$0xff] }
 0x204   :  { %1519 = vmatprep.subr.bf16.mxu1 %v3246_v11  ;;  %v2906_v11 = vcombine.high %v1643_v8, %v1647_v9  ;;  %v1616_v8 = vld [vmem:[%s4444_s10 + $0x1c0] sm:$0xff] }
 0x205   :  { %v1620_v9 = vld [vmem:[%s4444_s10 + $0x1e0] sm:$0xff] }
 0x206   :  { %2508 = vmatpush1.bf16.msra.mxu0 %v2881_v62  ;;  %v2844_v62 = vcombine.high %v1584_v59, %v1588_v60 }
 0x207   :  { %1520 = vmatpush1.bf16.msra.mxu1 %v3244_v13  ;;  %2509 = vmatprep.subr.bf16.mxu0 %v2890_v3  ;;  %v1651_v13 = vld [vmem:[%s4444_s10 + $0x2d8] sm:$0xff]  ;;  %v2860_v3 = vcombine.high %v1600_v0, %v1604_v1 }
 0x208   :  { %1521 = vmatprep.subr.bf16.mxu1 %v3249_v14  ;;  %v1655_v14 = vld [vmem:[%s4444_s10 + $0x2f8] sm:$0xff] }
 0x20a   :  { %2510 = vmatpush1.bf16.msra.mxu0 %v2889_v2  ;;  %v2851_v2 = vcombine.low %v1592_v26, %v1596_v27  ;;  %v1427_v27 = vld [vmem:[%s4443_s9] sm:$0x3] }
 0x20b   :  { %1522 = vmatpush1.bf16.msra.mxu1 %v3247_v15  ;;  %2511 = vmatprep.subr.bf16.mxu0 %v2898_v7  ;;  %v2913_v15 = vcombine.low %v1651_v13, %v1655_v14  ;;  %v2868_v7 = vcombine.high %v1608_v4, %v1612_v5 }
 0x20c   :  { %1523 = vmatprep.subr.bf16.mxu1 %v3252_v17  ;;  %v2914_v17 = vcombine.high %v1651_v13, %v1655_v14  ;;  %v1624_v13 = vld [vmem:[%s4444_s10 + $0x200] sm:$0xff] }
 0x20d   :  { %v1628_v14 = vld [vmem:[%s4444_s10 + $0x220] sm:$0xff] }
 0x20e   :  { %2512 = vmatpush1.bf16.msra.mxu0 %v2897_v6  ;;  %v2859_v6 = vcombine.low %v1600_v0, %v1604_v1 }
 0x20f   :  { %1524 = vmatpush1.bf16.msra.mxu1 %v3250_v18  ;;  %2513 = vmatprep.subr.bf16.mxu0 %v2906_v11  ;;  %v1659_v18 = vld [vmem:[%s4444_s10 + $0x318] sm:$0xff]  ;;  %v2876_v11 = vcombine.high %v1616_v8, %v1620_v9 }
 0x210   :  { %1525 = vmatprep.subr.bf16.mxu1 %v3255_v19  ;;  %v1663_v19 = vld [vmem:[%s4444_s10 + $0x338] sm:$0xff] }
 0x211   :  { %v2921_v20 = vcombine.low %v1659_v18, %v1663_v19  ;;  %v2922_v21 = vcombine.high %v1659_v18, %v1663_v19  ;;  %v1632_v18 = vld [vmem:[%s4444_s10 + $0x240] sm:$0xff] }
 0x212   :  { %2514 = vmatpush1.bf16.msra.mxu0 %v2905_v10  ;;  %v2867_v10 = vcombine.low %v1608_v4, %v1612_v5  ;;  %v1636_v19 = vld [vmem:[%s4444_s10 + $0x260] sm:$0xff] }
 0x213   :  { %1526 = vmatpush1.bf16.msra.mxu1 %v3253_v22  ;;  %2515 = vmatprep.subr.bf16.mxu0 %v2914_v17  ;;  %v1667_v22 = vld [vmem:[%s4444_s10 + $0x358] sm:$0xff]  ;;  %v2884_v17 = vcombine.high %v1624_v13, %v1628_v14 }
 0x214   :  { %2817 = vmatprep.subr.msk.bf16.mxu1 %vm1508_vm0, %v2816_v23  ;;  %v1671_v23 = vld [vmem:[%s4444_s10 + $0x378] sm:$0xff] }
 0x215   :  { %v2929_v24 = vcombine.low %v1667_v22, %v1671_v23 }
 0x216   :  { %2516 = vmatpush1.bf16.msra.mxu0 %v2913_v15  ;;  %v2875_v15 = vcombine.low %v1616_v8, %v1620_v9  ;;  %v1569_v8 = vld [vmem:[%s4444_s10 + $0x48] sm:$0xff] }
 0x217   :  { %1528 = vmatpush1.bf16.msra.mxu1 %v1510_v25  ;;  %2517 = vmatprep.subr.bf16.mxu0 %v2922_v21  ;;  %v2930_v25 = vcombine.high %v1667_v22, %v1671_v23  ;;  %v2892_v21 = vcombine.high %v1632_v18, %v1636_v19  ;;  %v1640_v22 = vld [vmem:[%s4444_s10 + $0x280] sm:$0xff]  ;;  %v1573_v9 = vld [vmem:[%s4444_s10 + $0x68] sm:$0xff] }
 0x218   :  { %2370 = vmatprep.subr.bf16.mxu1 %v2820_v29  ;;  %v1644_v23 = vld [vmem:[%s4444_s10 + $0x2a0] sm:$0xff] }
 0x21a   :  { %2518 = vmatpush1.bf16.msra.mxu0 %v2921_v20  ;;  %v2883_v20 = vcombine.low %v1624_v13, %v1628_v14  ;;  %v2830_v13 = vcombine.high %v1569_v8, %v1573_v9  ;;  %v1577_v14 = vld [vmem:[%s4444_s10 + $0x88] sm:$0xff] }
 0x21b   :  { %2519 = vmatprep.subr.bf16.mxu0 %v2930_v25  ;;  %v2900_v25 = vcombine.high %v1640_v22, %v1644_v23 }
 0x21e   :  { %2520 = vmatpush1.bf16.msra.mxu0 %v2929_v24  ;;  %v2891_v24 = vcombine.low %v1632_v18, %v1636_v19  ;;  %v1585_v19 = vld [vmem:[%s4444_s10 + $0xc8] sm:$0xff] }
 0x2b1   :  { %v2967_v29 = vpop.f32.mrb[0].mxu1 }
 0x2b2   :  { %v2968_v31 = vpop.f32.mrb[1].mxu1 }
 0x2b3   :  { %v2969_v32 = vadd.f32 %v2968_v31, %v2967_v29  ;;  %v2970_v33 = vpop.f32.mrb[2].mxu1  ;;  %v1648_v29 = vld [vmem:[%s4444_s10 + $0x2c0] sm:$0xff]  ;;  %v2899_v31 = vcombine.low %v1640_v22, %v1644_v23  ;;  %v1593_v23 = vld [vmem:[%s4444_s10 + $0x108] sm:$0xff] }
 0x2b4   :  { %v2971_v34 = vpop.f32.mrb[3].mxu1  ;;  %v1656_v33 = vld [vmem:[%s4444_s10 + $0x300] sm:$0xff] }
 0x2b5   :  { %v1224_v35 = vadd.f32 %v2969_v32, %v2769_v30  ;;  %v1652_v30 = vld [vmem:[%s4444_s10 + $0x2e0] sm:$0xff] }
 0x2b6   :  { %v2908_v32 = vcombine.high %v1648_v29, %v1652_v30  ;;  %v1660_v34 = vld [vmem:[%s4444_s10 + $0x320] sm:$0xff] }
 0x2b7   :  { %1405 = vst.msk [vmem:[#allocation2] sm:$0x3] %vm1404_vm1, %v1224_v35 }
 0x2d1   :  { %v2989_v36 = vpop.f32.mrb[4].mxu1 }
 0x2d2   :  { %v2990_v38 = vpop.f32.mrb[5].mxu1 }
 0x2d3   :  { %v2991_v39 = vadd.f32 %v2990_v38, %v2989_v36  ;;  %v2992_v40 = vpop.f32.mrb[6].mxu1  ;;  %v2916_v36 = vcombine.high %v1656_v33, %v1660_v34  ;;  %v1668_v38 = vld [vmem:[%s4444_s10 + $0x360] sm:$0xff] }
 0x2d4   :  { %v2993_v42 = vpop.f32.mrb[7].mxu1 }
 0x2d5   :  { %v1399_v44 = vadd.f32 %v2991_v39, %v2786_v37  ;;  %v1664_v37 = vld [vmem:[%s4444_s10 + $0x340] sm:$0xff]  ;;  %v2915_v39 = vcombine.low %v1656_v33, %v1660_v34  ;;  %v1609_v34 = vld [vmem:[%s4444_s10 + $0x188] sm:$0xff] }
 0x2d6   :  { %v2924_v40 = vcombine.high %v1664_v37, %v1668_v38  ;;  %v2923_v42 = vcombine.low %v1664_v37, %v1668_v38  ;;  %v1617_v38 = vld [vmem:[%s4444_s10 + $0x1c8] sm:$0xff] }
 0x2d7   :  { %v1408_v45 = vmul.f32 0.5, %v1399_v44  ;;  %1406 = vst.msk [vmem:[#allocation4] sm:$0x3] %vm1404_vm1, %v1399_v44  ;;  %v1672_v44 = vld [vmem:[%s4444_s10 + $0x380] sm:$0xff] }
 0x2d9   :  { %v1409_v46 = vmul.f32 1.442695, %v1408_v45  ;;  %v1676_v45 = vld [vmem:[%s4444_s10 + $0x3a0] sm:$0xff] }
 0x2db   :  { %3258 = vpow2.f32 %v1409_v46  ;;  %v2932_v46 = vcombine.high %v1672_v44, %v1676_v45 }
 0x2e5   :  { %v3259_v48 = vpop.eup %3258 }
 0x2e6   :  { %v1411_v49 = vmul.f32 %v3259_v48, %v1407_v47  ;;  %v1675_v47 = vld [vmem:[%s4444_s10 + $0x398] sm:$0xff] }
 0x2e7   :  { %v1679_v48 = vld [vmem:[%s4444_s10 + $0x3b8] sm:$0xff] }
 0x2e8   :  { %v1412_v52 = vadd.f32 %v1411_v49, %v1224_v35  ;;  %v2907_v35 = vcombine.low %v1648_v29, %v1652_v30  ;;  %v2931_v49 = vcombine.low %v1672_v44, %v1676_v45  ;;  %v2938_v50 = vcombine.high %v1675_v47, %v1679_v48  ;;  %v1601_v30 = vld [vmem:[%s4444_s10 + $0x148] sm:$0xff] }
 0x2e9   :  { %v2937_v51 = vcombine.low %v1675_v47, %v1679_v48  ;;  %v1625_v44 = vld [vmem:[%s4444_s10 + $0x208] sm:$0xff] }
 0x2ea   :  { %v1413_v53 = vpack.c.bf16 %v1412_v52, %v1412_v52  ;;  %2521 = vmatprep.subr.bf16.mxu0 %v2938_v50  ;;  %v1680_v52 = vld [vmem:[%s4444_s10 + $0x3c0] sm:$0xff]  ;;  %v1629_v45 = vld [vmem:[%s4444_s10 + $0x228] sm:$0xff] }
 0x2eb   :  { %2522 = vmatpush1.bf16.msra.mxu0 %v2937_v51  ;;  %v2886_v47 = vcombine.high %v1625_v44, %v1629_v45  ;;  %v1633_v48 = vld [vmem:[%s4444_s10 + $0x248] sm:$0xff]  ;;  %v2885_v50 = vcombine.low %v1625_v44, %v1629_v45  ;;  %v1618_v45 = vld [vmem:[%s4444_s10 + $0x1d0] sm:$0xff] }
 0x2ec   :  { %2818 = vmatmul.mubr.msk.bf16.vlgmr.msra.gmra.mrb[8].mxu1 %vm1504_vm2, %v1413_v53  ;;  %v1684_v53 = vld [vmem:[%s4444_s10 + $0x3e0] sm:$0xff] }
 0x2ed   :  { %2371 = vmatpush1.bf16.msra.mxu1 %v2819_v28  ;;  %v2843_v28 = vcombine.low %v1584_v59, %v1588_v60  ;;  %v2945_v59 = vcombine.low %v1683_v55, %v1687_v56  ;;  %v1561_v60 = vld [vmem:[%s4444_s10 + $0x8] sm:$0xff] }
 0x2ee   :  { %2372 = vmatprep.subr.bf16.mxu1 %v2828_v54  ;;  %v2940_v54 = vcombine.high %v1680_v52, %v1684_v53 }
 0x2f1   :  { %2373 = vmatpush1.bf16.msra.mxu1 %v2827_v57  ;;  %v2939_v57 = vcombine.low %v1680_v52, %v1684_v53  ;;  %v1641_v52 = vld [vmem:[%s4444_s10 + $0x288] sm:$0xff] }
 0x2f2   :  { %2374 = vmatprep.subr.bf16.mxu1 %v2836_v58  ;;  %v2946_v58 = vcombine.high %v1683_v55, %v1687_v56  ;;  %v1645_v53 = vld [vmem:[%s4444_s10 + $0x2a8] sm:$0xff] }
 0x2f3   :  { %v2902_v55 = vcombine.high %v1641_v52, %v1645_v53  ;;  %v1649_v56 = vld [vmem:[%s4444_s10 + $0x2c8] sm:$0xff] }
 0x2f4   :  { %2523 = vmatprep.subr.bf16.mxu0 %v2946_v58  ;;  %v2901_v58 = vcombine.low %v1641_v52, %v1645_v53  ;;  %v1634_v53 = vld [vmem:[%s4444_s10 + $0x250] sm:$0xff] }
 0x2f5   :  { %2375 = vmatpush1.bf16.msra.mxu1 %v2835_v61  ;;  %v1565_v61 = vld [vmem:[%s4444_s10 + $0x28] sm:$0xff]  ;;  %2524 = vmatpush1.bf16.msra.mxu0 %v2945_v59 }
 0x2f6   :  { %2376 = vmatprep.subr.bf16.mxu1 %v2844_v62  ;;  %v2822_v62 = vcombine.high %v1561_v60, %v1565_v61  ;;  %v2821_v26 = vcombine.low %v1561_v60, %v1565_v61  ;;  %v1657_v60 = vld [vmem:[%s4444_s10 + $0x308] sm:$0xff] }
 0x2f7   :  { %v1661_v61 = vld [vmem:[%s4444_s10 + $0x328] sm:$0xff] }
 0x2f9   :  { %2377 = vmatpush1.bf16.msra.mxu1 %v2843_v28  ;;  %v1432_v28 = vrot.slane %v1427_v27, %v3862_v41 }
 0x2fa   :  { %2378 = vmatprep.subr.bf16.mxu1 %v2852_v63  ;;  %v1436_v63 = vrot.slane %v1427_v27, %v3868_v43  ;;  %v1665_v27 = vld [vmem:[%s4444_s10 + $0x348] sm:$0xff] }
 0x2fd   :  { %2379 = vmatpush1.bf16.msra.mxu1 %v2851_v2 }
 0x2fe   :  { %2380 = vmatprep.subr.bf16.mxu1 %v2860_v3 }
 0x301   :  { %2381 = vmatpush1.bf16.msra.mxu1 %v2859_v6 }
 0x302   :  { %2382 = vmatprep.subr.bf16.mxu1 %v2868_v7 }
 0x305   :  { %2383 = vmatpush1.bf16.msra.mxu1 %v2867_v10 }
 0x306   :  { %2384 = vmatprep.subr.bf16.mxu1 %v2876_v11 }
 0x309   :  { %2385 = vmatpush1.bf16.msra.mxu1 %v2875_v15  ;;  %v1581_v15 = vld [vmem:[%s4444_s10 + $0xa8] sm:$0xff] }
 0x30a   :  { %2386 = vmatprep.subr.bf16.mxu1 %v2884_v17  ;;  %v2829_v17 = vcombine.low %v1569_v8, %v1573_v9  ;;  %v2838_v18 = vcombine.high %v1577_v14, %v1581_v15  ;;  %v1562_v9 = vld [vmem:[%s4444_s10 + $0x10] sm:$0xff] }
 0x30d   :  { %2387 = vmatpush1.bf16.msra.mxu1 %v2883_v20  ;;  %v1589_v20 = vld [vmem:[%s4444_s10 + $0xe8] sm:$0xff] }
 0x30e   :  { %2388 = vmatprep.subr.bf16.mxu1 %v2892_v21  ;;  %v2837_v21 = vcombine.low %v1577_v14, %v1581_v15  ;;  %v2846_v22 = vcombine.high %v1585_v19, %v1589_v20 }
 0x311   :  { %2389 = vmatpush1.bf16.msra.mxu1 %v2891_v24  ;;  %v1597_v24 = vld [vmem:[%s4444_s10 + $0x128] sm:$0xff] }
 0x312   :  { %2390 = vmatprep.subr.bf16.mxu1 %v2900_v25  ;;  %v2845_v25 = vcombine.low %v1585_v19, %v1589_v20  ;;  %v2854_v29 = vcombine.high %v1593_v23, %v1597_v24 }
 0x315   :  { %2391 = vmatpush1.bf16.msra.mxu1 %v2899_v31  ;;  %v1605_v31 = vld [vmem:[%s4444_s10 + $0x168] sm:$0xff] }
 0x316   :  { %2392 = vmatprep.subr.bf16.mxu1 %v2908_v32  ;;  %v2853_v32 = vcombine.low %v1593_v23, %v1597_v24  ;;  %v2862_v33 = vcombine.high %v1601_v30, %v1605_v31 }
 0x319   :  { %2393 = vmatpush1.bf16.msra.mxu1 %v2907_v35  ;;  %v1613_v35 = vld [vmem:[%s4444_s10 + $0x1a8] sm:$0xff] }
 0x31a   :  { %2394 = vmatprep.subr.bf16.mxu1 %v2916_v36  ;;  %v2861_v36 = vcombine.low %v1601_v30, %v1605_v31  ;;  %v2870_v37 = vcombine.high %v1609_v34, %v1613_v35 }
 0x31d   :  { %2395 = vmatpush1.bf16.msra.mxu1 %v2915_v39  ;;  %v1621_v39 = vld [vmem:[%s4444_s10 + $0x1e8] sm:$0xff] }
 0x31e   :  { %2396 = vmatprep.subr.bf16.mxu1 %v2924_v40  ;;  %v2869_v40 = vcombine.low %v1609_v34, %v1613_v35  ;;  %v1602_v35 = vld [vmem:[%s4444_s10 + $0x150] sm:$0xff] }
 0x321   :  { %2397 = vmatpush1.bf16.msra.mxu1 %v2923_v42  ;;  %v2878_v42 = vcombine.high %v1617_v38, %v1621_v39 }
 0x322   :  { %2398 = vmatprep.subr.bf16.mxu1 %v2932_v46  ;;  %v2877_v46 = vcombine.low %v1617_v38, %v1621_v39  ;;  %v1610_v39 = vld [vmem:[%s4444_s10 + $0x190] sm:$0xff] }
 0x325   :  { %2399 = vmatpush1.bf16.msra.mxu1 %v2931_v49  ;;  %v1637_v49 = vld [vmem:[%s4444_s10 + $0x268] sm:$0xff] }
 0x326   :  { %2400 = vmatprep.subr.bf16.mxu1 %v2940_v54  ;;  %v2894_v51 = vcombine.high %v1633_v48, %v1637_v49  ;;  %v2893_v54 = vcombine.low %v1633_v48, %v1637_v49  ;;  %v1626_v49 = vld [vmem:[%s4444_s10 + $0x210] sm:$0xff] }
 0x329   :  { %2401 = vmatpush1.bf16.msra.mxu1 %v2939_v57  ;;  %v1653_v57 = vld [vmem:[%s4444_s10 + $0x2e8] sm:$0xff] }
 0x32a   :  { %2411 = vmatprep.subr.bf16.mxu1 %v2822_v62  ;;  %v2910_v59 = vcombine.high %v1649_v56, %v1653_v57  ;;  %v2909_v62 = vcombine.low %v1649_v56, %v1653_v57  ;;  %v1642_v57 = vld [vmem:[%s4444_s10 + $0x290] sm:$0xff] }
 0x3bf   :  { %v1549_v0 = vpop.f32.mrb[8].mxu1 }
 0x3c0   :  { %v1550_v1 = vadd.f32 %v1549_v0, %v1432_v28  ;;  %v1551_v2 = vpop.f32.mrb[9].mxu1  ;;  %v1669_v28 = vld [vmem:[%s4444_s10 + $0x368] sm:$0xff] }
 0x3c1   :  { %v1552_v3 = vadd.f32 %v1551_v2, %v1436_v63  ;;  %v1553_v4 = vpop.f32.mrb[10].mxu1  ;;  %v2917_v63 = vcombine.low %v1657_v60, %v1661_v61  ;;  %v2926_v0 = vcombine.high %v1665_v27, %v1669_v28  ;;  %v1677_v2 = vld [vmem:[%s4444_s10 + $0x3a8] sm:$0xff] }
 0x3c2   :  { %v1556_v5 = vmax.f32 %v1550_v1, 0.0  ;;  %v1554_v6 = vpop.f32.mrb[11].mxu1  ;;  %v1673_v1 = vld [vmem:[%s4444_s10 + $0x388] sm:$0xff] }
 0x3c3   :  { %v1557_v7 = vmax.f32 %v1552_v3, 0.0  ;;  %v2925_v3 = vcombine.low %v1665_v27, %v1669_v28  ;;  %v2934_v4 = vcombine.high %v1673_v1, %v1677_v2  ;;  %v1685_v6 = vld [vmem:[%s4444_s10 + $0x3e8] sm:$0xff]  ;;  %v1658_v28 = vld [vmem:[%s4444_s10 + $0x310] sm:$0xff] }
 0x3c4   :  { %v4187_v11 = vpack.c.bf16 %v1556_v5, %v1556_v5  ;;  %v1681_v5 = vld [vmem:[%s4444_s10 + $0x3c8] sm:$0xff] }
 0x3c5   :  { %v4185_v10 = vpack.c.bf16 %v1557_v7, %v1557_v7  ;;  %v2933_v7 = vcombine.low %v1673_v1, %v1677_v2  ;;  %v2942_v8 = vcombine.high %v1681_v5, %v1685_v6  ;;  %v2941_v14 = vcombine.low %v1681_v5, %v1685_v6  ;;  %v1666_v2 = vld [vmem:[%s4444_s10 + $0x350] sm:$0xff] }
 0x3c6   :  { %v1674_v6 = vld [vmem:[%s4444_s10 + $0x390] sm:$0xff] }
 0x3c7   :  { %2402 = vmatprep.mubr.bf16.mxu1 %v4185_v10  ;;  %2525 = vmatprep.mubr.bf16.mxu0 %v4185_v10 }
 0x3c8   :  { %2403 = vmatmul.mubr.bf16.vlgmr.msra.gmra.mrb[12].mxu1 %v4187_v11  ;;  %2526 = vmatmul.mubr.bf16.vlgmr.msra.gmra.mrb[4].mxu0 %v4187_v11 }
 0x3c9   :  { %2412 = vmatpush1.bf16.msra.mxu1 %v2821_v26  ;;  %2443 = vmatprep.mubr.bf16.mxu1 %v4185_v10  ;;  %v2918_v26 = vcombine.high %v1657_v60, %v1661_v61  ;;  %v1650_v61 = vld [vmem:[%s4444_s10 + $0x2d0] sm:$0xff] }
 0x3ca   :  { %2413 = vmatprep.subr.bf16.mxu1 %v2830_v13  ;;  %v1566_v13 = vld [vmem:[%s4444_s10 + $0x30] sm:$0xff] }
 0x3cb   :  { %v2824_v15 = vcombine.high %v1562_v9, %v1566_v13  ;;  %v2823_v19 = vcombine.low %v1562_v9, %v1566_v13  ;;  %v1682_v13 = vld [vmem:[%s4444_s10 + $0x3d0] sm:$0xff] }
 0x3cd   :  { %2414 = vmatpush1.bf16.msra.mxu1 %v2829_v17  ;;  %v1570_v17 = vld [vmem:[%s4444_s10 + $0x50] sm:$0xff] }
 0x3ce   :  { %2415 = vmatprep.subr.bf16.mxu1 %v2838_v18  ;;  %v1574_v18 = vld [vmem:[%s4444_s10 + $0x70] sm:$0xff] }
 0x3cf   :  { %v2832_v20 = vcombine.high %v1570_v17, %v1574_v18  ;;  %v2831_v23 = vcombine.low %v1570_v17, %v1574_v18 }
 0x3d1   :  { %2416 = vmatpush1.bf16.msra.mxu1 %v2837_v21  ;;  %v1578_v21 = vld [vmem:[%s4444_s10 + $0x90] sm:$0xff] }
 0x3d2   :  { %2417 = vmatprep.subr.bf16.mxu1 %v2846_v22  ;;  %v1582_v22 = vld [vmem:[%s4444_s10 + $0xb0] sm:$0xff] }
 0x3d3   :  { %v2840_v24 = vcombine.high %v1578_v21, %v1582_v22  ;;  %v2839_v30 = vcombine.low %v1578_v21, %v1582_v22  ;;  %v1720_v21 = vsub.s32 7, %v3414_v12 }
 0x3d5   :  { %2418 = vmatpush1.bf16.msra.mxu1 %v2845_v25  ;;  %v1586_v25 = vld [vmem:[%s4444_s10 + $0xd0] sm:$0xff] }
 0x3d6   :  { %2419 = vmatprep.subr.bf16.mxu1 %v2854_v29  ;;  %v1590_v29 = vld [vmem:[%s4444_s10 + $0xf0] sm:$0xff] }
 0x3d7   :  { %v2848_v31 = vcombine.high %v1586_v25, %v1590_v29 }
 0x3d9   :  { %2420 = vmatpush1.bf16.msra.mxu1 %v2853_v32  ;;  %v1594_v32 = vld [vmem:[%s4444_s10 + $0x110] sm:$0xff] }
 0x3da   :  { %2421 = vmatprep.subr.bf16.mxu1 %v2862_v33  ;;  %v2847_v33 = vcombine.low %v1586_v25, %v1590_v29 }
 0x3dd   :  { %2422 = vmatpush1.bf16.msra.mxu1 %v2861_v36  ;;  %v1606_v36 = vld [vmem:[%s4444_s10 + $0x170] sm:$0xff] }
 0x3de   :  { %2423 = vmatprep.subr.bf16.mxu1 %v2870_v37  ;;  %v2864_v38 = vcombine.high %v1602_v35, %v1606_v36 }
 0x3e1   :  { %2424 = vmatpush1.bf16.msra.mxu1 %v2869_v40  ;;  %v1614_v40 = vld [vmem:[%s4444_s10 + $0x1b0] sm:$0xff] }
 0x3e2   :  { %2425 = vmatprep.subr.bf16.mxu1 %v2878_v42  ;;  %v2863_v42 = vcombine.low %v1602_v35, %v1606_v36  ;;  %v2872_v44 = vcombine.high %v1610_v39, %v1614_v40 }
 0x3e5   :  { %2426 = vmatpush1.bf16.msra.mxu1 %v2877_v46  ;;  %v1622_v46 = vld [vmem:[%s4444_s10 + $0x1f0] sm:$0xff] }
 0x3e6   :  { %2427 = vmatprep.subr.bf16.mxu1 %v2886_v47  ;;  %v2871_v47 = vcombine.low %v1610_v39, %v1614_v40  ;;  %v2880_v48 = vcombine.high %v1618_v45, %v1622_v46 }
 0x3e9   :  { %2428 = vmatpush1.bf16.msra.mxu1 %v2885_v50  ;;  %v1630_v50 = vld [vmem:[%s4444_s10 + $0x230] sm:$0xff] }
 0x3ea   :  { %2429 = vmatprep.subr.bf16.mxu1 %v2894_v51  ;;  %v2879_v51 = vcombine.low %v1618_v45, %v1622_v46  ;;  %v2888_v52 = vcombine.high %v1626_v49, %v1630_v50 }
 0x3ed   :  { %2430 = vmatpush1.bf16.msra.mxu1 %v2893_v54  ;;  %v1638_v54 = vld [vmem:[%s4444_s10 + $0x270] sm:$0xff] }
 0x3ee   :  { %2431 = vmatprep.subr.bf16.mxu1 %v2902_v55  ;;  %v2887_v55 = vcombine.low %v1626_v49, %v1630_v50  ;;  %v2896_v56 = vcombine.high %v1634_v53, %v1638_v54 }
 0x3f1   :  { %2432 = vmatpush1.bf16.msra.mxu1 %v2901_v58  ;;  %v1646_v58 = vld [vmem:[%s4444_s10 + $0x2b0] sm:$0xff] }
 0x3f2   :  { %2433 = vmatprep.subr.bf16.mxu1 %v2910_v59  ;;  %v2895_v59 = vcombine.low %v1634_v53, %v1638_v54  ;;  %v2904_v60 = vcombine.high %v1642_v57, %v1646_v58 }
 0x3f5   :  { %2434 = vmatpush1.bf16.msra.mxu1 %v2909_v62  ;;  %v1654_v62 = vld [vmem:[%s4444_s10 + $0x2f0] sm:$0xff] }
 0x3f6   :  { %2435 = vmatprep.subr.bf16.mxu1 %v2918_v26  ;;  %v2903_v26 = vcombine.low %v1642_v57, %v1646_v58  ;;  %v2912_v27 = vcombine.high %v1650_v61, %v1654_v62 }
 0x3f9   :  { %2436 = vmatpush1.bf16.msra.mxu1 %v2917_v63  ;;  %v1662_v63 = vld [vmem:[%s4444_s10 + $0x330] sm:$0xff] }
 0x3fa   :  { %2437 = vmatprep.subr.bf16.mxu1 %v2926_v0  ;;  %v2911_v0 = vcombine.low %v1650_v61, %v1654_v62  ;;  %v2920_v1 = vcombine.high %v1658_v28, %v1662_v63 }
 0x3fd   :  { %2438 = vmatpush1.bf16.msra.mxu1 %v2925_v3  ;;  %v1670_v3 = vld [vmem:[%s4444_s10 + $0x370] sm:$0xff] }
 0x3fe   :  { %2439 = vmatprep.subr.bf16.mxu1 %v2934_v4  ;;  %v2919_v4 = vcombine.low %v1658_v28, %v1662_v63  ;;  %v2928_v5 = vcombine.high %v1666_v2, %v1670_v3 }
 0x401   :  { %2440 = vmatpush1.bf16.msra.mxu1 %v2933_v7  ;;  %v1678_v7 = vld [vmem:[%s4444_s10 + $0x3b0] sm:$0xff] }
 0x402   :  { %2441 = vmatprep.subr.bf16.mxu1 %v2942_v8  ;;  %v2927_v8 = vcombine.low %v1666_v2, %v1670_v3  ;;  %v2936_v9 = vcombine.high %v1674_v6, %v1678_v7 }
 0x405   :  { %2442 = vmatpush1.bf16.msra.mxu1 %v2941_v14  ;;  %v1686_v14 = vld [vmem:[%s4444_s10 + $0x3f0] sm:$0xff] }
 0x406   :  { %2452 = vmatprep.subr.bf16.mxu1 %v2824_v15  ;;  %v2935_v15 = vcombine.low %v1674_v6, %v1678_v7  ;;  %v2944_v17 = vcombine.high %v1682_v13, %v1686_v14  ;;  %v2943_v18 = vcombine.low %v1682_v13, %v1686_v14 }
 0x408   :  { %2444 = vmatmul.mubr.bf16.vlgmr.msra.gmra.mrb[16].mxu1 %v4187_v11 }
 0x409   :  { %2453 = vmatpush1.bf16.msra.mxu1 %v2823_v19  ;;  %2484 = vmatprep.mubr.bf16.mxu1 %v4185_v10  ;;  %v1598_v10 = vld [vmem:[%s4444_s10 + $0x130] sm:$0xff]  ;;  %v1716_v19 = vsub.s32 6, %v3414_v12  ;;  %s3310_s10 = smov [#allocation2]  }
 0x40a   :  { %2454 = vmatprep.subr.bf16.mxu1 %v2832_v20  ;;  %v2856_v34 = vcombine.high %v1594_v32, %v1598_v10  ;;  %v2855_v37 = vcombine.low %v1594_v32, %v1598_v10  ;;  %v4381_v20 = vld [vmem:[%s4445_s11] sm:$0xff]  ;;  %s2615_s11 = sshll.u32 %s3310_s10, 4  ;;  %s2616_s11 = int_to_ptr.vmem [resolvable:$true] %s2615_s11 }
 0x40b   :  { %v1693_v22 = vrot.slane %v4381_v20, %v3862_v41  ;;  %v1721_v25 = vrot.slane %v4381_v20, %v1720_v21  ;;  %s3260_s28 = scalar_lea.vmem %s2616_s11, 32  ;;  %p3265_p1 = scmp.lt.s32.totalorder %s2616_s11, %s2616_s11 }
 0x40c   :  { %p3261_p0 = scmp.ne.s32.totalorder %s2616_s11, %s3260_s28  ;;  %p3266_p2 = scmp.lt.s32.totalorder %s3260_s28, %s3260_s28 }
 0x40d   :  { %2455 = vmatpush1.bf16.msra.mxu1 %v2831_v23  ;;  %v1717_v23 = vrot.slane %v4381_v20, %v1716_v19 }
 0x40e   :  { %2456 = vmatprep.subr.bf16.mxu1 %v2840_v24  ;;  %v1697_v24 = vrot.slane %v4381_v20, %v3868_v43  ;;  %p3267_p3 = por %p3266_p2, %p3265_p1 }
 0x410   :  { %p3268_p4 = pnand %p3267_p3, %p3261_p0 }
 0x411   :  { %2457 = vmatpush1.bf16.msra.mxu1 %v2839_v30 }
 0x412   :  { %2458 = vmatprep.subr.bf16.mxu1 %v2848_v31 }
 0x415   :  { %2459 = vmatpush1.bf16.msra.mxu1 %v2847_v33 }
 0x416   :  { %2460 = vmatprep.subr.bf16.mxu1 %v2856_v34 }
 0x419   :  { %2461 = vmatpush1.bf16.msra.mxu1 %v2855_v37 }
 0x41a   :  { %2462 = vmatprep.subr.bf16.mxu1 %v2864_v38 }
 0x41d   :  { %2463 = vmatpush1.bf16.msra.mxu1 %v2863_v42 }
 0x41e   :  { %2464 = vmatprep.subr.bf16.mxu1 %v2872_v44 }
 0x421   :  { %2465 = vmatpush1.bf16.msra.mxu1 %v2871_v47 }
 0x422   :  { %2466 = vmatprep.subr.bf16.mxu1 %v2880_v48 }
 0x425   :  { %2467 = vmatpush1.bf16.msra.mxu1 %v2879_v51 }
 0x426   :  { %2468 = vmatprep.subr.bf16.mxu1 %v2888_v52 }
 0x429   :  { %2469 = vmatpush1.bf16.msra.mxu1 %v2887_v55 }
 0x42a   :  { %2470 = vmatprep.subr.bf16.mxu1 %v2896_v56 }
 0x42d   :  { %2471 = vmatpush1.bf16.msra.mxu1 %v2895_v59 }
 0x42e   :  { %2472 = vmatprep.subr.bf16.mxu1 %v2904_v60 }
 0x431   :  { %2473 = vmatpush1.bf16.msra.mxu1 %v2903_v26 }
 0x432   :  { %2474 = vmatprep.subr.bf16.mxu1 %v2912_v27 }
 0x435   :  { %2475 = vmatpush1.bf16.msra.mxu1 %v2911_v0 }
 0x436   :  { %2476 = vmatprep.subr.bf16.mxu1 %v2920_v1 }
 0x439   :  { %2477 = vmatpush1.bf16.msra.mxu1 %v2919_v4 }
 0x43a   :  { %2478 = vmatprep.subr.bf16.mxu1 %v2928_v5 }
 0x43d   :  { %2479 = vmatpush1.bf16.msra.mxu1 %v2927_v8 }
 0x43e   :  { %2480 = vmatprep.subr.bf16.mxu1 %v2936_v9 }
 0x441   :  { %2481 = vmatpush1.bf16.msra.mxu1 %v2935_v15 }
 0x442   :  { %2482 = vmatprep.subr.bf16.mxu1 %v2944_v17 }
 0x445   :  { %2483 = vmatpush1.bf16.msra.mxu1 %v2943_v18 }
 0x448   :  { %2485 = vmatmul.mubr.bf16.vlgmr.msra.gmra.mrb[20].mxu1 %v4187_v11 }
 0x49b   :  { %v2404_v11 = vpop.f32.mrb[12].mxu1  ;;  %v2527_v29 = vpop.f32.mrb[4].mxu0 }
 0x49c   :  { %v2405_v30 = vadd.f32 %v2404_v11, %v1693_v22  ;;  %v2528_v31 = vadd.f32 %v2527_v29, %v1717_v23  ;;  %v2406_v32 = vpop.f32.mrb[13].mxu1  ;;  %v2529_v10 = vpop.f32.mrb[5].mxu0 }
 0x49d   :  { %v2407_v33 = vadd.f32 %v2406_v32, %v1697_v24  ;;  %v2530_v34 = vadd.f32 %v2529_v10, %v1721_v25  ;;  %v2408_v35 = vpop.f32.mrb[14].mxu1  ;;  %v2531_v36 = vpop.f32.mrb[6].mxu0 }
 0x49e   :  { %v2534_v37 = vmax.f32 %v2405_v30, 0.0  ;;  %v2540_v38 = vmax.f32 %v2528_v31, 0.0  ;;  %v2409_v41 = vpop.f32.mrb[15].mxu1  ;;  %v2532_v39 = vpop.f32.mrb[7].mxu0 }
 0x49f   :  { %v2535_v40 = vmax.f32 %v2407_v33, 0.0  ;;  %v2541_v42 = vmax.f32 %v2530_v34, 0.0 }
 0x4a1   :  { %v2947_v44 = vpack.c.bf16 %v2535_v40, %v2534_v37  ;;  %v4390_v43 = vpack.c.bf16 %v2541_v42, %v2540_v38 }
 0x4a2   :  { %3271 = shalt.err (!%p3268_p4)
}
 0x4a3   :  { %s3272_s1 = scalar_lea.hbm %s4446_s12, 32 }
 0x4a4   :  { %p3273_p5 = scmp.ne.s32.totalorder %s4446_s12, %s3272_s1  ;;  %p3276_p6 = scmp.lt.u32.totalorder %s3272_s1, %s4446_s12 }
 0x4a6   :  { %p3278_p7 = pnand %p3276_p6, %p3273_p5 }
 0x4a8   :  { %3281 = shalt.err (!%p3278_p7)
}
 0x4a9   :  { %2618 = dma.vmem_to_hbm [thread:$0]  %s2616_s11, 32, %s4446_s12, [#allocation3]  }
 0x4aa   :  { %s3282_s8 = scalar_lea.vmem %s2626_s27, 32  ;;  %p3287_p9 = scmp.lt.s32.totalorder %s2626_s27, %s2626_s27 }
 0x4ab   :  { %p3283_p8 = scmp.ne.s32.totalorder %s2626_s27, %s3282_s8  ;;  %p3288_p10 = scmp.lt.s32.totalorder %s3282_s8, %s3282_s8 }
 0x4ad   :  { %p3289_p11 = por %p3288_p10, %p3287_p9 }
 0x4af   :  { %p3290_p12 = pnand %p3289_p11, %p3283_p8 }
 0x4b1   :  { %3293 = shalt.err (!%p3290_p12)
}
 0x4b2   :  { %s3294_s17 = scalar_lea.hbm %s4447_s13, 32 }
 0x4b3   :  { %p3295_p13 = scmp.ne.s32.totalorder %s4447_s13, %s3294_s17  ;;  %p3298_p0 = scmp.lt.u32.totalorder %s3294_s17, %s4447_s13 }
 0x4b5   :  { %p3300_p1 = pnand %p3298_p0, %p3295_p13 }
 0x4b7   :  { %3303 = shalt.err (!%p3300_p1)
}
 0x4b8   :  { %2628 = dma.vmem_to_hbm [thread:$0]  %s2626_s27, 32, %s4447_s13, [#allocation5]   ;;  %v1700_v45 = vsub.s32 2, %v3414_v12  ;;  %v1704_v46 = vsub.s32 3, %v3414_v12  ;;  %v2568_v58 = vrot.slane %v2947_v44, %v3423_v16  ;;  %v1708_v61 = vsub.s32 4, %v3414_v12 }
 0x4b9   :  { %v1712_v62 = vsub.s32 5, %v3414_v12  ;;  %v2589_v7 = vrot.slane %v4390_v43, %v3423_v16 }
 0x4ba   :  { %v1701_v47 = vrot.slane %v4381_v20, %v1700_v45  ;;  %v1705_v48 = vrot.slane %v4381_v20, %v1704_v46  ;;  %v1709_v26 = vrot.slane %v4381_v20, %v1708_v61 }
 0x4bb   :  { %v1713_v27 = vrot.slane %v4381_v20, %v1712_v62 }
 0x4db   :  { %v2445_v49 = vpop.f32.mrb[16].mxu1 }
 0x4dc   :  { %v2446_v50 = vadd.f32 %v2445_v49, %v1701_v47  ;;  %v2447_v51 = vpop.f32.mrb[17].mxu1 }
 0x4dd   :  { %v2448_v52 = vadd.f32 %v2447_v51, %v1705_v48  ;;  %v2449_v53 = vpop.f32.mrb[18].mxu1 }
 0x4de   :  { %v2536_v54 = vmax.f32 %v2446_v50, 0.0  ;;  %v2450_v55 = vpop.f32.mrb[19].mxu1 }
 0x4df   :  { %v2537_v56 = vmax.f32 %v2448_v52, 0.0 }
 0x4e1   :  { %v2948_v57 = vpack.c.bf16 %v2537_v56, %v2536_v54 }
 0x4e3   :  { %v2575_v59 = vrot.slane %v2948_v57, %v3423_v16 }
 0x4e5   :  { %v2590_v60 = vcombine.low %v2568_v58, %v2575_v59 }
 0x4e7   :  { %v2598_v12 = vrot.slane %v2590_v60, %v3423_v16 }
 0x51b   :  { %v2486_v28 = vpop.f32.mrb[20].mxu1 }
 0x51c   :  { %v2487_v63 = vadd.f32 %v2486_v28, %v1709_v26  ;;  %v2488_v0 = vpop.f32.mrb[21].mxu1 }
 0x51d   :  { %v2489_v1 = vadd.f32 %v2488_v0, %v1713_v27  ;;  %v2490_v2 = vpop.f32.mrb[22].mxu1 }
 0x51e   :  { %v2538_v3 = vmax.f32 %v2487_v63, 0.0  ;;  %v2491_v4 = vpop.f32.mrb[23].mxu1 }
 0x51f   :  { %v2539_v5 = vmax.f32 %v2489_v1, 0.0 }
 0x521   :  { %v2949_v6 = vpack.c.bf16 %v2539_v5, %v2538_v3 }
 0x523   :  { %v2582_v8 = vrot.slane %v2949_v6, %v3423_v16 }
 0x525   :  { %v2591_v9 = vcombine.low %v2582_v8, %v2589_v7 }
 0x527   :  { %v2605_v13 = vrot.slane %v2591_v9, %v3423_v16 }
 0x529   :  { %v2606_v14 = vcombine.low %v2598_v12, %v2605_v13 }
 0x52b   :  { %2608 = vst [vmem:[%s4448_s14] sm:$0xff] %v2606_v14 }
 0x52c   :  { %3304 = dma.done.wait [#allocation3], 32  }
 0x52d   :  { %3305 = vsyncadd [#allocation3], 4294967264 }
 0x52e   :  { %3306 = dma.done.wait [#allocation5], 32  }
 0x52f   :  { %3307 = vsyncadd [#allocation5], 4294967264 }
 0x530   :  { %2639 = vsyncpa [#allocation3], 1 }
 0x531   :  { %2640 = vsyncpa [#allocation5], 1 }

// kernel: vae_forward.14
= control target key start
LH: loop header
LB: loop body
LE: loop exit
PB: predicated region body
PF: predicated region fallthrough
CT: control target
= control target key end

     0   :  { %s868_s12 = smov 0   ;;  %s870_s13 = smov 0   ;;  %s979_s0 = inlined_call_operand.vmem [shape: bf16[4,64,256], index: 0, kind: input, shape index: {}]   ;;  %s980_s1 = inlined_call_operand.vmem [shape: bf16[4,256,32], index: 1, kind: input, shape index: {}]   ;;  %s981_s2 = inlined_call_operand.vmem [shape: f32[64,1], index: 2, kind: input, shape index: {}]   ;;  %s982_s3 = inlined_call_operand.vmem [shape: bf16[4,64,32], index: 3, kind: output, shape index: {}]  }
   0x1   :  { %s872_s14 = smov 0  }
   0x2 LB: > { %s25_s15 = sadd.s32 1, %s841_s13  ;;  %p660_p0 = scmp.ge.s32.totalorder %s845_s14, 1  ;;  %s845_s14 = sphi %s872_s14, %s13_s14   ;;  %s841_s13 = sphi %s870_s13, %s984_s13   ;;  %s837_s12 = sphi %s868_s12, %s983_s12  }
   0x3   : > { %p27_p1 = scmp.ge.s32.totalorder %s25_s15, 4  ;;  %p166_p2 = scmp.lt.s32.totalorder %s845_s14, 5 }
   0x5   : > { %s986_s15 = smov (%p27_p1, %s25_s15), 0  ;;  %p167_p3 = pnand %p660_p0, %p166_p2 }
   0x6   : > { %p201_p4 = scmp.lt.s32.totalorder (!%p167_p3), %s837_s12, 3  ;;  %v265_v0 = vld [vmem:[%s981_s2 + $0x10] sm:$0xff] (!%p167_p3)  ;;  %v263_v1 = vld [vmem:[%s981_s2] sm:$0xff] (!%p167_p3)  ;;  %v847_v2 = vmov (!%p167_p3), 0   ;;  %v266_v3 = vld [vmem:[%s981_s2 + $0x18] sm:$0xff] (!%p167_p3)  ;;  %vm552_vm0 = vcmask (!%p167_p3), 257024  }
   0x7   : > { %170 = sbr.rel (%p167_p3) target bundleno = 282 (0x11a), region = 32  ;;  %794 = vset.pattern.permute.xlu1 (!%p167_p3), %v847_v2  ;;  %793 = vset.pattern.permute.xlu0 (!%p167_p3), %v847_v2  ;;  %v264_v4 = vld [vmem:[%s981_s2 + $0x8] sm:$0xff] (!%p167_p3)  ;;  %v267_v7 = vld [vmem:[%s981_s2 + $0x20] sm:$0xff] (!%p167_p3)  ;;  %v270_v12 = vld [vmem:[%s981_s2 + $0x38] sm:$0xff] (!%p167_p3) }
   0x8   : > { %283 = vperm.xlu1 (!%p167_p3), %794, %v265_v0   ;;  %273 = vperm.xlu0 (!%p167_p3), %793, %v263_v1   ;;  %v268_v6 = vld [vmem:[%s981_s2 + $0x28] sm:$0xff] (!%p167_p3)  ;;  %v269_v13 = vld [vmem:[%s981_s2 + $0x30] sm:$0xff] (!%p167_p3) }
   0xc   : > { %288 = vperm.xlu1 (!%p167_p3), %794, %v266_v3   ;;  %278 = vperm.xlu0 (!%p167_p3), %793, %v264_v4  }
   0xe   : > { %s988_s12 = smov (!%p201_p4, %s837_s12), 3 }
   0xf   : > { %s702_s24 = sshll.u32 %s988_s12, 7  ;;  %s701_s9 = sshll.u32 %s988_s12, 6 }
  0x10   : > { %s904_s27 = scalar_lea.vmem %s980_s1, %s702_s24  ;;  %298 = vperm.xlu1 %794, %v268_v6   ;;  %293 = vperm.xlu0 %793, %v267_v7   ;;  %s931_s16 = scalar_lea.vmem %s979_s0, %s701_s9 }
  0x11   : > { %v795_v5 = vld [vmem:[%s904_s27 + $0x40] sm:$0xff]   ;;  %v797_v9 = vld [vmem:[%s904_s27 + $0x48] sm:$0xff]   ;;  %v799_v11 = vld [vmem:[%s904_s27 + $0x50] sm:$0xff]   ;;  %s703_s17 = sshll.u32 %s988_s12, 5 }
  0x12   : > { %v796_v8 = vld [vmem:[%s904_s27] sm:$0xff]   ;;  %712 = vmatprep.subr.bf16.mxu0 %v795_v5  ;;  %752 = vmatprep.subr.bf16.mxu1 %v795_v5  ;;  %v798_v10 = vld [vmem:[%s904_s27 + $0x8] sm:$0xff]   ;;  %v800_v14 = vld [vmem:[%s904_s27 + $0x10] sm:$0xff]   ;;  %s952_s20 = scalar_lea.vmem %s982_s3, %s703_s17 }
  0x13   : > { %713 = vmatpush3.bf16.msra.mxu0 %v796_v8  ;;  %760 = vmatpush3.bf16.msra.mxu1 %v796_v8  ;;  %v801_v15 = vld [vmem:[%s904_s27 + $0x58] sm:$0xff]   ;;  %v803_v17 = vld [vmem:[%s904_s27 + $0x60] sm:$0xff]   ;;  %v805_v19 = vld [vmem:[%s904_s27 + $0x68] sm:$0xff]  }
  0x14   : > { %714 = vmatprep.subr.bf16.mxu0 %v797_v9  ;;  %753 = vmatprep.subr.bf16.mxu1 %v797_v9  ;;  %v802_v16 = vld [vmem:[%s904_s27 + $0x18] sm:$0xff]   ;;  %v804_v18 = vld [vmem:[%s904_s27 + $0x20] sm:$0xff]   ;;  %v806_v22 = vld [vmem:[%s904_s27 + $0x28] sm:$0xff]  }
  0x15   : > { %308 = vperm.xlu1 %794, %v270_v12   ;;  %303 = vperm.xlu0 %793, %v269_v13   ;;  %v813_v20 = vld [vmem:[%s931_s16 + $0x4] ss:$8 sps:$4 sm:$0xff]   ;;  %v807_v23 = vld [vmem:[%s904_s27 + $0x70] sm:$0xff]   ;;  %v809_v25 = vld [vmem:[%s904_s27 + $0x78] sm:$0xff]  }
  0x16   : > { %v816_v21 = vld [vmem:[%s931_s16 + $0x24] ss:$8 sps:$4 sm:$0xff]   ;;  %479 = vmatprep.mubr.bf16.mxu0 %v813_v20  ;;  %v808_v24 = vld [vmem:[%s904_s27 + $0x30] sm:$0xff]   ;;  %v810_v26 = vld [vmem:[%s904_s27 + $0x38] sm:$0xff]  }
  0x17   : > { %715 = vmatpush3.bf16.msra.mxu0 %v798_v10  ;;  %761 = vmatpush3.bf16.msra.mxu1 %v798_v10  ;;  %v811_v27 = vld [vmem:[%s931_s16] ss:$8 sps:$4 sm:$0xff]   ;;  %v817_v29 = vld [vmem:[%s931_s16 + $0x14] ss:$8 sps:$4 sm:$0xff]   ;;  %v821_v31 = vld [vmem:[%s931_s16 + $0x10] ss:$8 sps:$4 sm:$0xff]  }
  0x18   : > { %716 = vmatprep.subr.bf16.mxu0 %v799_v11  ;;  %754 = vmatprep.subr.bf16.mxu1 %v799_v11  ;;  %v814_v28 = vld [vmem:[%s931_s16 + $0x20] ss:$8 sps:$4 sm:$0xff]   ;;  %v819_v30 = vld [vmem:[%s931_s16 + $0x34] ss:$8 sps:$4 sm:$0xff]   ;;  %v822_v32 = vld [vmem:[%s931_s16 + $0x30] ss:$8 sps:$4 sm:$0xff]  }
  0x19   : > { %495 = vmatprep.mubr.bf16.mxu1 %v816_v21 }
  0x1b   : > { %717 = vmatpush3.bf16.msra.mxu0 %v800_v14  ;;  %762 = vmatpush3.bf16.msra.mxu1 %v800_v14 }
  0x1c   : > { %718 = vmatprep.subr.bf16.mxu0 %v801_v15  ;;  %755 = vmatprep.subr.bf16.mxu1 %v801_v15 }
  0x1f   : > { %719 = vmatpush3.bf16.msra.mxu0 %v802_v16  ;;  %763 = vmatpush3.bf16.msra.mxu1 %v802_v16 }
  0x20   : > { %720 = vmatprep.subr.bf16.mxu0 %v803_v17  ;;  %756 = vmatprep.subr.bf16.mxu1 %v803_v17 }
  0x23   : > { %721 = vmatpush3.bf16.msra.mxu0 %v804_v18  ;;  %764 = vmatpush3.bf16.msra.mxu1 %v804_v18 }
  0x24   : > { %722 = vmatprep.subr.bf16.mxu0 %v805_v19  ;;  %757 = vmatprep.subr.bf16.mxu1 %v805_v19 }
  0x27   : > { %723 = vmatpush3.bf16.msra.mxu0 %v806_v22  ;;  %765 = vmatpush3.bf16.msra.mxu1 %v806_v22 }
  0x28   : > { %724 = vmatprep.subr.bf16.mxu0 %v807_v23  ;;  %758 = vmatprep.subr.bf16.mxu1 %v807_v23 }
  0x2b   : > { %725 = vmatpush3.bf16.msra.mxu0 %v808_v24  ;;  %766 = vmatpush3.bf16.msra.mxu1 %v808_v24 }
  0x2c   : > { %726 = vmatprep.subr.bf16.mxu0 %v809_v25  ;;  %759 = vmatprep.subr.bf16.mxu1 %v809_v25 }
  0x2f   : > { %727 = vmatpush3.bf16.msra.mxu0 %v810_v26  ;;  %767 = vmatpush3.bf16.msra.mxu1 %v810_v26 }
  0x32   : > { %480 = vmatmul.mubr.bf16.vlgmr.msra.gmra.mrb[0].mxu0 %v811_v27  ;;  %496 = vmatmul.mubr.bf16.vlgmr.msra.gmra.mrb[0].mxu1 %v814_v28 }
  0x33   : > { %487 = vmatprep.mubr.bf16.mxu0 %v817_v29  ;;  %503 = vmatprep.mubr.bf16.mxu1 %v819_v30 }
  0x3a   : > { %488 = vmatmul.mubr.bf16.gmra.mrb[4].mxu0 %v821_v31  ;;  %504 = vmatmul.mubr.bf16.gmra.mrb[4].mxu1 %v822_v32 }
  0x87   : > { %v274_v33 = vpop.permute.xlu0 %273  ;;  %v284_v34 = vpop.permute.xlu1 %283 }
  0x8b   : > { %v279_v35 = vpop.permute.xlu0 %278  ;;  %v289_v36 = vpop.permute.xlu1 %288 }
  0x8f   : > { %v294_v37 = vpop.permute.xlu0 %293  ;;  %v299_v52 = vpop.permute.xlu1 %298 }
  0x94   : > { %v304_v57 = vpop.permute.xlu0 %303  ;;  %v309_v14 = vpop.permute.xlu1 %308 }
 0x105   : > { %v728_v38 = vpop.f32.mrb[0].mxu0  ;;  %v740_v39 = vpop.f32.mrb[0].mxu1 }
 0x106   : > { %v729_v40 = vpop.f32.mrb[1].mxu0  ;;  %v741_v41 = vpop.f32.mrb[1].mxu1 }
 0x107   : > { %v730_v42 = vadd.f32 %v729_v40, %v728_v38  ;;  %v742_v43 = vadd.f32 %v741_v41, %v740_v39  ;;  %v731_v44 = vpop.f32.mrb[2].mxu0  ;;  %v743_v45 = vpop.f32.mrb[2].mxu1 }
 0x108   : > { %v732_v46 = vpop.f32.mrb[3].mxu0  ;;  %v744_v47 = vpop.f32.mrb[3].mxu1 }
 0x109   : > { %v482_v48 = vadd.f32 %v730_v42, %v274_v33  ;;  %v498_v49 = vadd.f32 %v742_v43, %v294_v37  ;;  %v733_v50 = vadd.f32 %v732_v46, %v731_v44  ;;  %v745_v51 = vadd.f32 %v744_v47, %v743_v45 }
 0x10b   : > { %v512_v53 = vmax.f32 %v482_v48, 0.0  ;;  %v516_v54 = vmax.f32 %v498_v49, 0.0  ;;  %v485_v55 = vadd.f32 %v733_v50, %v279_v35  ;;  %v501_v56 = vadd.f32 %v745_v51, %v299_v52 }
 0x10d   : > { %v704_v58 = vpack.c.bf16 %v512_v53, %v512_v53  ;;  %v708_v59 = vpack.c.bf16 %v516_v54, %v516_v54  ;;  %v513_v60 = vmax.f32 %v485_v55, 0.0  ;;  %v517_v61 = vmax.f32 %v501_v56, 0.0  ;;  %v734_v62 = vpop.f32.mrb[4].mxu0  ;;  %v746_v63 = vpop.f32.mrb[4].mxu1 }
 0x10e   : > { %v735_v0 = vpop.f32.mrb[5].mxu0  ;;  %v747_v1 = vpop.f32.mrb[5].mxu1 }
 0x10f   : > { %553 = vst.msk [vmem:[%s952_s20] sm:$0xf] %vm552_vm0, %v704_v58  ;;  %557 = vst.msk [vmem:[%s952_s20 + $0x10] sm:$0xf] %vm552_vm0, %v708_v59  ;;  %v705_v2 = vpack.c.bf16 %v513_v60, %v513_v60  ;;  %v709_v3 = vpack.c.bf16 %v517_v61, %v517_v61  ;;  %v736_v4 = vadd.f32 %v735_v0, %v734_v62  ;;  %v737_v6 = vpop.f32.mrb[6].mxu0  ;;  %v749_v7 = vpop.f32.mrb[6].mxu1 }
 0x110   : > { %v748_v5 = vadd.f32 %v747_v1, %v746_v63  ;;  %v738_v8 = vpop.f32.mrb[7].mxu0  ;;  %v750_v9 = vpop.f32.mrb[7].mxu1 }
 0x111   : > { %554 = vst.msk [vmem:[%s952_s20 + $0x4] sm:$0xf] %vm552_vm0, %v705_v2  ;;  %558 = vst.msk [vmem:[%s952_s20 + $0x14] sm:$0xf] %vm552_vm0, %v709_v3  ;;  %v490_v10 = vadd.f32 %v736_v4, %v284_v34  ;;  %v739_v12 = vadd.f32 %v738_v8, %v737_v6  ;;  %v751_v13 = vadd.f32 %v750_v9, %v749_v7 }
 0x112   : > { %v506_v11 = vadd.f32 %v748_v5, %v304_v57 }
 0x113   : > { %v514_v15 = vmax.f32 %v490_v10, 0.0  ;;  %v493_v17 = vadd.f32 %v739_v12, %v289_v36  ;;  %v509_v18 = vadd.f32 %v751_v13, %v309_v14 }
 0x114   : > { %v518_v16 = vmax.f32 %v506_v11, 0.0 }
 0x115   : > { %v706_v19 = vpack.c.bf16 %v514_v15, %v514_v15  ;;  %v515_v21 = vmax.f32 %v493_v17, 0.0  ;;  %v519_v22 = vmax.f32 %v509_v18, 0.0 }
 0x116   : > { %v710_v20 = vpack.c.bf16 %v518_v16, %v518_v16 }
 0x117   : > { %555 = vst.msk [vmem:[%s952_s20 + $0x8] sm:$0xf] %vm552_vm0, %v706_v19  ;;  %v707_v23 = vpack.c.bf16 %v515_v21, %v515_v21  ;;  %v711_v24 = vpack.c.bf16 %v519_v22, %v519_v22 }
 0x118   : > { %559 = vst.msk [vmem:[%s952_s20 + $0x18] sm:$0xf] %vm552_vm0, %v710_v20 }
 0x119   : > { %556 = vst.msk [vmem:[%s952_s20 + $0xc] sm:$0xf] %vm552_vm0, %v707_v23  ;;  %560 = vst.msk [vmem:[%s952_s20 + $0x1c] sm:$0xf] %vm552_vm0, %v711_v24 }
 0x11a PF: > { %s13_s14 = sadd.s32 1, %s845_s14   ;;  %s983_s12 = smov %s841_s13 }
 0x11b   : > { %p10_p5 = scmp.ge.s32.totalorder %s13_s14, 6   ;;  %s984_s13 = smov %s986_s15 }
 0x11d   :  { %12 = sbr.rel (!%p10_p5) target bundleno = 2 (0x2), region = 65 }

// kernel: vae_forward.15
= control target key start
LH: loop header
LB: loop body
LE: loop exit
PB: predicated region body
PF: predicated region fallthrough
CT: control target
= control target key end

     0   :  { %s760_s12 = smov 0   ;;  %s762_s13 = smov 0   ;;  %s831_s0 = inlined_call_operand.vmem [shape: bf16[4,32,256], index: 0, kind: input, shape index: {}]   ;;  %s832_s1 = inlined_call_operand.vmem [shape: bf16[4,256,128], index: 1, kind: input, shape index: {}]   ;;  %s833_s2 = inlined_call_operand.vmem [shape: f32[32,1], index: 2, kind: input, shape index: {}]   ;;  %s834_s3 = inlined_call_operand.vmem [shape: bf16[4,32,128], index: 3, kind: output, shape index: {}]  }
   0x1   :  { %s764_s14 = smov 0  }
   0x2 LB: > { %s25_s15 = sadd.s32 1, %s733_s13  ;;  %p571_p0 = scmp.ge.s32.totalorder %s737_s14, 1  ;;  %s737_s14 = sphi %s764_s14, %s13_s14   ;;  %s733_s13 = sphi %s762_s13, %s836_s13   ;;  %s729_s12 = sphi %s760_s12, %s835_s12  }
   0x3   : > { %p27_p1 = scmp.ge.s32.totalorder %s25_s15, 4  ;;  %p166_p2 = scmp.lt.s32.totalorder %s737_s14, 5 }
   0x5   : > { %s838_s15 = smov (%p27_p1, %s25_s15), 0  ;;  %p167_p3 = pnand %p571_p0, %p166_p2 }
   0x6   : > { %p201_p4 = scmp.lt.s32.totalorder (!%p167_p3), %s729_s12, 3  ;;  %v261_v0 = vld [vmem:[%s833_s2 + $0x10] sm:$0xff] (!%p167_p3)  ;;  %v259_v1 = vld [vmem:[%s833_s2] sm:$0xff] (!%p167_p3)  ;;  %v739_v2 = vmov (!%p167_p3), 0   ;;  %v262_v3 = vld [vmem:[%s833_s2 + $0x18] sm:$0xff] (!%p167_p3) }
   0x7   : > { %170 = sbr.rel (%p167_p3) target bundleno = 274 (0x112), region = 32  ;;  %692 = vset.pattern.permute.xlu1 (!%p167_p3), %v739_v2  ;;  %691 = vset.pattern.permute.xlu0 (!%p167_p3), %v739_v2  ;;  %v260_v4 = vld [vmem:[%s833_s2 + $0x8] sm:$0xff] (!%p167_p3) }
   0x8   : > { %275 = vperm.xlu1 (!%p167_p3), %692, %v261_v0   ;;  %265 = vperm.xlu0 (!%p167_p3), %691, %v259_v1  }
   0xc   : > { %280 = vperm.xlu1 (!%p167_p3), %692, %v262_v3   ;;  %270 = vperm.xlu0 (!%p167_p3), %691, %v260_v4  }
   0xe   : > { %s840_s12 = smov (!%p201_p4, %s729_s12), 3 }
   0xf   : > { %s605_s24 = sshll.u32 %s840_s12, 7  ;;  %s604_s28 = sshll.u32 %s840_s12, 5 }
  0x10   : > { %s796_s27 = scalar_lea.vmem %s832_s1, %s605_s24  ;;  %s205_s4 = scalar_lea.vmem %s831_s0, %s604_s28 }
  0x11   : > { %v693_v5 = vld [vmem:[%s796_s27 + $0x40] sm:$0xff]   ;;  %v695_v7 = vld [vmem:[%s796_s27 + $0x48] sm:$0xff]   ;;  %v697_v9 = vld [vmem:[%s796_s27 + $0x50] sm:$0xff]   ;;  %s606_s5 = sshll.u32 %s840_s12, 4 }
  0x12   : > { %v694_v6 = vld [vmem:[%s796_s27] sm:$0xff]   ;;  %622 = vmatprep.subr.bf16.mxu0 %v693_v5  ;;  %650 = vmatprep.subr.bf16.mxu1 %v693_v5  ;;  %v696_v8 = vld [vmem:[%s796_s27 + $0x8] sm:$0xff]   ;;  %v698_v10 = vld [vmem:[%s796_s27 + $0x10] sm:$0xff]   ;;  %s221_s8 = scalar_lea.vmem %s834_s3, %s606_s5 }
  0x13   : > { %623 = vmatpush3.bf16.msra.mxu0 %v694_v6  ;;  %658 = vmatpush3.bf16.msra.mxu1 %v694_v6  ;;  %v699_v11 = vld [vmem:[%s796_s27 + $0x58] sm:$0xff]   ;;  %v701_v13 = vld [vmem:[%s796_s27 + $0x60] sm:$0xff]   ;;  %v703_v15 = vld [vmem:[%s796_s27 + $0x68] sm:$0xff]  }
  0x14   : > { %624 = vmatprep.subr.bf16.mxu0 %v695_v7  ;;  %651 = vmatprep.subr.bf16.mxu1 %v695_v7  ;;  %v700_v12 = vld [vmem:[%s796_s27 + $0x18] sm:$0xff]   ;;  %v702_v14 = vld [vmem:[%s796_s27 + $0x20] sm:$0xff]   ;;  %v704_v18 = vld [vmem:[%s796_s27 + $0x28] sm:$0xff]  }
  0x15   : > { %v711_v16 = vld [vmem:[%s205_s4 + $0x4] ss:$8 sps:$4 sm:$0xff]   ;;  %v714_v17 = vld [vmem:[%s205_s4 + $0x14] ss:$8 sps:$4 sm:$0xff]   ;;  %v709_v23 = vld [vmem:[%s205_s4] ss:$8 sps:$4 sm:$0xff]  }
  0x16   : > { %v705_v19 = vld [vmem:[%s796_s27 + $0x70] sm:$0xff]   ;;  %431 = vmatprep.mubr.bf16.mxu0 %v711_v16  ;;  %439 = vmatprep.mubr.bf16.mxu1 %v714_v17  ;;  %v707_v21 = vld [vmem:[%s796_s27 + $0x78] sm:$0xff]  }
  0x17   : > { %625 = vmatpush3.bf16.msra.mxu0 %v696_v8  ;;  %659 = vmatpush3.bf16.msra.mxu1 %v696_v8  ;;  %v706_v20 = vld [vmem:[%s796_s27 + $0x30] sm:$0xff]   ;;  %v708_v22 = vld [vmem:[%s796_s27 + $0x38] sm:$0xff]  }
  0x18   : > { %626 = vmatprep.subr.bf16.mxu0 %v697_v9  ;;  %652 = vmatprep.subr.bf16.mxu1 %v697_v9  ;;  %v712_v24 = vld [vmem:[%s205_s4 + $0x10] ss:$8 sps:$4 sm:$0xff]  }
  0x1b   : > { %627 = vmatpush3.bf16.msra.mxu0 %v698_v10  ;;  %660 = vmatpush3.bf16.msra.mxu1 %v698_v10 }
  0x1c   : > { %628 = vmatprep.subr.bf16.mxu0 %v699_v11  ;;  %653 = vmatprep.subr.bf16.mxu1 %v699_v11 }
  0x1f   : > { %629 = vmatpush3.bf16.msra.mxu0 %v700_v12  ;;  %661 = vmatpush3.bf16.msra.mxu1 %v700_v12 }
  0x20   : > { %630 = vmatprep.subr.bf16.mxu0 %v701_v13  ;;  %654 = vmatprep.subr.bf16.mxu1 %v701_v13 }
  0x23   : > { %631 = vmatpush3.bf16.msra.mxu0 %v702_v14  ;;  %662 = vmatpush3.bf16.msra.mxu1 %v702_v14 }
  0x24   : > { %632 = vmatprep.subr.bf16.mxu0 %v703_v15  ;;  %655 = vmatprep.subr.bf16.mxu1 %v703_v15 }
  0x27   : > { %633 = vmatpush3.bf16.msra.mxu0 %v704_v18  ;;  %663 = vmatpush3.bf16.msra.mxu1 %v704_v18 }
  0x28   : > { %634 = vmatprep.subr.bf16.mxu0 %v705_v19  ;;  %656 = vmatprep.subr.bf16.mxu1 %v705_v19 }
  0x2b   : > { %635 = vmatpush3.bf16.msra.mxu0 %v706_v20  ;;  %664 = vmatpush3.bf16.msra.mxu1 %v706_v20 }
  0x2c   : > { %636 = vmatprep.subr.bf16.mxu0 %v707_v21  ;;  %657 = vmatprep.subr.bf16.mxu1 %v707_v21 }
  0x2f   : > { %637 = vmatpush3.bf16.msra.mxu0 %v708_v22  ;;  %665 = vmatpush3.bf16.msra.mxu1 %v708_v22 }
  0x32   : > { %432 = vmatmul.mubr.bf16.vlgmr.msra.gmra.mrb[0].mxu0 %v709_v23  ;;  %440 = vmatmul.mubr.bf16.vlgmr.msra.gmra.mrb[0].mxu1 %v712_v24 }
  0x87   : > { %v276_v25 = vpop.permute.xlu1 %275  ;;  %v266_v26 = vpop.permute.xlu0 %265 }
  0x8b   : > { %v281_v41 = vpop.permute.xlu1 %280  ;;  %v271_v42 = vpop.permute.xlu0 %270 }
 0x105   : > { %v638_v27 = vpop.f32.mrb[0].mxu0  ;;  %v644_v28 = vpop.f32.mrb[0].mxu1 }
 0x106   : > { %v639_v29 = vpop.f32.mrb[1].mxu0  ;;  %v645_v30 = vpop.f32.mrb[1].mxu1 }
 0x107   : > { %v640_v31 = vadd.f32 %v639_v29, %v638_v27  ;;  %v646_v32 = vadd.f32 %v645_v30, %v644_v28  ;;  %v641_v33 = vpop.f32.mrb[2].mxu0  ;;  %v647_v34 = vpop.f32.mrb[2].mxu1 }
 0x108   : > { %v642_v35 = vpop.f32.mrb[3].mxu0  ;;  %v648_v36 = vpop.f32.mrb[3].mxu1 }
 0x109   : > { %v434_v37 = vadd.f32 %v640_v31, %v266_v26  ;;  %v442_v38 = vadd.f32 %v646_v32, %v276_v25  ;;  %v643_v39 = vadd.f32 %v642_v35, %v641_v33  ;;  %v649_v40 = vadd.f32 %v648_v36, %v647_v34 }
 0x10b   : > { %v437_v43 = vadd.f32 %v643_v39, %v271_v42  ;;  %v445_v44 = vadd.f32 %v649_v40, %v281_v41  ;;  %v448_v45 = vmax.f32 %v434_v37, 0.0  ;;  %v450_v46 = vmax.f32 %v442_v38, 0.0 }
 0x10d   : > { %v449_v47 = vmax.f32 %v437_v43, 0.0  ;;  %v451_v48 = vmax.f32 %v445_v44, 0.0 }
 0x10f   : > { %v614_v49 = vpack.c.bf16 %v449_v47, %v448_v45  ;;  %v619_v50 = vpack.c.bf16 %v451_v48, %v450_v46 }
 0x111   : > { %615 = vst [vmem:[%s221_s8] sm:$0xff] %v614_v49   ;;  %621 = vst [vmem:[%s221_s8 + $0x8] sm:$0xff] %v619_v50  }
 0x112 PF: > { %s13_s14 = sadd.s32 1, %s737_s14   ;;  %s835_s12 = smov %s733_s13 }
 0x113   : > { %p10_p5 = scmp.ge.s32.totalorder %s13_s14, 6   ;;  %s836_s13 = smov %s838_s15 }
 0x115   :  { %12 = sbr.rel (!%p10_p5) target bundleno = 2 (0x2), region = 65 }

// kernel: vae_forward.16
= control target key start
LH: loop header
LB: loop body
LE: loop exit
PB: predicated region body
PF: predicated region fallthrough
CT: control target
= control target key end

     0   :  { %s892_s12 = smov 0   ;;  %s894_s13 = smov 0   ;;  %s1049_s0 = inlined_call_operand.vmem [shape: bf16[4,32,128], index: 0, kind: input, shape index: {}]   ;;  %s1050_s1 = inlined_call_operand.vmem [shape: bf16[4,128,512], index: 1, kind: input, shape index: {}]   ;;  %s1051_s2 = inlined_call_operand.vmem [shape: f32[32,1], index: 2, kind: input, shape index: {}]   ;;  %s1052_s3 = inlined_call_operand.vmem [shape: bf16[4,32,512], index: 3, kind: output, shape index: {}]  }
   0x1   :  { %s896_s14 = smov 0   ;;  %s898_s15 = smov 0  }
   0x2   :  { %s900_s16 = smov 0   ;;  %s902_s17 = smov 0  }
   0x3   :  { %s904_s18 = smov 0  }
   0x4 LB: > { %s22_s19 = sadd.s32 1, %s861_s16  ;;  %s25_s20 = sadd.s32 1, %s865_s17  ;;  %s869_s18 = sphi %s904_s18, %s13_s18   ;;  %s865_s17 = sphi %s902_s17, %s1059_s17   ;;  %s861_s16 = sphi %s900_s16, %s1058_s16   ;;  %s857_s15 = sphi %s898_s15, %s1057_s15   ;;  %s853_s14 = sphi %s896_s14, %s1056_s14   ;;  %s849_s13 = sphi %s894_s13, %s1055_s13   ;;  %s845_s12 = sphi %s892_s12, %s1054_s12  }
   0x5   : > { %p23_p0 = scmp.ge.s32.totalorder %s22_s19, 2  ;;  %s668_s21 = sadd.s32 4294967295, %s869_s18  }
   0x6   : > { %p67_p1 = scmp.ne.s32.totalorder %s849_s13, %s845_s12  ;;  %p68_p2 = scmp.eq.s32.totalorder %s869_s18, 0 }
   0x7   : > { %s1061_s19 = smov (%p23_p0, %s22_s19), 0  ;;  %s1063_s20 = smov (!%p23_p0, %s25_s20), %s865_s17 }
   0x8   : > { %p27_p3 = scmp.ge.s32.totalorder %s1063_s20, 4  ;;  %p120_p4 = scmp.eq.s32.totalorder %s668_s21, 7 }
   0x9   : > { %s56_s22 = ssub.s32 %s861_s16, %s1061_s19  ;;  %p69_p5 = por %p68_p2, %p67_p1 }
   0xa   : > { %s1065_s20 = smov (%p27_p3, %s1063_s20), 0  ;;  %p940_p6 = por %p120_p4, %p67_p1 }
   0xb   : > { %s55_s24 = ssub.s32 %s865_s17, %s1065_s20  ;;  %s60_s26 = sadd.s32 1, %s849_s13 }
   0xc   : > { %s57_s25 = sor.u32 %s56_s22, %s55_s24  ;;  %p671_p8 = scmp.ge.s32.totalorder %s869_s18, 8 }
   0xd   : > { %p58_p7 = scmp.eq.s32.totalorder %s57_s25, 0 }
   0xe   : > { %145 = sbr.rel (%p671_p8) target bundleno = 36 (0x24), region = 20 }
   0xf   : > { %s948_s27 = scalar_select %p58_p7, %s849_s13, %s60_s26  }
  0x15   : > { %156 = sbr.rel (!%p69_p5) target bundleno = 36 (0x24), region = 28  ;;  %s158_s28 = sand.u32 (%p69_p5), 1, %s849_s13  }
  0x16   : > { %s673_s29 = sshll.u32 (%p69_p5), %s861_s16, 1  ;;  %s672_s30 = sshll.u32 (%p69_p5), %s158_s28, 7 }
  0x17   : > { %s674_s4 = sshll.u32 (%p69_p5), %s865_s17, 6  ;;  %s160_s10 = scalar_lea.vmem (%p69_p5), [#allocation2], %s672_s30 }
  0x18   : > { %s163_s5 = sadd.s32 (%p69_p5), %s674_s4, %s673_s29 }
  0x19   : > { %s675_s6 = sshll.u32 (%p69_p5), %s163_s5, 2 }
  0x1a   : > { %s957_s9 = scalar_lea.vmem (%p69_p5), %s1050_s1, %s675_s6 }
  0x1b   : > { %v223_v0 = vld [vmem:[%s957_s9] sm:$0xff] (%p69_p5)  ;;  %v225_v1 = vld [vmem:[%s957_s9 + $0x10] sm:$0xff] (%p69_p5) }
  0x1c   : > { %v227_v2 = vld [vmem:[%s957_s9 + $0x20] sm:$0xff]  ;;  %224 = vst [vmem:[%s160_s10] sm:$0xff] %v223_v0  ;;  %226 = vst [vmem:[%s160_s10 + $0x8] sm:$0xff] %v225_v1  ;;  %v229_v3 = vld [vmem:[%s957_s9 + $0x30] sm:$0xff] }
  0x1d   : > { %228 = vst [vmem:[%s160_s10 + $0x10] sm:$0xff] %v227_v2  ;;  %v231_v4 = vld [vmem:[%s957_s9 + $0x40] sm:$0xff]  ;;  %v233_v5 = vld [vmem:[%s957_s9 + $0x50] sm:$0xff]  ;;  %230 = vst [vmem:[%s160_s10 + $0x18] sm:$0xff] %v229_v3 }
  0x1e   : > { %232 = vst [vmem:[%s160_s10 + $0x20] sm:$0xff] %v231_v4  ;;  %234 = vst [vmem:[%s160_s10 + $0x28] sm:$0xff] %v233_v5  ;;  %v235_v6 = vld [vmem:[%s957_s9 + $0x60] sm:$0xff]  ;;  %v237_v7 = vld [vmem:[%s957_s9 + $0x70] sm:$0xff] }
  0x1f   : > { %v239_v8 = vld [vmem:[%s957_s9 + $0x80] sm:$0xff]  ;;  %236 = vst [vmem:[%s160_s10 + $0x30] sm:$0xff] %v235_v6  ;;  %238 = vst [vmem:[%s160_s10 + $0x38] sm:$0xff] %v237_v7  ;;  %v241_v9 = vld [vmem:[%s957_s9 + $0x90] sm:$0xff] }
  0x20   : > { %240 = vst [vmem:[%s160_s10 + $0x40] sm:$0xff] %v239_v8  ;;  %v243_v10 = vld [vmem:[%s957_s9 + $0xa0] sm:$0xff]  ;;  %v245_v11 = vld [vmem:[%s957_s9 + $0xb0] sm:$0xff]  ;;  %242 = vst [vmem:[%s160_s10 + $0x48] sm:$0xff] %v241_v9 }
  0x21   : > { %244 = vst [vmem:[%s160_s10 + $0x50] sm:$0xff] %v243_v10  ;;  %246 = vst [vmem:[%s160_s10 + $0x58] sm:$0xff] %v245_v11  ;;  %v247_v12 = vld [vmem:[%s957_s9 + $0xc0] sm:$0xff]  ;;  %v249_v13 = vld [vmem:[%s957_s9 + $0xd0] sm:$0xff] }
  0x22   : > { %v251_v14 = vld [vmem:[%s957_s9 + $0xe0] sm:$0xff]  ;;  %248 = vst [vmem:[%s160_s10 + $0x60] sm:$0xff] %v247_v12  ;;  %250 = vst [vmem:[%s160_s10 + $0x68] sm:$0xff] %v249_v13  ;;  %v253_v15 = vld [vmem:[%s957_s9 + $0xf0] sm:$0xff] }
  0x23   : > { %252 = vst [vmem:[%s160_s10 + $0x70] sm:$0xff] %v251_v14  ;;  %254 = vst [vmem:[%s160_s10 + $0x78] sm:$0xff] %v253_v15 }
  0x24 PF: > { %p676_p9 = scmp.ge.s32.totalorder %s869_s18, 1  ;;  %p259_p10 = scmp.lt.s32.totalorder %s869_s18, 9 }
  0x26   : > { %p260_p11 = pnand %p676_p9, %p259_p10 }
  0x27   : > { %s266_s11 = sand.u32 (!%p260_p11), 1, %s845_s12   ;;  %v323_v16 = vld [vmem:[%s1051_s2 + $0x10] sm:$0xff] (!%p260_p11)  ;;  %v321_v17 = vld [vmem:[%s1051_s2] sm:$0xff] (!%p260_p11)  ;;  %v871_v18 = vmov (!%p260_p11), 0   ;;  %p293_p12 = scmp.lt.s32.totalorder (!%p260_p11), %s857_s15, 3  ;;  %v324_v20 = vld [vmem:[%s1051_s2 + $0x18] sm:$0xff] (!%p260_p11) }
  0x28   : > { %263 = sbr.rel (%p260_p11) target bundleno = 305 (0x131), region = 66  ;;  %s677_s26 = sshll.u32 (!%p260_p11), %s266_s11, 7  ;;  %469 = vmatprep.mubr.bf16.mxu0 (!%p260_p11), %v871_v18  ;;  %479 = vmatprep.mubr.bf16.mxu1 (!%p260_p11), %v871_v18  ;;  %v322_v23 = vld [vmem:[%s1051_s2 + $0x8] sm:$0xff] (!%p260_p11) }
  0x29   : > { %788 = vset.pattern.permute.xlu1 (!%p260_p11), %v871_v18  ;;  %787 = vset.pattern.permute.xlu0 (!%p260_p11), %v871_v18  ;;  %s987_s28 = scalar_lea.vmem (!%p260_p11), [#allocation2], %s677_s26  ;;  %s678_s21 = sshll.u32 (!%p260_p11), %s266_s11, 5 }
  0x2a   : > { %v789_v19 = vld [vmem:[%s987_s28 + $0x4] ss:$8 sps:$4 sm:$0xff] (!%p260_p11)   ;;  %337 = vperm.xlu1 (!%p260_p11), %788, %v323_v16   ;;  %327 = vperm.xlu0 (!%p260_p11), %787, %v321_v17   ;;  %v791_v21 = vld [vmem:[%s987_s28] ss:$8 sps:$4 sm:$0xff] (!%p260_p11)   ;;  %v792_v22 = vld [vmem:[%s987_s28 + $0x14] ss:$8 sps:$4 sm:$0xff] (!%p260_p11)  }
  0x2b   : > { %437 = vmatprep.subr.bf16.mxu0 (!%p260_p11), %v789_v19  ;;  %714 = vmatprep.subr.bf16.mxu1 (!%p260_p11), %v789_v19  ;;  %v794_v24 = vld [vmem:[%s987_s28 + $0x10] ss:$8 sps:$4 sm:$0xff] (!%p260_p11)   ;;  %v795_v25 = vld [vmem:[%s987_s28 + $0x24] ss:$8 sps:$4 sm:$0xff] (!%p260_p11)   ;;  %v797_v26 = vld [vmem:[%s987_s28 + $0x20] ss:$8 sps:$4 sm:$0xff] (!%p260_p11)  }
  0x2c   : > { %438 = vmatpush1.bf16.msra.mxu0 (!%p260_p11), %v791_v21  ;;  %722 = vmatpush1.bf16.msra.mxu1 (!%p260_p11), %v791_v21  ;;  %v798_v27 = vld [vmem:[%s987_s28 + $0x34] ss:$8 sps:$4 sm:$0xff] (!%p260_p11)   ;;  %v800_v28 = vld [vmem:[%s987_s28 + $0x30] ss:$8 sps:$4 sm:$0xff] (!%p260_p11)   ;;  %v801_v29 = vld [vmem:[%s987_s28 + $0x44] ss:$8 sps:$4 sm:$0xff] (!%p260_p11)  }
  0x2d   : > { %439 = vmatprep.subr.bf16.mxu0 (!%p260_p11), %v792_v22  ;;  %715 = vmatprep.subr.bf16.mxu1 (!%p260_p11), %v792_v22  ;;  %v803_v30 = vld [vmem:[%s987_s28 + $0x40] ss:$8 sps:$4 sm:$0xff] (!%p260_p11)   ;;  %v804_v31 = vld [vmem:[%s987_s28 + $0x54] ss:$8 sps:$4 sm:$0xff] (!%p260_p11)   ;;  %v806_v32 = vld [vmem:[%s987_s28 + $0x50] ss:$8 sps:$4 sm:$0xff] (!%p260_p11)  }
  0x2e   : > { %342 = vperm.xlu1 (!%p260_p11), %788, %v324_v20   ;;  %332 = vperm.xlu0 (!%p260_p11), %787, %v322_v23   ;;  %v807_v33 = vld [vmem:[%s987_s28 + $0x64] ss:$8 sps:$4 sm:$0xff] (!%p260_p11)   ;;  %v809_v34 = vld [vmem:[%s987_s28 + $0x60] ss:$8 sps:$4 sm:$0xff] (!%p260_p11)   ;;  %v810_v35 = vld [vmem:[%s987_s28 + $0x74] ss:$8 sps:$4 sm:$0xff] (!%p260_p11)  }
  0x2f   : > { %s294_s4 = scalar_select %p293_p12, %s857_s15, 3  ;;  %v812_v36 = vld [vmem:[%s987_s28 + $0x70] ss:$8 sps:$4 sm:$0xff]  }
  0x30   : > { %440 = vmatpush1.bf16.msra.mxu0 %v794_v24  ;;  %723 = vmatpush1.bf16.msra.mxu1 %v794_v24  ;;  %s292_s12 = scalar_lea.vmem [#allocation3], %s678_s21  ;;  %s704_s11 = sshll.u32 (%p940_p6), %s853_s14, 1 }
  0x31   : > { %s709_s7 = sshll.u32 %s294_s4, 4  ;;  %441 = vmatprep.subr.bf16.mxu0 %v795_v25  ;;  %716 = vmatprep.subr.bf16.mxu1 %v795_v25  ;;  %s705_s22 = sshll.u32 (%p940_p6), %s857_s15, 4 }
  0x32   : > { %s1006_s10 = scalar_lea.vmem %s1049_s0, %s709_s7  ;;  %s535_s24 = sadd.s32 (%p940_p6), %s705_s22, %s704_s11 }
  0x33   : > { %v813_v37 = vld [vmem:[%s1006_s10] sm:$0xff]   ;;  %v814_v38 = vld [vmem:[%s1006_s10 + $0x8] sm:$0xff]   ;;  %s706_s25 = sshll.u32 (%p940_p6), %s535_s24, 2 }
  0x34   : > { %442 = vmatpush1.bf16.msra.mxu0 %v797_v26  ;;  %724 = vmatpush1.bf16.msra.mxu1 %v797_v26  ;;  %s537_s29 = scalar_lea.vmem (%p940_p6), %s1052_s3, %s706_s25 }
  0x35   : > { %443 = vmatprep.subr.bf16.mxu0 %v798_v27  ;;  %717 = vmatprep.subr.bf16.mxu1 %v798_v27 }
  0x38   : > { %444 = vmatpush1.bf16.msra.mxu0 %v800_v28  ;;  %725 = vmatpush1.bf16.msra.mxu1 %v800_v28 }
  0x39   : > { %445 = vmatprep.subr.bf16.mxu0 %v801_v29  ;;  %718 = vmatprep.subr.bf16.mxu1 %v801_v29 }
  0x3c   : > { %446 = vmatpush1.bf16.msra.mxu0 %v803_v30  ;;  %726 = vmatpush1.bf16.msra.mxu1 %v803_v30 }
  0x3d   : > { %447 = vmatprep.subr.bf16.mxu0 %v804_v31  ;;  %719 = vmatprep.subr.bf16.mxu1 %v804_v31 }
  0x40   : > { %448 = vmatpush1.bf16.msra.mxu0 %v806_v32  ;;  %727 = vmatpush1.bf16.msra.mxu1 %v806_v32 }
  0x41   : > { %449 = vmatprep.subr.bf16.mxu0 %v807_v33  ;;  %720 = vmatprep.subr.bf16.mxu1 %v807_v33 }
  0x44   : > { %450 = vmatpush1.bf16.msra.mxu0 %v809_v34  ;;  %728 = vmatpush1.bf16.msra.mxu1 %v809_v34 }
  0x45   : > { %451 = vmatprep.subr.bf16.mxu0 %v810_v35  ;;  %721 = vmatprep.subr.bf16.mxu1 %v810_v35 }
  0x48   : > { %452 = vmatpush1.bf16.msra.mxu0 %v812_v36  ;;  %729 = vmatpush1.bf16.msra.mxu1 %v812_v36 }
  0x4b   : > { %470 = vmatmul.mubr.bf16.vlgmr.msra.gmra.mrb[0].mxu0 %v813_v37  ;;  %480 = vmatmul.mubr.bf16.vlgmr.msra.gmra.mrb[0].mxu1 %v814_v38 }
  0xa9   : > { %v338_v39 = vpop.permute.xlu1 %337  ;;  %v328_v40 = vpop.permute.xlu0 %327 }
  0xad   : > { %v343_v41 = vpop.permute.xlu1 %342  ;;  %v333_v42 = vpop.permute.xlu0 %332 }
 0x11e   : > { %v471_v43 = vpop.f32.mrb[0].mxu0  ;;  %v481_v44 = vpop.f32.mrb[0].mxu1 }
 0x11f   : > { %v472_v45 = vadd.f32 %v471_v43, %v328_v40  ;;  %v482_v46 = vadd.f32 %v481_v44, %v338_v39  ;;  %v473_v47 = vpop.f32.mrb[1].mxu0  ;;  %v483_v48 = vpop.f32.mrb[1].mxu1 }
 0x120   : > { %v474_v49 = vadd.f32 %v473_v47, %v328_v40  ;;  %v484_v50 = vadd.f32 %v483_v48, %v338_v39  ;;  %v475_v51 = vpop.f32.mrb[2].mxu0  ;;  %v485_v52 = vpop.f32.mrb[2].mxu1 }
 0x121   : > { %v490_v53 = vmax.f32 %v472_v45, 0.0  ;;  %v494_v54 = vmax.f32 %v482_v46, 0.0  ;;  %v476_v55 = vadd.f32 %v475_v51, %v333_v42  ;;  %v486_v56 = vadd.f32 %v485_v52, %v343_v41  ;;  %v477_v57 = vpop.f32.mrb[3].mxu0  ;;  %v487_v58 = vpop.f32.mrb[3].mxu1 }
 0x122   : > { %v491_v59 = vmax.f32 %v474_v49, 0.0  ;;  %v495_v60 = vmax.f32 %v484_v50, 0.0  ;;  %v478_v61 = vadd.f32 %v477_v57, %v333_v42  ;;  %v488_v62 = vadd.f32 %v487_v58, %v343_v41  ;;  %532 = sbr.rel (!%p940_p6) target bundleno = 305 (0x131), region = 74 }
 0x123   : > { %v492_v63 = vmax.f32 %v476_v55, 0.0  ;;  %v496_v0 = vmax.f32 %v486_v56, 0.0 }
 0x124   : > { %v710_v1 = vpack.c.bf16 %v491_v59, %v490_v53  ;;  %v712_v2 = vpack.c.bf16 %v495_v60, %v494_v54  ;;  %v493_v3 = vmax.f32 %v478_v61, 0.0  ;;  %v497_v4 = vmax.f32 %v488_v62, 0.0 }
 0x126   : > { %522 = vst [vmem:[%s292_s12] sm:$0xff] %v710_v1  ;;  %524 = vst [vmem:[%s292_s12 + $0x10] sm:$0xff] %v712_v2  ;;  %v711_v5 = vpack.c.bf16 %v493_v3, %v492_v63  ;;  %v713_v6 = vpack.c.bf16 %v497_v4, %v496_v0 }
 0x128   : > { %523 = vst [vmem:[%s292_s12 + $0x8] sm:$0xff] %v711_v5  ;;  %525 = vst [vmem:[%s292_s12 + $0x18] sm:$0xff] %v713_v6 }
 0x12d   : > { %v571_v7 = vld [vmem:[%s292_s12] sm:$0xff]  ;;  %v575_v9 = vld [vmem:[%s292_s12 + $0x10] sm:$0xff] }
 0x12e   : > { %572 = vst [vmem:[%s537_s29] sm:$0xff] %v571_v7  ;;  %576 = vst [vmem:[%s537_s29 + $0x20] sm:$0xff] %v575_v9 }
 0x12f   : > { %v573_v8 = vld [vmem:[%s292_s12 + $0x8] sm:$0xff]  ;;  %v577_v10 = vld [vmem:[%s292_s12 + $0x18] sm:$0xff] }
 0x130   : > { %574 = vst [vmem:[%s537_s29 + $0x10] sm:$0xff] %v573_v8  ;;  %578 = vst [vmem:[%s537_s29 + $0x30] sm:$0xff] %v577_v10 }
 0x131 PF: > { %s13_s18 = sadd.s32 1, %s869_s18   ;;  %s1054_s12 = smov %s849_s13 }
 0x132   : > { %p10_p13 = scmp.ge.s32.totalorder %s13_s18, 10   ;;  %s1055_s13 = smov %s948_s27 }
 0x133   : > { %s1056_s14 = smov %s861_s16  ;;  %s1057_s15 = smov %s865_s17 }
 0x134   : > { %s1058_s16 = smov %s1061_s19  ;;  %s1059_s17 = smov %s1065_s20 }
 0x135   :  { %12 = sbr.rel (!%p10_p13) target bundleno = 4 (0x4), region = 146 }

// kernel: vae_forward.17
= control target key start
LH: loop header
LB: loop body
LE: loop exit
PB: predicated region body
PF: predicated region fallthrough
CT: control target
= control target key end

     0   :  { %s1282_s12 = smov 0   ;;  %s1284_s13 = smov 0   ;;  %s1597_s0 = inlined_call_operand.vmem [shape: bf16[4,3,128], index: 0, kind: input, shape index: {}]   ;;  %s1598_s1 = inlined_call_operand.vmem [shape: bf16[4,128,2048], index: 1, kind: input, shape index: {}]   ;;  %s1599_s2 = inlined_call_operand.vmem [shape: f32[3,1], index: 2, kind: input, shape index: {}]   ;;  %s1600_s3 = inlined_call_operand.vmem [shape: f32[4,3,2048], index: 3, kind: output, shape index: {}]  }
   0x1   :  { %s1286_s14 = smov 0   ;;  %s1288_s15 = smov 0  }
   0x2   :  { %s1290_s16 = smov 0   ;;  %s1292_s17 = smov 0  }
   0x3   :  { %s1294_s18 = smov 0  }
   0x4 LB: > { %s22_s19 = sadd.s32 1, %s1251_s16  ;;  %s25_s20 = sadd.s32 1, %s1255_s17  ;;  %s1259_s18 = sphi %s1294_s18, %s13_s18   ;;  %s1255_s17 = sphi %s1292_s17, %s1607_s17   ;;  %s1251_s16 = sphi %s1290_s16, %s1606_s16   ;;  %s1247_s15 = sphi %s1288_s15, %s1605_s15   ;;  %s1243_s14 = sphi %s1286_s14, %s1604_s14   ;;  %s1239_s13 = sphi %s1284_s13, %s1603_s13   ;;  %s1235_s12 = sphi %s1282_s12, %s1602_s12  }
   0x5   : > { %p23_p0 = scmp.ge.s32.totalorder %s22_s19, 2  ;;  %p67_p1 = scmp.ne.s32.totalorder %s1239_s13, %s1235_s12 }
   0x6   : > { %p68_p2 = scmp.eq.s32.totalorder %s1259_s18, 0  ;;  %s60_s24 = sadd.s32 1, %s1239_s13 }
   0x7   : > { %s1609_s19 = smov (%p23_p0, %s22_s19), 0  ;;  %s1611_s20 = smov (!%p23_p0, %s25_s20), %s1255_s17 }
   0x8   : > { %p69_p3 = por %p68_p2, %p67_p1  ;;  %p27_p4 = scmp.ge.s32.totalorder %s1611_s20, 4 }
   0x9   : > { %s56_s21 = ssub.s32 %s1251_s16, %s1609_s19  ;;  %p1054_p6 = scmp.ge.s32.totalorder %s1259_s18, 8 }
   0xa   : > { %s1613_s20 = smov (%p27_p4, %s1611_s20), 0 }
   0xb   : > { %s55_s22 = ssub.s32 %s1255_s17, %s1613_s20  ;;  %145 = sbr.rel (%p1054_p6) target bundleno = 57 (0x39), region = 20 }
   0xc   : > { %s57_s23 = sor.u32 %s56_s21, %s55_s22 }
   0xd   : > { %p58_p5 = scmp.eq.s32.totalorder %s57_s23, 0 }
   0xf   : > { %s1333_s25 = scalar_select %p58_p5, %s1239_s13, %s60_s24  }
  0x12   : > { %155 = sbr.rel (!%p69_p3) target bundleno = 57 (0x39), region = 28  ;;  %s157_s26 = sand.u32 (%p69_p3), 1, %s1239_s13  }
  0x13   : > { %s1056_s27 = sshll.u32 (%p69_p3), %s1251_s16, 3  ;;  %s1055_s28 = sshll.u32 (%p69_p3), %s157_s26, 9 }
  0x14   : > { %s1057_s29 = sshll.u32 (%p69_p3), %s1255_s17, 8  ;;  %s1347_s8 = scalar_lea.vmem (%p69_p3), [#allocation2], %s1055_s28 }
  0x15   : > { %s162_s30 = sadd.s32 (%p69_p3), %s1057_s29, %s1056_s27 }
  0x16   : > { %s1058_s4 = sshll.u32 (%p69_p3), %s162_s30, 2 }
  0x17   : > { %s1342_s7 = scalar_lea.vmem (%p69_p3), %s1598_s1, %s1058_s4 }
  0x18   : > { %v177_v0 = vld [vmem:[%s1342_s7] sm:$0xff] (%p69_p3)  ;;  %v179_v1 = vld [vmem:[%s1342_s7 + $0x8] sm:$0xff] (%p69_p3)  ;;  %v181_v2 = vld [vmem:[%s1342_s7 + $0x10] sm:$0xff] (%p69_p3) }
  0x19   : > { %178 = vst [vmem:[%s1347_s8] sm:$0xff] %v177_v0  ;;  %180 = vst [vmem:[%s1347_s8 + $0x8] sm:$0xff] %v179_v1  ;;  %v183_v3 = vld [vmem:[%s1342_s7 + $0x18] sm:$0xff]  ;;  %v185_v4 = vld [vmem:[%s1342_s7 + $0x40] sm:$0xff] }
  0x1a   : > { %182 = vst [vmem:[%s1347_s8 + $0x10] sm:$0xff] %v181_v2  ;;  %v187_v5 = vld [vmem:[%s1342_s7 + $0x48] sm:$0xff]  ;;  %184 = vst [vmem:[%s1347_s8 + $0x18] sm:$0xff] %v183_v3  ;;  %v189_v6 = vld [vmem:[%s1342_s7 + $0x50] sm:$0xff] }
  0x1b   : > { %186 = vst [vmem:[%s1347_s8 + $0x20] sm:$0xff] %v185_v4  ;;  %188 = vst [vmem:[%s1347_s8 + $0x28] sm:$0xff] %v187_v5  ;;  %v191_v7 = vld [vmem:[%s1342_s7 + $0x58] sm:$0xff]  ;;  %v193_v8 = vld [vmem:[%s1342_s7 + $0x80] sm:$0xff] }
  0x1c   : > { %190 = vst [vmem:[%s1347_s8 + $0x30] sm:$0xff] %v189_v6  ;;  %192 = vst [vmem:[%s1347_s8 + $0x38] sm:$0xff] %v191_v7  ;;  %v195_v9 = vld [vmem:[%s1342_s7 + $0x88] sm:$0xff]  ;;  %v197_v10 = vld [vmem:[%s1342_s7 + $0x90] sm:$0xff] }
  0x1d   : > { %194 = vst [vmem:[%s1347_s8 + $0x40] sm:$0xff] %v193_v8  ;;  %v199_v11 = vld [vmem:[%s1342_s7 + $0x98] sm:$0xff]  ;;  %196 = vst [vmem:[%s1347_s8 + $0x48] sm:$0xff] %v195_v9  ;;  %v201_v12 = vld [vmem:[%s1342_s7 + $0xc0] sm:$0xff] }
  0x1e   : > { %198 = vst [vmem:[%s1347_s8 + $0x50] sm:$0xff] %v197_v10  ;;  %200 = vst [vmem:[%s1347_s8 + $0x58] sm:$0xff] %v199_v11  ;;  %v203_v13 = vld [vmem:[%s1342_s7 + $0xc8] sm:$0xff]  ;;  %v205_v14 = vld [vmem:[%s1342_s7 + $0xd0] sm:$0xff] }
  0x1f   : > { %202 = vst [vmem:[%s1347_s8 + $0x60] sm:$0xff] %v201_v12  ;;  %204 = vst [vmem:[%s1347_s8 + $0x68] sm:$0xff] %v203_v13  ;;  %v207_v15 = vld [vmem:[%s1342_s7 + $0xd8] sm:$0xff]  ;;  %v209_v16 = vld [vmem:[%s1342_s7 + $0x100] sm:$0xff] }
  0x20   : > { %206 = vst [vmem:[%s1347_s8 + $0x70] sm:$0xff] %v205_v14  ;;  %v211_v17 = vld [vmem:[%s1342_s7 + $0x108] sm:$0xff]  ;;  %208 = vst [vmem:[%s1347_s8 + $0x78] sm:$0xff] %v207_v15  ;;  %v213_v18 = vld [vmem:[%s1342_s7 + $0x110] sm:$0xff] }
  0x21   : > { %210 = vst [vmem:[%s1347_s8 + $0x80] sm:$0xff] %v209_v16  ;;  %212 = vst [vmem:[%s1347_s8 + $0x88] sm:$0xff] %v211_v17  ;;  %v215_v19 = vld [vmem:[%s1342_s7 + $0x118] sm:$0xff]  ;;  %v217_v20 = vld [vmem:[%s1342_s7 + $0x140] sm:$0xff] }
  0x22   : > { %214 = vst [vmem:[%s1347_s8 + $0x90] sm:$0xff] %v213_v18  ;;  %216 = vst [vmem:[%s1347_s8 + $0x98] sm:$0xff] %v215_v19  ;;  %v219_v21 = vld [vmem:[%s1342_s7 + $0x148] sm:$0xff]  ;;  %v221_v22 = vld [vmem:[%s1342_s7 + $0x150] sm:$0xff] }
  0x23   : > { %218 = vst [vmem:[%s1347_s8 + $0xa0] sm:$0xff] %v217_v20  ;;  %v223_v23 = vld [vmem:[%s1342_s7 + $0x158] sm:$0xff]  ;;  %220 = vst [vmem:[%s1347_s8 + $0xa8] sm:$0xff] %v219_v21  ;;  %v225_v24 = vld [vmem:[%s1342_s7 + $0x180] sm:$0xff] }
  0x24   : > { %222 = vst [vmem:[%s1347_s8 + $0xb0] sm:$0xff] %v221_v22  ;;  %224 = vst [vmem:[%s1347_s8 + $0xb8] sm:$0xff] %v223_v23  ;;  %v227_v25 = vld [vmem:[%s1342_s7 + $0x188] sm:$0xff]  ;;  %v229_v26 = vld [vmem:[%s1342_s7 + $0x190] sm:$0xff] }
  0x25   : > { %226 = vst [vmem:[%s1347_s8 + $0xc0] sm:$0xff] %v225_v24  ;;  %228 = vst [vmem:[%s1347_s8 + $0xc8] sm:$0xff] %v227_v25  ;;  %v231_v27 = vld [vmem:[%s1342_s7 + $0x198] sm:$0xff]  ;;  %v233_v28 = vld [vmem:[%s1342_s7 + $0x1c0] sm:$0xff] }
  0x26   : > { %230 = vst [vmem:[%s1347_s8 + $0xd0] sm:$0xff] %v229_v26  ;;  %v235_v29 = vld [vmem:[%s1342_s7 + $0x1c8] sm:$0xff]  ;;  %232 = vst [vmem:[%s1347_s8 + $0xd8] sm:$0xff] %v231_v27  ;;  %v237_v30 = vld [vmem:[%s1342_s7 + $0x1d0] sm:$0xff] }
  0x27   : > { %234 = vst [vmem:[%s1347_s8 + $0xe0] sm:$0xff] %v233_v28  ;;  %236 = vst [vmem:[%s1347_s8 + $0xe8] sm:$0xff] %v235_v29  ;;  %v239_v31 = vld [vmem:[%s1342_s7 + $0x1d8] sm:$0xff]  ;;  %v241_v32 = vld [vmem:[%s1342_s7 + $0x200] sm:$0xff] }
  0x28   : > { %238 = vst [vmem:[%s1347_s8 + $0xf0] sm:$0xff] %v237_v30  ;;  %240 = vst [vmem:[%s1347_s8 + $0xf8] sm:$0xff] %v239_v31  ;;  %v243_v33 = vld [vmem:[%s1342_s7 + $0x208] sm:$0xff]  ;;  %v245_v34 = vld [vmem:[%s1342_s7 + $0x210] sm:$0xff] }
  0x29   : > { %242 = vst [vmem:[%s1347_s8 + $0x100] sm:$0xff] %v241_v32  ;;  %v247_v35 = vld [vmem:[%s1342_s7 + $0x218] sm:$0xff]  ;;  %244 = vst [vmem:[%s1347_s8 + $0x108] sm:$0xff] %v243_v33  ;;  %v249_v36 = vld [vmem:[%s1342_s7 + $0x240] sm:$0xff] }
  0x2a   : > { %246 = vst [vmem:[%s1347_s8 + $0x110] sm:$0xff] %v245_v34  ;;  %248 = vst [vmem:[%s1347_s8 + $0x118] sm:$0xff] %v247_v35  ;;  %v251_v37 = vld [vmem:[%s1342_s7 + $0x248] sm:$0xff]  ;;  %v253_v38 = vld [vmem:[%s1342_s7 + $0x250] sm:$0xff] }
  0x2b   : > { %250 = vst [vmem:[%s1347_s8 + $0x120] sm:$0xff] %v249_v36  ;;  %252 = vst [vmem:[%s1347_s8 + $0x128] sm:$0xff] %v251_v37  ;;  %v255_v39 = vld [vmem:[%s1342_s7 + $0x258] sm:$0xff]  ;;  %v257_v40 = vld [vmem:[%s1342_s7 + $0x280] sm:$0xff] }
  0x2c   : > { %254 = vst [vmem:[%s1347_s8 + $0x130] sm:$0xff] %v253_v38  ;;  %v259_v41 = vld [vmem:[%s1342_s7 + $0x288] sm:$0xff]  ;;  %256 = vst [vmem:[%s1347_s8 + $0x138] sm:$0xff] %v255_v39  ;;  %v261_v42 = vld [vmem:[%s1342_s7 + $0x290] sm:$0xff] }
  0x2d   : > { %258 = vst [vmem:[%s1347_s8 + $0x140] sm:$0xff] %v257_v40  ;;  %260 = vst [vmem:[%s1347_s8 + $0x148] sm:$0xff] %v259_v41  ;;  %v263_v43 = vld [vmem:[%s1342_s7 + $0x298] sm:$0xff]  ;;  %v265_v44 = vld [vmem:[%s1342_s7 + $0x2c0] sm:$0xff] }
  0x2e   : > { %262 = vst [vmem:[%s1347_s8 + $0x150] sm:$0xff] %v261_v42  ;;  %264 = vst [vmem:[%s1347_s8 + $0x158] sm:$0xff] %v263_v43  ;;  %v267_v45 = vld [vmem:[%s1342_s7 + $0x2c8] sm:$0xff]  ;;  %v269_v46 = vld [vmem:[%s1342_s7 + $0x2d0] sm:$0xff] }
  0x2f   : > { %266 = vst [vmem:[%s1347_s8 + $0x160] sm:$0xff] %v265_v44  ;;  %v271_v47 = vld [vmem:[%s1342_s7 + $0x2d8] sm:$0xff]  ;;  %268 = vst [vmem:[%s1347_s8 + $0x168] sm:$0xff] %v267_v45  ;;  %v273_v48 = vld [vmem:[%s1342_s7 + $0x300] sm:$0xff] }
  0x30   : > { %270 = vst [vmem:[%s1347_s8 + $0x170] sm:$0xff] %v269_v46  ;;  %272 = vst [vmem:[%s1347_s8 + $0x178] sm:$0xff] %v271_v47  ;;  %v275_v49 = vld [vmem:[%s1342_s7 + $0x308] sm:$0xff]  ;;  %v277_v50 = vld [vmem:[%s1342_s7 + $0x310] sm:$0xff] }
  0x31   : > { %274 = vst [vmem:[%s1347_s8 + $0x180] sm:$0xff] %v273_v48  ;;  %276 = vst [vmem:[%s1347_s8 + $0x188] sm:$0xff] %v275_v49  ;;  %v279_v51 = vld [vmem:[%s1342_s7 + $0x318] sm:$0xff]  ;;  %v281_v52 = vld [vmem:[%s1342_s7 + $0x340] sm:$0xff] }
  0x32   : > { %278 = vst [vmem:[%s1347_s8 + $0x190] sm:$0xff] %v277_v50  ;;  %v283_v53 = vld [vmem:[%s1342_s7 + $0x348] sm:$0xff]  ;;  %280 = vst [vmem:[%s1347_s8 + $0x198] sm:$0xff] %v279_v51  ;;  %v285_v54 = vld [vmem:[%s1342_s7 + $0x350] sm:$0xff] }
  0x33   : > { %282 = vst [vmem:[%s1347_s8 + $0x1a0] sm:$0xff] %v281_v52  ;;  %284 = vst [vmem:[%s1347_s8 + $0x1a8] sm:$0xff] %v283_v53  ;;  %v287_v55 = vld [vmem:[%s1342_s7 + $0x358] sm:$0xff]  ;;  %v289_v56 = vld [vmem:[%s1342_s7 + $0x380] sm:$0xff] }
  0x34   : > { %286 = vst [vmem:[%s1347_s8 + $0x1b0] sm:$0xff] %v285_v54  ;;  %288 = vst [vmem:[%s1347_s8 + $0x1b8] sm:$0xff] %v287_v55  ;;  %v291_v57 = vld [vmem:[%s1342_s7 + $0x388] sm:$0xff]  ;;  %v293_v58 = vld [vmem:[%s1342_s7 + $0x390] sm:$0xff] }
  0x35   : > { %290 = vst [vmem:[%s1347_s8 + $0x1c0] sm:$0xff] %v289_v56  ;;  %v295_v59 = vld [vmem:[%s1342_s7 + $0x398] sm:$0xff]  ;;  %292 = vst [vmem:[%s1347_s8 + $0x1c8] sm:$0xff] %v291_v57  ;;  %v297_v60 = vld [vmem:[%s1342_s7 + $0x3c0] sm:$0xff] }
  0x36   : > { %294 = vst [vmem:[%s1347_s8 + $0x1d0] sm:$0xff] %v293_v58  ;;  %296 = vst [vmem:[%s1347_s8 + $0x1d8] sm:$0xff] %v295_v59  ;;  %v299_v61 = vld [vmem:[%s1342_s7 + $0x3c8] sm:$0xff]  ;;  %v301_v62 = vld [vmem:[%s1342_s7 + $0x3d0] sm:$0xff] }
  0x37   : > { %298 = vst [vmem:[%s1347_s8 + $0x1e0] sm:$0xff] %v297_v60  ;;  %300 = vst [vmem:[%s1347_s8 + $0x1e8] sm:$0xff] %v299_v61  ;;  %v303_v63 = vld [vmem:[%s1342_s7 + $0x3d8] sm:$0xff] }
  0x38   : > { %302 = vst [vmem:[%s1347_s8 + $0x1f0] sm:$0xff] %v301_v62  ;;  %304 = vst [vmem:[%s1347_s8 + $0x1f8] sm:$0xff] %v303_v63 }
  0x39 PF: > { %p1059_p7 = scmp.ge.s32.totalorder %s1259_s18, 1  ;;  %p309_p8 = scmp.lt.s32.totalorder %s1259_s18, 9 }
  0x3b   : > { %p310_p9 = pnand %p1059_p7, %p309_p8 }
  0x3c   : > { %s316_s9 = sand.u32 (!%p310_p9), 1, %s1235_s12   ;;  %v428_v0 = vld [vmem:[%s1599_s2] sm:$0x7] (!%p310_p9)  ;;  %v1261_v1 = vmov (!%p310_p9), 0   ;;  %p347_p10 = scmp.lt.s32.totalorder (!%p310_p9), %s1247_s15, 3 }
  0x3d   : > { %313 = sbr.rel (%p310_p9) target bundleno = 362 (0x16a), region = 51  ;;  %s1060_s21 = sshll.u32 (!%p310_p9), %s316_s9, 9  ;;  %786 = vmatprep.mubr.bf16.mxu0 (!%p310_p9), %v1261_v1  ;;  %827 = vmatprep.mubr.bf16.mxu1 (!%p310_p9), %v1261_v1 }
  0x3e   : > { %1188 = vset.pattern.permute.xlu0 (!%p310_p9), %v1261_v1  ;;  %s1483_s22 = scalar_lea.vmem (!%p310_p9), [#allocation2], %s1060_s21  ;;  %s1062_s27 = sshll.u32 (!%p310_p9), %s1243_s14, 3 }
  0x3f   : > { %v364_v2 = vld [vmem:[%s1483_s22] sm:$0xff] (!%p310_p9)  ;;  %v365_v4 = vld [vmem:[%s1483_s22 + $0x8] sm:$0xff] (!%p310_p9)  ;;  %431 = vperm.xlu0 (!%p310_p9), %1188, %v428_v0   ;;  %v366_v0 = vld [vmem:[%s1483_s22 + $0x10] sm:$0xff] (!%p310_p9)  ;;  %p1566_p11 = scmp.lt.s32.totalorder (!%p310_p9), %s1062_s27, 15 }
  0x40   : > { %v368_v3 = vld [vmem:[%s1483_s22 + $0x20] sm:$0xff] (!%p310_p9)  ;;  %v369_v6 = vld [vmem:[%s1483_s22 + $0x28] sm:$0xff] (!%p310_p9) }
  0x41   : > { %v1066_v5 = vcombine.high (!%p310_p9), %v364_v2, %v368_v3  ;;  %v1065_v7 = vcombine.low (!%p310_p9), %v364_v2, %v368_v3  ;;  %v372_v8 = vld [vmem:[%s1483_s22 + $0x40] sm:$0xff] (!%p310_p9)  ;;  %v1068_v10 = vcombine.high (!%p310_p9), %v365_v4, %v369_v6  ;;  %v1067_v11 = vcombine.low (!%p310_p9), %v365_v4, %v369_v6  ;;  %v373_v13 = vld [vmem:[%s1483_s22 + $0x48] sm:$0xff] (!%p310_p9)  ;;  %v370_v2 = vld [vmem:[%s1483_s22 + $0x30] sm:$0xff] (!%p310_p9) }
  0x42   : > { %v376_v9 = vld [vmem:[%s1483_s22 + $0x60] sm:$0xff] (!%p310_p9)  ;;  %v377_v14 = vld [vmem:[%s1483_s22 + $0x68] sm:$0xff] (!%p310_p9)  ;;  %v367_v3 = vld [vmem:[%s1483_s22 + $0x18] sm:$0xff] (!%p310_p9) }
  0x43   : > { %v1074_v12 = vcombine.high (!%p310_p9), %v372_v8, %v376_v9  ;;  %v380_v15 = vld [vmem:[%s1483_s22 + $0x80] sm:$0xff] (!%p310_p9)  ;;  %754 = vmatprep.subr.bf16.mxu0 (!%p310_p9), %v1066_v5  ;;  %v1076_v16 = vcombine.high (!%p310_p9), %v373_v13, %v377_v14  ;;  %v381_v18 = vld [vmem:[%s1483_s22 + $0x88] sm:$0xff] (!%p310_p9)  ;;  %795 = vmatprep.subr.bf16.mxu1 (!%p310_p9), %v1068_v10  ;;  %v1073_v20 = vcombine.low (!%p310_p9), %v372_v8, %v376_v9  ;;  %v371_v4 = vld [vmem:[%s1483_s22 + $0x38] sm:$0xff] (!%p310_p9) }
  0x44   : > { %v384_v17 = vld [vmem:[%s1483_s22 + $0xa0] sm:$0xff]  ;;  %v385_v19 = vld [vmem:[%s1483_s22 + $0xa8] sm:$0xff]  ;;  %755 = vmatpush1.bf16.msra.mxu0 %v1065_v7  ;;  %796 = vmatpush1.bf16.msra.mxu1 %v1067_v11  ;;  %v1075_v21 = vcombine.low %v373_v13, %v377_v14  ;;  %s1615_s15 = smov (!%p347_p10, %s1247_s15), 3  ;;  %v1070_v7 = vcombine.high %v366_v0, %v370_v2  ;;  %v1072_v8 = vcombine.high %v367_v3, %v371_v4  ;;  %v374_v9 = vld [vmem:[%s1483_s22 + $0x50] sm:$0xff]  ;;  %s1617_s27 = smov (!%p1566_p11, %s1062_s27), 15 }
  0x45   : > { %756 = vmatprep.subr.bf16.mxu0 %v1074_v12  ;;  %v1082_v22 = vcombine.high %v380_v15, %v384_v17  ;;  %797 = vmatprep.subr.bf16.mxu1 %v1076_v16  ;;  %v1084_v23 = vcombine.high %v381_v18, %v385_v19  ;;  %v388_v24 = vld [vmem:[%s1483_s22 + $0xc0] sm:$0xff]  ;;  %v389_v26 = vld [vmem:[%s1483_s22 + $0xc8] sm:$0xff]  ;;  %v1081_v28 = vcombine.low %v380_v15, %v384_v17  ;;  %s1061_s12 = sshll.u32 %s1615_s15, 1  ;;  %v378_v10 = vld [vmem:[%s1483_s22 + $0x70] sm:$0xff]  ;;  %s1063_s14 = sshll.u32 %s1615_s15, 4 }
  0x46   : > { %v392_v25 = vld [vmem:[%s1483_s22 + $0xe0] sm:$0xff]  ;;  %v393_v27 = vld [vmem:[%s1483_s22 + $0xe8] sm:$0xff]  ;;  %v1083_v29 = vcombine.low %v381_v18, %v385_v19  ;;  %s350_s26 = scalar_lea.vmem %s1597_s0, %s1061_s12  ;;  %v375_v11 = vld [vmem:[%s1483_s22 + $0x58] sm:$0xff]  ;;  %v1069_v14 = vcombine.low %v366_v0, %v370_v2  ;;  %v1071_v15 = vcombine.low %v367_v3, %v371_v4  ;;  %v1078_v16 = vcombine.high %v374_v9, %v378_v10  ;;  %s358_s29 = sadd.s32 %s1063_s14, %s1617_s27 }
  0x47   : > { %v1090_v30 = vcombine.high %v388_v24, %v392_v25  ;;  %v1092_v31 = vcombine.high %v389_v26, %v393_v27  ;;  %v396_v32 = vld [vmem:[%s1483_s22 + $0x100] sm:$0xff]  ;;  %v397_v34 = vld [vmem:[%s1483_s22 + $0x108] sm:$0xff]  ;;  %v1089_v36 = vcombine.low %v388_v24, %v392_v25  ;;  %v1091_v37 = vcombine.low %v389_v26, %v393_v27  ;;  %v379_v12 = vld [vmem:[%s1483_s22 + $0x78] sm:$0xff]  ;;  %s1064_s30 = sshll.u32 %s358_s29, 2 }
  0x48   : > { %757 = vmatpush1.bf16.msra.mxu0 %v1073_v20  ;;  %798 = vmatpush1.bf16.msra.mxu1 %v1075_v21  ;;  %v400_v33 = vld [vmem:[%s1483_s22 + $0x120] sm:$0xff]  ;;  %v401_v35 = vld [vmem:[%s1483_s22 + $0x128] sm:$0xff]  ;;  %v1080_v17 = vcombine.high %v375_v11, %v379_v12  ;;  %v382_v18 = vld [vmem:[%s1483_s22 + $0x90] sm:$0xff]  ;;  %s360_s6 = scalar_lea.vmem %s1600_s3, %s1064_s30 }
  0x49   : > { %758 = vmatprep.subr.bf16.mxu0 %v1082_v22  ;;  %799 = vmatprep.subr.bf16.mxu1 %v1084_v23  ;;  %v1098_v38 = vcombine.high %v396_v32, %v400_v33  ;;  %v1100_v39 = vcombine.high %v397_v34, %v401_v35  ;;  %v404_v40 = vld [vmem:[%s1483_s22 + $0x140] sm:$0xff]  ;;  %v405_v42 = vld [vmem:[%s1483_s22 + $0x148] sm:$0xff]  ;;  %v1097_v44 = vcombine.low %v396_v32, %v400_v33  ;;  %v386_v19 = vld [vmem:[%s1483_s22 + $0xb0] sm:$0xff] }
  0x4a   : > { %v408_v41 = vld [vmem:[%s1483_s22 + $0x160] sm:$0xff]  ;;  %v409_v43 = vld [vmem:[%s1483_s22 + $0x168] sm:$0xff]  ;;  %v1099_v45 = vcombine.low %v397_v34, %v401_v35  ;;  %v383_v20 = vld [vmem:[%s1483_s22 + $0x98] sm:$0xff]  ;;  %v1077_v22 = vcombine.low %v374_v9, %v378_v10  ;;  %v1079_v23 = vcombine.low %v375_v11, %v379_v12  ;;  %v1086_v24 = vcombine.high %v382_v18, %v386_v19 }
  0x4b   : > { %v1106_v46 = vcombine.high %v404_v40, %v408_v41  ;;  %v1108_v47 = vcombine.high %v405_v42, %v409_v43  ;;  %v412_v48 = vld [vmem:[%s1483_s22 + $0x180] sm:$0xff]  ;;  %v413_v50 = vld [vmem:[%s1483_s22 + $0x188] sm:$0xff]  ;;  %v1105_v52 = vcombine.low %v404_v40, %v408_v41  ;;  %v1107_v53 = vcombine.low %v405_v42, %v409_v43  ;;  %v387_v21 = vld [vmem:[%s1483_s22 + $0xb8] sm:$0xff] }
  0x4c   : > { %759 = vmatpush1.bf16.msra.mxu0 %v1081_v28  ;;  %800 = vmatpush1.bf16.msra.mxu1 %v1083_v29  ;;  %v416_v49 = vld [vmem:[%s1483_s22 + $0x1a0] sm:$0xff]  ;;  %v417_v51 = vld [vmem:[%s1483_s22 + $0x1a8] sm:$0xff]  ;;  %v1088_v25 = vcombine.high %v383_v20, %v387_v21  ;;  %v390_v26 = vld [vmem:[%s1483_s22 + $0xd0] sm:$0xff] }
  0x4d   : > { %760 = vmatprep.subr.bf16.mxu0 %v1090_v30  ;;  %801 = vmatprep.subr.bf16.mxu1 %v1092_v31  ;;  %v1114_v54 = vcombine.high %v412_v48, %v416_v49  ;;  %v1116_v55 = vcombine.high %v413_v50, %v417_v51  ;;  %v420_v56 = vld [vmem:[%s1483_s22 + $0x1c0] sm:$0xff]  ;;  %v421_v58 = vld [vmem:[%s1483_s22 + $0x1c8] sm:$0xff]  ;;  %v1113_v60 = vcombine.low %v412_v48, %v416_v49  ;;  %v394_v27 = vld [vmem:[%s1483_s22 + $0xf0] sm:$0xff] }
  0x4e   : > { %v424_v57 = vld [vmem:[%s1483_s22 + $0x1e0] sm:$0xff]  ;;  %v425_v59 = vld [vmem:[%s1483_s22 + $0x1e8] sm:$0xff]  ;;  %v1115_v61 = vcombine.low %v413_v50, %v417_v51  ;;  %v391_v28 = vld [vmem:[%s1483_s22 + $0xd8] sm:$0xff]  ;;  %v1085_v30 = vcombine.low %v382_v18, %v386_v19  ;;  %v1087_v31 = vcombine.low %v383_v20, %v387_v21  ;;  %v1094_v32 = vcombine.high %v390_v26, %v394_v27 }
  0x4f   : > { %v1122_v62 = vcombine.high %v420_v56, %v424_v57  ;;  %v1124_v63 = vcombine.high %v421_v58, %v425_v59  ;;  %v1121_v5 = vcombine.low %v420_v56, %v424_v57  ;;  %v1123_v6 = vcombine.low %v421_v58, %v425_v59  ;;  %v1533_v13 = vld [vmem:[%s350_s26] sm:$0x3]  ;;  %v395_v29 = vld [vmem:[%s1483_s22 + $0xf8] sm:$0xff]  ;;  %v398_v34 = vld [vmem:[%s1483_s22 + $0x110] sm:$0xff] }
  0x50   : > { %761 = vmatpush1.bf16.msra.mxu0 %v1089_v36  ;;  %802 = vmatpush1.bf16.msra.mxu1 %v1091_v37  ;;  %v1096_v33 = vcombine.high %v391_v28, %v395_v29  ;;  %v402_v35 = vld [vmem:[%s1483_s22 + $0x130] sm:$0xff]  ;;  %v399_v36 = vld [vmem:[%s1483_s22 + $0x118] sm:$0xff] }
  0x51   : > { %762 = vmatprep.subr.bf16.mxu0 %v1098_v38  ;;  %803 = vmatprep.subr.bf16.mxu1 %v1100_v39  ;;  %v403_v37 = vld [vmem:[%s1483_s22 + $0x138] sm:$0xff]  ;;  %v1093_v38 = vcombine.low %v390_v26, %v394_v27  ;;  %v1102_v39 = vcombine.high %v398_v34, %v402_v35  ;;  %v406_v41 = vld [vmem:[%s1483_s22 + $0x150] sm:$0xff] }
  0x52   : > { %v1104_v40 = vcombine.high %v399_v36, %v403_v37  ;;  %v410_v42 = vld [vmem:[%s1483_s22 + $0x170] sm:$0xff]  ;;  %v407_v43 = vld [vmem:[%s1483_s22 + $0x158] sm:$0xff] }
  0x53   : > { %v414_v49 = vld [vmem:[%s1483_s22 + $0x190] sm:$0xff]  ;;  %v415_v51 = vld [vmem:[%s1483_s22 + $0x198] sm:$0xff] }
  0x54   : > { %763 = vmatpush1.bf16.msra.mxu0 %v1097_v44  ;;  %804 = vmatpush1.bf16.msra.mxu1 %v1099_v45  ;;  %v411_v44 = vld [vmem:[%s1483_s22 + $0x178] sm:$0xff]  ;;  %v1101_v45 = vcombine.low %v398_v34, %v402_v35  ;;  %v418_v50 = vld [vmem:[%s1483_s22 + $0x1b0] sm:$0xff] }
  0x55   : > { %764 = vmatprep.subr.bf16.mxu0 %v1106_v46  ;;  %805 = vmatprep.subr.bf16.mxu1 %v1108_v47  ;;  %v1103_v46 = vcombine.low %v399_v36, %v403_v37  ;;  %v1110_v47 = vcombine.high %v406_v41, %v410_v42  ;;  %v1112_v48 = vcombine.high %v407_v43, %v411_v44  ;;  %v422_v57 = vld [vmem:[%s1483_s22 + $0x1d0] sm:$0xff]  ;;  %v423_v59 = vld [vmem:[%s1483_s22 + $0x1d8] sm:$0xff] }
  0x56   : > { %v426_v58 = vld [vmem:[%s1483_s22 + $0x1f0] sm:$0xff] }
  0x57   : > { %v1125_v2 = vcombine.low %v422_v57, %v426_v58 }
  0x58   : > { %765 = vmatpush1.bf16.msra.mxu0 %v1105_v52  ;;  %806 = vmatpush1.bf16.msra.mxu1 %v1107_v53  ;;  %v419_v52 = vld [vmem:[%s1483_s22 + $0x1b8] sm:$0xff]  ;;  %v1109_v53 = vcombine.low %v406_v41, %v410_v42 }
  0x59   : > { %766 = vmatprep.subr.bf16.mxu0 %v1114_v54  ;;  %807 = vmatprep.subr.bf16.mxu1 %v1116_v55  ;;  %v1111_v54 = vcombine.low %v407_v43, %v411_v44  ;;  %v1118_v55 = vcombine.high %v414_v49, %v418_v50  ;;  %v1120_v56 = vcombine.high %v415_v51, %v419_v52 }
  0x5c   : > { %767 = vmatpush1.bf16.msra.mxu0 %v1113_v60  ;;  %808 = vmatpush1.bf16.msra.mxu1 %v1115_v61  ;;  %v427_v60 = vld [vmem:[%s1483_s22 + $0x1f8] sm:$0xff]  ;;  %v1117_v61 = vcombine.low %v414_v49, %v418_v50 }
  0x5d   : > { %768 = vmatprep.subr.bf16.mxu0 %v1122_v62  ;;  %809 = vmatprep.subr.bf16.mxu1 %v1124_v63  ;;  %v1119_v62 = vcombine.low %v415_v51, %v419_v52  ;;  %v1126_v63 = vcombine.high %v422_v57, %v426_v58  ;;  %v1128_v0 = vcombine.high %v423_v59, %v427_v60 }
  0x5e   : > { %v1127_v3 = vcombine.low %v423_v59, %v427_v60 }
  0x60   : > { %769 = vmatpush1.bf16.msra.mxu0 %v1121_v5  ;;  %810 = vmatpush1.bf16.msra.mxu1 %v1123_v6 }
  0x61   : > { %836 = vmatprep.subr.bf16.mxu0 %v1070_v7  ;;  %877 = vmatprep.subr.bf16.mxu1 %v1072_v8 }
  0x63   : > { %787 = vmatmul.mubr.bf16.vlgmr.msra.gmra.mrb[0].mxu0 %v1533_v13  ;;  %828 = vmatmul.mubr.bf16.vlgmr.msra.gmra.mrb[0].mxu1 %v1533_v13 }
  0x64   : > { %837 = vmatpush1.bf16.msra.mxu0 %v1069_v14  ;;  %878 = vmatpush1.bf16.msra.mxu1 %v1071_v15 }
  0x65   : > { %838 = vmatprep.subr.bf16.mxu0 %v1078_v16  ;;  %879 = vmatprep.subr.bf16.mxu1 %v1080_v17 }
  0x66   : > { %868 = vmatprep.mubr.bf16.mxu0 %v1261_v1  ;;  %909 = vmatprep.mubr.bf16.mxu1 %v1261_v1  ;;  %v1095_v1 = vcombine.low %v391_v28, %v395_v29 }
  0x68   : > { %839 = vmatpush1.bf16.msra.mxu0 %v1077_v22  ;;  %880 = vmatpush1.bf16.msra.mxu1 %v1079_v23 }
  0x69   : > { %840 = vmatprep.subr.bf16.mxu0 %v1086_v24  ;;  %881 = vmatprep.subr.bf16.mxu1 %v1088_v25 }
  0x6c   : > { %841 = vmatpush1.bf16.msra.mxu0 %v1085_v30  ;;  %882 = vmatpush1.bf16.msra.mxu1 %v1087_v31 }
  0x6d   : > { %842 = vmatprep.subr.bf16.mxu0 %v1094_v32  ;;  %883 = vmatprep.subr.bf16.mxu1 %v1096_v33 }
  0x70   : > { %843 = vmatpush1.bf16.msra.mxu0 %v1093_v38  ;;  %884 = vmatpush1.bf16.msra.mxu1 %v1095_v1 }
  0x71   : > { %844 = vmatprep.subr.bf16.mxu0 %v1102_v39  ;;  %885 = vmatprep.subr.bf16.mxu1 %v1104_v40 }
  0x74   : > { %845 = vmatpush1.bf16.msra.mxu0 %v1101_v45  ;;  %886 = vmatpush1.bf16.msra.mxu1 %v1103_v46 }
  0x75   : > { %846 = vmatprep.subr.bf16.mxu0 %v1110_v47  ;;  %887 = vmatprep.subr.bf16.mxu1 %v1112_v48 }
  0x78   : > { %847 = vmatpush1.bf16.msra.mxu0 %v1109_v53  ;;  %888 = vmatpush1.bf16.msra.mxu1 %v1111_v54 }
  0x79   : > { %848 = vmatprep.subr.bf16.mxu0 %v1118_v55  ;;  %889 = vmatprep.subr.bf16.mxu1 %v1120_v56 }
  0x7c   : > { %849 = vmatpush1.bf16.msra.mxu0 %v1117_v61  ;;  %890 = vmatpush1.bf16.msra.mxu1 %v1119_v62 }
  0x7d   : > { %850 = vmatprep.subr.bf16.mxu0 %v1126_v63  ;;  %891 = vmatprep.subr.bf16.mxu1 %v1128_v0 }
  0x80   : > { %851 = vmatpush1.bf16.msra.mxu0 %v1125_v2  ;;  %892 = vmatpush1.bf16.msra.mxu1 %v1127_v3 }
  0x83   : > { %869 = vmatmul.mubr.bf16.vlgmr.msra.gmra.mrb[4].mxu0 %v1533_v13  ;;  %910 = vmatmul.mubr.bf16.vlgmr.msra.gmra.mrb[4].mxu1 %v1533_v13 }
  0xbe   : > { %v432_v4 = vpop.permute.xlu0 %431 }
 0x136   : > { %v788_v5 = vpop.f32.mrb[0].mxu0  ;;  %v829_v6 = vpop.f32.mrb[0].mxu1 }
 0x137   : > { %v789_v7 = vadd.f32 %v788_v5, %v432_v4  ;;  %v790_v8 = vpop.f32.mrb[1].mxu0  ;;  %v830_v9 = vadd.f32 %v829_v6, %v432_v4  ;;  %v831_v11 = vpop.f32.mrb[1].mxu1 }
 0x138   : > { %v791_v10 = vadd.f32 %v790_v8, %v432_v4  ;;  %v792_v12 = vpop.f32.mrb[2].mxu0  ;;  %v832_v14 = vadd.f32 %v831_v11, %v432_v4  ;;  %v833_v15 = vpop.f32.mrb[2].mxu1 }
 0x139   : > { %1189 = vtanh.f32 %v789_v7  ;;  %v793_v13 = vpop.f32.mrb[3].mxu0  ;;  %v834_v16 = vpop.f32.mrb[3].mxu1 }
 0x13a   : > { %1191 = vtanh.f32 %v830_v9 }
 0x13b   : > { %1193 = vtanh.f32 %v791_v10 }
 0x13c   : > { %1195 = vtanh.f32 %v832_v14 }
 0x143   : > { %v1190_v17 = vpop.eup %1189 }
 0x144   : > { %v1192_v18 = vpop.eup %1191 }
 0x145   : > { %v1194_v19 = vpop.eup %1193 }
 0x146   : > { %v1196_v20 = vpop.eup %1195  ;;  %v934_v21 = vcombine.low %v1190_v17, %v1194_v19 }
 0x147   : > { %v935_v22 = vcombine.low %v1192_v18, %v1196_v20 }
 0x148   : > { %942 = vst [vmem:[%s360_s6] sm:$0x77] %v934_v21 }
 0x149   : > { %943 = vst [vmem:[%s360_s6 + $0x8] sm:$0x77] %v935_v22 }
 0x156   : > { %v870_v23 = vpop.f32.mrb[4].mxu0  ;;  %v911_v25 = vpop.f32.mrb[4].mxu1 }
 0x157   : > { %v871_v24 = vadd.f32 %v870_v23, %v432_v4  ;;  %v872_v26 = vpop.f32.mrb[5].mxu0  ;;  %v912_v27 = vadd.f32 %v911_v25, %v432_v4  ;;  %v913_v29 = vpop.f32.mrb[5].mxu1 }
 0x158   : > { %v873_v28 = vadd.f32 %v872_v26, %v432_v4  ;;  %v874_v30 = vpop.f32.mrb[6].mxu0  ;;  %v914_v31 = vadd.f32 %v913_v29, %v432_v4  ;;  %v915_v32 = vpop.f32.mrb[6].mxu1 }
 0x159   : > { %1197 = vtanh.f32 %v871_v24  ;;  %v875_v33 = vpop.f32.mrb[7].mxu0  ;;  %v916_v34 = vpop.f32.mrb[7].mxu1 }
 0x15a   : > { %1199 = vtanh.f32 %v912_v27 }
 0x15b   : > { %1201 = vtanh.f32 %v873_v28 }
 0x15c   : > { %1203 = vtanh.f32 %v914_v31 }
 0x163   : > { %v1198_v35 = vpop.eup %1197 }
 0x164   : > { %v1200_v36 = vpop.eup %1199 }
 0x165   : > { %v1202_v37 = vpop.eup %1201 }
 0x166   : > { %v1204_v38 = vpop.eup %1203  ;;  %v936_v1 = vcombine.low %v1198_v35, %v1202_v37 }
 0x167   : > { %v937_v39 = vcombine.low %v1200_v36, %v1204_v38 }
 0x168   : > { %944 = vst [vmem:[%s360_s6 + $0x10] sm:$0x77] %v936_v1 }
 0x169   : > { %945 = vst [vmem:[%s360_s6 + $0x18] sm:$0x77] %v937_v39 }
 0x16a PF: > { %s13_s18 = sadd.s32 1, %s1259_s18   ;;  %s1602_s12 = smov %s1239_s13 }
 0x16b   : > { %p10_p12 = scmp.ge.s32.totalorder %s13_s18, 10   ;;  %s1603_s13 = smov %s1333_s25 }
 0x16c   : > { %s1604_s14 = smov %s1251_s16  ;;  %s1605_s15 = smov %s1255_s17 }
 0x16d   : > { %s1606_s16 = smov %s1609_s19  ;;  %s1607_s17 = smov %s1613_s20 }
 0x16e   :  { %12 = sbr.rel (!%p10_p12) target bundleno = 4 (0x4), region = 93 }

</bundles_post_ra>
